<compile_context>
chip_gen: v7x
topology: tpu7x:2x2x1
jax: 0.10.0
libtpu: 0.0.40
codegen_flags: <defaults>
</compile_context>

<pallas_src>
import functools

import jax
import jax.numpy as jnp
import numpy as np
from jax.experimental import pallas as pl
from jax.experimental.pallas import tpu as pltpu


NUM_LAYERS = 5
NUM_CLASSES = 40
RELU_LAYERS = (1, 2)       # relu_list
REZERO_LAYERS = (0, 3)     # re_list; with rezero=[1,0,0,1,0] the residual
                           # y[i+1-rezero[i]] is always the layer's own input.
LANE = 128


def _round_up(n, m=LANE):
    return ((n + m - 1) // m) * m


# ------------------------------ Pallas kernel --------------------------------

def _sage_re_fused_kernel(alpha_ref, adj_ref, x_ref,
                          w0, b0, w1, b1, w2, b2, w3, b3, w4, b4,
                          o_ref, *, num_classes, relu_layers, rezero_layers):
    """Whole SAGE_Re forward fused on-chip.

    adj_ref : (Np, Np)        bf16  row-normalized adjacency (resident once)
    x_ref   : (Np, C0p)       f32   zero-padded input features
    w_i     : layers 0..3 -> (2*Cin_p, Cout_p) bf16 == vstack([W, W_root])
              layer 4     -> (Cin_p, 2*Cout_p) bf16 == hstack([W, W_root])
    b_i     : (1, Cout_p)     f32   zero-padded bias
    alpha   : (NUM_LAYERS,)   f32   ReZero scales (SMEM)
    o_ref   : (Np, Cout_p_last) f32 masked log_softmax of the logits
    """
    adj = adj_ref[...]                        # bf16, stays resident on-chip
    x = x_ref[...]                            # f32 activations

    w_refs = (w0, w1, w2, w3)
    b_refs = (b0, b1, b2, b3)

    # ---- layers 0..3: out = concat([adj@x, x]) @ [W ; W_root] + b ----------
    for i in range(NUM_LAYERS - 1):
        x_bf = x.astype(jnp.bfloat16)                         # cast once/layer
        agg = jnp.dot(adj, x_bf, preferred_element_type=jnp.float32)
        cat = jnp.concatenate([agg.astype(jnp.bfloat16), x_bf], axis=-1)
        out = jnp.dot(cat, w_refs[i][...], preferred_element_type=jnp.float32)
        out = out + b_refs[i][...]                            # fp32 epilogue
        if i in relu_layers:
            out = jnp.maximum(out, 0.0)
        if i in rezero_layers:
            out = x + alpha_ref[i] * out          # ReZero: residual == input
        x = out

    # ---- layer 4 (256 -> 40): reorder to adj @ (x @ W) so the N^2 matmul ---
    # contracts over the padded class dim (128) instead of 256.
    x_bf = x.astype(jnp.bfloat16)
    xw_cat = jnp.dot(x_bf, w4[...], preferred_element_type=jnp.float32)
    half = w4.shape[1] // 2                       # 128-aligned lane split
    xw, xwr = xw_cat[:, :half], xw_cat[:, half:]
    logits = jnp.dot(adj, xw.astype(jnp.bfloat16),
                     preferred_element_type=jnp.float32) + xwr + b4[...]
    if (NUM_LAYERS - 1) in relu_layers:   # not taken for this model config
        logits = jnp.maximum(logits, 0.0)

    # ---- fused masked log_softmax over the first num_classes lanes ---------
    lane = jax.lax.broadcasted_iota(jnp.int32, logits.shape, 1)
    valid = lane < num_classes
    z = jnp.where(valid, logits, -jnp.inf)
    m = jnp.max(z, axis=-1, keepdims=True)
    e = jnp.where(valid, jnp.exp(z - m), 0.0)
    lse = jnp.log(jnp.sum(e, axis=-1, keepdims=True))
    o_ref[...] = jnp.where(valid, z - m - lse, 0.0).astype(o_ref.dtype)


# ------------------------------- JAX wrapper ----------------------------------

def sage_re_forward(x, adj_mean, params, alpha):
    """Mirrors SAGE_Re.forward (inference mode: F.dropout is identity)."""
    n, c_in = x.shape
    n_pad = _round_up(n)            # lane-dense adjacency rows + aligned K dims
    c0p = _round_up(c_in)

    # TODO(synk): at real ogbn-arxiv scale (N ~ 169K) the dense (N, N) adjacency
    # and the fully-VMEM-resident fused kernel do not fit; that regime needs a
    # row-tiled per-layer (or sparse-gather) kernel instead.

    x_pad = jnp.zeros((n_pad, c0p), jnp.float32).at[:n, :c_in].set(
        x.astype(jnp.float32))
    adj_pad = jnp.zeros((n_pad, n_pad), jnp.float32).at[:n, :n].set(
        adj_mean.astype(jnp.float32)).astype(jnp.bfloat16)

    packed = []
    for i, (w, wr, b) in enumerate(params):
        ci, co = w.shape
        cip, cop = _round_up(ci), _round_up(co)
        w_p = jnp.zeros((cip, cop), jnp.float32).at[:ci, :co].set(w)
        wr_p = jnp.zeros((cip, cop), jnp.float32).at[:ci, :co].set(wr)
        if i < NUM_LAYERS - 1:
            w_stack = jnp.concatenate([w_p, wr_p], axis=0)   # [W ; W_root]
        else:
            w_stack = jnp.concatenate([w_p, wr_p], axis=1)   # [W | W_root]
        b_p = jnp.zeros((1, cop), jnp.float32).at[0, :co].set(b)
        packed.append((w_stack.astype(jnp.bfloat16), b_p))

    c_last_p = _round_up(params[-1][0].shape[1])

    vmem = pl.BlockSpec(memory_space=pltpu.MemorySpace.VMEM)
    smem = pl.BlockSpec(memory_space=pltpu.MemorySpace.SMEM)

    args = [jnp.asarray(alpha, jnp.float32), adj_pad, x_pad]
    in_specs = [smem, vmem, vmem]
    for w_s, b_p in packed:
        args += [w_s, b_p]
        in_specs += [vmem, vmem]

    kernel = functools.partial(
        _sage_re_fused_kernel,
        num_classes=NUM_CLASSES,
        relu_layers=RELU_LAYERS,
        rezero_layers=REZERO_LAYERS,
    )
    out_pad = pl.pallas_call(
        kernel,
        out_shape=jax.ShapeDtypeStruct((n_pad, c_last_p), jnp.float32),
        in_specs=in_specs,
        out_specs=vmem,
    )(*args)
    return out_pad[:n, :NUM_CLASSES]


# ------------------------------ parameter init --------------------------------

def glorot(key, shape):
    fan_in, fan_out = shape
    a = jnp.sqrt(6.0 / (fan_in + fan_out))
    return jax.random.uniform(key, shape, jnp.float32, -a, a)


def init_sage_re_params(key, in_channels):
    channels = [in_channels, in_channels, 256, 256, 256, NUM_CLASSES]
    params = []
    for i in range(NUM_LAYERS):
        key, k1, k2 = jax.random.split(key, 3)
        w = glorot(k1, (channels[i], channels[i + 1]))       # l_SAGE.weight
        wr = glorot(k2, (channels[i], channels[i + 1]))      # l_SAGE.root_weight
        b = jnp.zeros((channels[i + 1],), jnp.float32)       # zeros(bias)
        params.append((w, wr, b))
    alpha = jnp.zeros((NUM_LAYERS,), jnp.float32)            # zeros(alpha)
    return params, alpha


# -------------------------- pure-JAX reference check ---------------------------

def sage_re_reference(x, adj_mean, params, alpha):
    """SAGE_Re.forward in plain JAX with the same bf16-in / fp32-accumulate
    precision choices as the kernel (validation only)."""
    adj_bf = adj_mean.astype(jnp.bfloat16)
    rezero = (1, 0, 0, 1, 0)
    y = [x]
    for i in range(NUM_LAYERS):
        w, wr, b = params[i]
        w_bf, wr_bf = w.astype(jnp.bfloat16), wr.astype(jnp.bfloat16)
        x_bf = x.astype(jnp.bfloat16)
        if i < NUM_LAYERS - 1:
            agg = jnp.dot(adj_bf, x_bf, preferred_element_type=jnp.float32)
            tmp = jnp.dot(agg.astype(jnp.bfloat16), w_bf,
                          preferred_element_type=jnp.float32)
        else:   # kernel reorders the last layer: adj @ (x @ W)  (associativity)
            xw = jnp.dot(x_bf, w_bf, preferred_element_type=jnp.float32)
            tmp = jnp.dot(adj_bf, xw.astype(jnp.bfloat16),
                          preferred_element_type=jnp.float32)
        tmp = tmp + jnp.dot(x_bf, wr_bf, preferred_element_type=jnp.float32)
        tmp = tmp + b
        if i in RELU_LAYERS:
            tmp = jnp.maximum(tmp, 0.0)
        if i in REZERO_LAYERS:
            x = y[i + 1 - rezero[i]] + alpha[i] * tmp
        else:
            x = tmp
        # F.dropout is identity in eval mode.
        y.append(x)
    return jax.nn.log_softmax(x, axis=-1)


# ------------------------------------ main -------------------------------------

if __name__ == "__main__":
    key = jax.random.PRNGKey(0)
    n_nodes = 64
    in_channels = 32
    k_adj, k_x, k_p, k_a, k_b = jax.random.split(key, 5)

    # Deterministic undirected 0/1 adjacency (no self-loops), row-mean-normalized
    # so adj_mean @ x == SparseTensor(adj_0).matmul(x, reduce='mean').
    a = (jax.random.uniform(k_adj, (n_nodes, n_nodes)) < 0.1).astype(jnp.float32)
    adj = jnp.maximum(a, a.T)
    adj = adj * (1.0 - jnp.eye(n_nodes, dtype=jnp.float32))
    deg = adj.sum(axis=1)
    adj_mean = adj / jnp.maximum(deg, 1.0)[:, None]

    x = jax.random.normal(k_x, (n_nodes, in_channels), jnp.float32)
    params, alpha = init_sage_re_params(k_p, in_channels)

    # Use non-zero alpha / biases so the ReZero and bias paths are actually
    # exercised (the module initializes them to zero but learns them).
    alpha = 0.1 * jax.random.normal(k_a, (NUM_LAYERS,), jnp.float32)
    params = [
        (w, wr, 0.1 * jax.random.normal(jax.random.fold_in(k_b, i),
                                        b.shape, jnp.float32))
        for i, (w, wr, b) in enumerate(params)
    ]

    fwd = jax.jit(sage_re_forward)
    out = jax.block_until_ready(fwd(x, adj_mean, params, alpha))

    assert out.shape == (n_nodes, NUM_CLASSES)
    assert out.dtype == jnp.float32
    assert bool(jnp.all(jnp.isfinite(out)))

    ref = jax.block_until_ready(sage_re_reference(x, adj_mean, params, alpha))
    np.testing.assert_allclose(np.asarray(out), np.asarray(ref),
                               atol=2e-2, rtol=2e-2)
    print("KERNEL_OK")
</pallas_src>

<mosaic_0001>
module attributes {stable_mosaic.version = 11 : i64} {
  func.func @_sage_re_fused_kernel(%arg0: memref<5xf32, #tpu.memory_space<smem>>, %arg1: memref<128x128xbf16, #tpu.memory_space<vmem>>, %arg2: memref<128x128xf32, #tpu.memory_space<vmem>>, %arg3: memref<256x128xbf16, #tpu.memory_space<vmem>>, %arg4: memref<1x128xf32, #tpu.memory_space<vmem>>, %arg5: memref<256x256xbf16, #tpu.memory_space<vmem>>, %arg6: memref<1x256xf32, #tpu.memory_space<vmem>>, %arg7: memref<512x256xbf16, #tpu.memory_space<vmem>>, %arg8: memref<1x256xf32, #tpu.memory_space<vmem>>, %arg9: memref<512x256xbf16, #tpu.memory_space<vmem>>, %arg10: memref<1x256xf32, #tpu.memory_space<vmem>>, %arg11: memref<256x256xbf16, #tpu.memory_space<vmem>>, %arg12: memref<1x128xf32, #tpu.memory_space<vmem>>, %arg13: memref<128x128xf32, #tpu.memory_space<vmem>>) attributes {dimension_semantics = [], scalar_prefetch = 0 : i64, scratch_operands = 0 : i64, tpu.core_type = #tpu.core_type<tc>} {
    %c0 = arith.constant 0 : index
    %c0_0 = arith.constant 0 : index
    %0 = vector.load %arg1[%c0, %c0_0] : memref<128x128xbf16, #tpu.memory_space<vmem>>, vector<128x128xbf16>
    %c0_1 = arith.constant 0 : index
    %c0_2 = arith.constant 0 : index
    %1 = vector.load %arg2[%c0_1, %c0_2] : memref<128x128xf32, #tpu.memory_space<vmem>>, vector<128x128xf32>
    %2 = arith.truncf %1 : vector<128x128xf32> to vector<128x128xbf16>
    %cst = arith.constant dense<0.000000e+00> : vector<128x128xf32>
    %3 = tpu.matmul %0, %2, %cst {dimension_numbers = #tpu.dot_dimension_numbers<[1], [0], [0], [1], [0, 0, 1, 1], [], []>} : vector<128x128xbf16>, vector<128x128xbf16>, vector<128x128xf32> -> vector<128x128xf32>
    %4 = arith.truncf %3 : vector<128x128xf32> to vector<128x128xbf16>
    %5 = tpu.concatenate %4, %2 in 1 : vector<128x128xbf16>, vector<128x128xbf16> -> vector<128x256xbf16>
    %c0_3 = arith.constant 0 : index
    %c0_4 = arith.constant 0 : index
    %6 = vector.load %arg3[%c0_3, %c0_4] : memref<256x128xbf16, #tpu.memory_space<vmem>>, vector<256x128xbf16>
    %cst_5 = arith.constant dense<0.000000e+00> : vector<128x128xf32>
    %7 = tpu.matmul %5, %6, %cst_5 {dimension_numbers = #tpu.dot_dimension_numbers<[1], [0], [0], [1], [0, 0, 1, 1], [], []>} : vector<128x256xbf16>, vector<256x128xbf16>, vector<128x128xf32> -> vector<128x128xf32>
    %c0_6 = arith.constant 0 : index
    %c0_7 = arith.constant 0 : index
    %8 = vector.load %arg4[%c0_6, %c0_7] : memref<1x128xf32, #tpu.memory_space<vmem>>, vector<1x128xf32>
    %9 = vector.broadcast %8 : vector<1x128xf32> to vector<128x128xf32>
    %10 = arith.addf %7, %9 : vector<128x128xf32>
    %c0_8 = arith.constant 0 : index
    %11 = memref.load %arg0[%c0_8] : memref<5xf32, #tpu.memory_space<smem>>
    %12 = vector.broadcast %11 : f32 to vector<128x128xf32>
    %13 = arith.mulf %12, %10 : vector<128x128xf32>
    %14 = arith.addf %1, %13 : vector<128x128xf32>
    %15 = arith.truncf %14 : vector<128x128xf32> to vector<128x128xbf16>
    %cst_9 = arith.constant dense<0.000000e+00> : vector<128x128xf32>
    %16 = tpu.matmul %0, %15, %cst_9 {dimension_numbers = #tpu.dot_dimension_numbers<[1], [0], [0], [1], [0, 0, 1, 1], [], []>} : vector<128x128xbf16>, vector<128x128xbf16>, vector<128x128xf32> -> vector<128x128xf32>
    %17 = arith.truncf %16 : vector<128x128xf32> to vector<128x128xbf16>
    %18 = tpu.concatenate %17, %15 in 1 : vector<128x128xbf16>, vector<128x128xbf16> -> vector<128x256xbf16>
    %c0_10 = arith.constant 0 : index
    %c0_11 = arith.constant 0 : index
    %19 = vector.load %arg5[%c0_10, %c0_11] : memref<256x256xbf16, #tpu.memory_space<vmem>>, vector<256x256xbf16>
    %cst_12 = arith.constant dense<0.000000e+00> : vector<128x256xf32>
    %20 = tpu.matmul %18, %19, %cst_12 {dimension_numbers = #tpu.dot_dimension_numbers<[1], [0], [0], [1], [0, 0, 1, 1], [], []>} : vector<128x256xbf16>, vector<256x256xbf16>, vector<128x256xf32> -> vector<128x256xf32>
    %c0_13 = arith.constant 0 : index
    %c0_14 = arith.constant 0 : index
    %21 = vector.load %arg6[%c0_13, %c0_14] : memref<1x256xf32, #tpu.memory_space<vmem>>, vector<1x256xf32>
    %22 = vector.broadcast %21 : vector<1x256xf32> to vector<128x256xf32>
    %23 = arith.addf %20, %22 : vector<128x256xf32>
    %cst_15 = arith.constant 0.000000e+00 : f32
    %24 = vector.broadcast %cst_15 : f32 to vector<128x256xf32>
    %25 = arith.maximumf %23, %24 : vector<128x256xf32>
    %26 = arith.truncf %25 : vector<128x256xf32> to vector<128x256xbf16>
    %cst_16 = arith.constant dense<0.000000e+00> : vector<128x256xf32>
    %27 = tpu.matmul %0, %26, %cst_16 {dimension_numbers = #tpu.dot_dimension_numbers<[1], [0], [0], [1], [0, 0, 1, 1], [], []>} : vector<128x128xbf16>, vector<128x256xbf16>, vector<128x256xf32> -> vector<128x256xf32>
    %28 = arith.truncf %27 : vector<128x256xf32> to vector<128x256xbf16>
    %29 = tpu.concatenate %28, %26 in 1 : vector<128x256xbf16>, vector<128x256xbf16> -> vector<128x512xbf16>
    %c0_17 = arith.constant 0 : index
    %c0_18 = arith.constant 0 : index
    %30 = vector.load %arg7[%c0_17, %c0_18] : memref<512x256xbf16, #tpu.memory_space<vmem>>, vector<512x256xbf16>
    %cst_19 = arith.constant dense<0.000000e+00> : vector<128x256xf32>
    %31 = tpu.matmul %29, %30, %cst_19 {dimension_numbers = #tpu.dot_dimension_numbers<[1], [0], [0], [1], [0, 0, 1, 1], [], []>} : vector<128x512xbf16>, vector<512x256xbf16>, vector<128x256xf32> -> vector<128x256xf32>
    %c0_20 = arith.constant 0 : index
    %c0_21 = arith.constant 0 : index
    %32 = vector.load %arg8[%c0_20, %c0_21] : memref<1x256xf32, #tpu.memory_space<vmem>>, vector<1x256xf32>
    %33 = vector.broadcast %32 : vector<1x256xf32> to vector<128x256xf32>
    %34 = arith.addf %31, %33 : vector<128x256xf32>
    %cst_22 = arith.constant 0.000000e+00 : f32
    %35 = vector.broadcast %cst_22 : f32 to vector<128x256xf32>
    %36 = arith.maximumf %34, %35 : vector<128x256xf32>
    %37 = arith.truncf %36 : vector<128x256xf32> to vector<128x256xbf16>
    %cst_23 = arith.constant dense<0.000000e+00> : vector<128x256xf32>
    %38 = tpu.matmul %0, %37, %cst_23 {dimension_numbers = #tpu.dot_dimension_numbers<[1], [0], [0], [1], [0, 0, 1, 1], [], []>} : vector<128x128xbf16>, vector<128x256xbf16>, vector<128x256xf32> -> vector<128x256xf32>
    %39 = arith.truncf %38 : vector<128x256xf32> to vector<128x256xbf16>
    %40 = tpu.concatenate %39, %37 in 1 : vector<128x256xbf16>, vector<128x256xbf16> -> vector<128x512xbf16>
    %c0_24 = arith.constant 0 : index
    %c0_25 = arith.constant 0 : index
    %41 = vector.load %arg9[%c0_24, %c0_25] : memref<512x256xbf16, #tpu.memory_space<vmem>>, vector<512x256xbf16>
    %cst_26 = arith.constant dense<0.000000e+00> : vector<128x256xf32>
    %42 = tpu.matmul %40, %41, %cst_26 {dimension_numbers = #tpu.dot_dimension_numbers<[1], [0], [0], [1], [0, 0, 1, 1], [], []>} : vector<128x512xbf16>, vector<512x256xbf16>, vector<128x256xf32> -> vector<128x256xf32>
    %c0_27 = arith.constant 0 : index
    %c0_28 = arith.constant 0 : index
    %43 = vector.load %arg10[%c0_27, %c0_28] : memref<1x256xf32, #tpu.memory_space<vmem>>, vector<1x256xf32>
    %44 = vector.broadcast %43 : vector<1x256xf32> to vector<128x256xf32>
    %45 = arith.addf %42, %44 : vector<128x256xf32>
    %c3 = arith.constant 3 : index
    %46 = memref.load %arg0[%c3] : memref<5xf32, #tpu.memory_space<smem>>
    %47 = vector.broadcast %46 : f32 to vector<128x256xf32>
    %48 = arith.mulf %47, %45 : vector<128x256xf32>
    %49 = arith.addf %36, %48 : vector<128x256xf32>
    %50 = arith.truncf %49 : vector<128x256xf32> to vector<128x256xbf16>
    %c0_29 = arith.constant 0 : index
    %c0_30 = arith.constant 0 : index
    %51 = vector.load %arg11[%c0_29, %c0_30] : memref<256x256xbf16, #tpu.memory_space<vmem>>, vector<256x256xbf16>
    %cst_31 = arith.constant dense<0.000000e+00> : vector<128x256xf32>
    %52 = tpu.matmul %50, %51, %cst_31 {dimension_numbers = #tpu.dot_dimension_numbers<[1], [0], [0], [1], [0, 0, 1, 1], [], []>} : vector<128x256xbf16>, vector<256x256xbf16>, vector<128x256xf32> -> vector<128x256xf32>
    %53 = vector.extract_strided_slice %52 {offsets = [0, 0], sizes = [128, 128], strides = [1, 1]} : vector<128x256xf32> to vector<128x128xf32>
    %54 = vector.extract_strided_slice %52 {offsets = [0, 128], sizes = [128, 128], strides = [1, 1]} : vector<128x256xf32> to vector<128x128xf32>
    %55 = arith.truncf %53 : vector<128x128xf32> to vector<128x128xbf16>
    %cst_32 = arith.constant dense<0.000000e+00> : vector<128x128xf32>
    %56 = tpu.matmul %0, %55, %cst_32 {dimension_numbers = #tpu.dot_dimension_numbers<[1], [0], [0], [1], [0, 0, 1, 1], [], []>} : vector<128x128xbf16>, vector<128x128xbf16>, vector<128x128xf32> -> vector<128x128xf32>
    %57 = arith.addf %56, %54 : vector<128x128xf32>
    %c0_33 = arith.constant 0 : index
    %c0_34 = arith.constant 0 : index
    %58 = vector.load %arg12[%c0_33, %c0_34] : memref<1x128xf32, #tpu.memory_space<vmem>>, vector<1x128xf32>
    %59 = vector.broadcast %58 : vector<1x128xf32> to vector<128x128xf32>
    %60 = arith.addf %57, %59 : vector<128x128xf32>
    %61 = tpu.iota {dimensions = array<i32: 1>} : vector<128x128xi32>
    %c40_i32 = arith.constant 40 : i32
    %62 = vector.broadcast %c40_i32 : i32 to vector<128x128xi32>
    %63 = arith.cmpi slt, %61, %62 : vector<128x128xi32>
    %cst_35 = arith.constant 0xFF800000 : f32
    %64 = vector.broadcast %cst_35 : f32 to vector<128x128xf32>
    %65 = arith.select %63, %60, %64 : vector<128x128xi1>, vector<128x128xf32>
    %cst_36 = arith.constant dense<0xFF800000> : vector<128xf32>
    %66 = vector.multi_reduction <maximumf>, %65, %cst_36 [1] : vector<128x128xf32> to vector<128xf32>
    %67 = vector.shape_cast %66 : vector<128xf32> to vector<128x1xf32>
    %68 = vector.broadcast %67 : vector<128x1xf32> to vector<128x128xf32>
    %69 = arith.subf %65, %68 : vector<128x128xf32>
    %70 = math.exp %69 : vector<128x128xf32>
    %cst_37 = arith.constant 0.000000e+00 : f32
    %71 = vector.broadcast %cst_37 : f32 to vector<128x128xf32>
    %72 = arith.select %63, %70, %71 : vector<128x128xi1>, vector<128x128xf32>
    %cst_38 = arith.constant dense<0.000000e+00> : vector<128xf32>
    %73 = vector.multi_reduction <add>, %72, %cst_38 [1] : vector<128x128xf32> to vector<128xf32>
    %74 = vector.shape_cast %73 : vector<128xf32> to vector<128x1xf32>
    %75 = math.log %74 : vector<128x1xf32>
    %76 = vector.broadcast %67 : vector<128x1xf32> to vector<128x128xf32>
    %77 = arith.subf %65, %76 : vector<128x128xf32>
    %78 = vector.broadcast %75 : vector<128x1xf32> to vector<128x128xf32>
    %79 = arith.subf %77, %78 : vector<128x128xf32>
    %cst_39 = arith.constant 0.000000e+00 : f32
    %80 = vector.broadcast %cst_39 : f32 to vector<128x128xf32>
    %81 = arith.select %63, %79, %80 : vector<128x128xi1>, vector<128x128xf32>
    %c0_40 = arith.constant 0 : index
    %c0_41 = arith.constant 0 : index
    %82 = vector.load %arg13[%c0_40, %c0_41] : memref<128x128xf32, #tpu.memory_space<vmem>>, vector<128x128xf32>
    tpu.vector_store %arg13[%c0_40, %c0_41], %81 {strides = array<i32>} : memref<128x128xf32, #tpu.memory_space<vmem>>, vector<128x128xf32>,
    return
  }
}

</mosaic_0001>

<bundles_post_ra>
// kernel: sage_re_forward.1
= control target key start
LH: loop header
LB: loop body
LE: loop exit
PB: predicated region body
PF: predicated region fallthrough
CT: control target
= control target key end

     0   :  { %18 = vsyncpa [#allocation3], 0  ;;  %s6312_s0 = inlined_call_operand.vmem [shape: f32[5], index: 0, kind: input, shape index: {}]   ;;  %s6313_s1 = inlined_call_operand.vmem [shape: bf16[128,128], index: 1, kind: input, shape index: {}]   ;;  %s6314_s2 = inlined_call_operand.vmem [shape: f32[128,128], index: 2, kind: input, shape index: {}]   ;;  %s6315_s3 = inlined_call_operand.vmem [shape: bf16[256,128], index: 3, kind: input, shape index: {}]   ;;  %s6316_s4 = inlined_call_operand.vmem [shape: f32[1,128], index: 4, kind: input, shape index: {}]   ;;  %s6317_s5 = inlined_call_operand.vmem [shape: bf16[256,256], index: 5, kind: input, shape index: {}]   ;;  %s6318_s6 = inlined_call_operand.vmem [shape: f32[1,256], index: 6, kind: input, shape index: {}]   ;;  %s6319_s7 = inlined_call_operand.vmem [shape: bf16[512,256], index: 7, kind: input, shape index: {}]   ;;  %s6320_s8 = inlined_call_operand.vmem [shape: f32[1,256], index: 8, kind: input, shape index: {}]   ;;  %s6321_s9 = inlined_call_operand.vmem [shape: bf16[512,256], index: 9, kind: input, shape index: {}]   ;;  %s6322_s10 = inlined_call_operand.vmem [shape: f32[1,256], index: 10, kind: input, shape index: {}]   ;;  %s6323_s11 = inlined_call_operand.vmem [shape: bf16[256,256], index: 11, kind: input, shape index: {}]   ;;  %s6324_s12 = inlined_call_operand.vmem [shape: f32[1,128], index: 12, kind: input, shape index: {}]   ;;  %s6325_s13 = inlined_call_operand.vmem [shape: f32[128,128], index: 13, kind: output, shape index: {}]  }
   0x1   :  { %s25_s27 = sshll.u32 %s6312_s0, 4  ;;  %s26_s27 = int_to_ptr.vmem [resolvable:$true] %s25_s27 }
   0x2   :  { %s4273_s28 = scalar_lea.vmem %s26_s27, 16  ;;  %p4278_p1 = scmp.lt.s32.totalorder %s26_s27, %s26_s27 }
   0x3   :  { %p4274_p0 = scmp.ne.s32.totalorder %s26_s27, %s4273_s28  ;;  %p4279_p2 = scmp.lt.s32.totalorder %s4273_s28, %s4273_s28 }
   0x5   :  { %p4280_p3 = por %p4279_p2, %p4278_p1 }
   0x7   :  { %p4281_p4 = pnand %p4280_p3, %p4274_p0 }
   0x9   :  { %4284 = shalt.err (!%p4281_p4)
}
   0xa   :  { %s4287_s29 = smov [#allocation2]  }
   0xb   :  { %28 = dma.vmem_to_smem %s26_s27, 16, %s4287_s29, [#allocation3]  }
   0xc   :  { %4285 = dma.done.wait [#allocation3], 16  }
   0xd   :  { %4286 = vsyncadd [#allocation3], 4294967280 }
   0xe   :  { %56 = sfence }
   0xf   :  { %v4365_v0 = vld [vmem:[%s6314_s2] sm:$0xff]  ;;  %v4370_v1 = vld [vmem:[%s6314_s2 + $0x8] sm:$0xff]  ;;  %v4375_v2 = vld [vmem:[%s6314_s2 + $0x10] sm:$0xff]  ;;  %s483_s26 = sld [smem:[#allocation2]]  ;;  %s3477_s22 = sld [smem:[#allocation2 + $0x3]] }
  0x10   :  { %v90_v3 = vpack.c.bf16 %v4370_v1, %v4365_v0  ;;  %v4382_v4 = vld [vmem:[%s6314_s2 + $0x18] sm:$0xff]  ;;  %v4391_v6 = vld [vmem:[%s6314_s2 + $0x20] sm:$0xff]  ;;  %v4396_v7 = vld [vmem:[%s6314_s2 + $0x28] sm:$0xff] }
  0x11   :  { %v4386_v5 = vpack.c.bf16 %v4382_v4, %v4375_v2  ;;  %v4401_v8 = vld [vmem:[%s6314_s2 + $0x30] sm:$0xff]  ;;  %v4406_v9 = vpack.c.bf16 %v4396_v7, %v4391_v6  ;;  %v4411_v10 = vld [vmem:[%s6314_s2 + $0x38] sm:$0xff]  ;;  %v4416_v11 = vld [vmem:[%s6313_s1] sm:$0xff]  }
  0x12   :  { %3623 = vmatprep.subr.bf16.mxu0 %v90_v3  ;;  %418 = vmatprep.mubr.bf16.mxu1 %v90_v3  ;;  %v4423_v12 = vpack.c.bf16 %v4411_v10, %v4401_v8  ;;  %v4428_v13 = vld [vmem:[%s6314_s2 + $0x40] sm:$0xff]  ;;  %v4433_v14 = vld [vmem:[%s6314_s2 + $0x48] sm:$0xff]  ;;  %v4439_v15 = vld [vmem:[%s6314_s2 + $0x50] sm:$0xff] }
  0x13   :  { %3624 = vmatpush3.bf16.msra.mxu0 %v90_v3  ;;  %3639 = vmatprep.mubr.bf16.mxu0 %v4416_v11  ;;  %v4444_v16 = vpack.c.bf16 %v4433_v14, %v4428_v13  ;;  %v4449_v17 = vld [vmem:[%s6314_s2 + $0x58] sm:$0xff]  ;;  %v3889_v18 = vld [vmem:[%s6315_s3 + $0x40] sm:$0xff]   ;;  %v4466_v21 = vld [vmem:[%s6314_s2 + $0x68] sm:$0xff] }
  0x14   :  { %3625 = vmatprep.subr.bf16.mxu0 %v4386_v5  ;;  %v3890_v19 = vld [vmem:[%s6315_s3] sm:$0xff]   ;;  %3527 = vmatprep.subr.bf16.mxu1 %v3889_v18  ;;  %v3891_v22 = vld [vmem:[%s6315_s3 + $0x48] sm:$0xff]   ;;  %v4474_v23 = vpack.c.bf16 %v4449_v17, %v4439_v15  ;;  %v3893_v25 = vld [vmem:[%s6315_s3 + $0x50] sm:$0xff]  }
  0x15   :  { %v4461_v20 = vld [vmem:[%s6314_s2 + $0x60] sm:$0xff]  ;;  %3528 = vmatpush3.bf16.msra.mxu1 %v3890_v19  ;;  %v3892_v24 = vld [vmem:[%s6315_s3 + $0x8] sm:$0xff]   ;;  %v4486_v26 = vld [vmem:[%s6314_s2 + $0x70] sm:$0xff] }
  0x16   :  { %3529 = vmatprep.subr.bf16.mxu1 %v3891_v22  ;;  %v4491_v27 = vld [vmem:[%s6314_s2 + $0x78] sm:$0xff]  ;;  %v4496_v28 = vpack.c.bf16 %v4466_v21, %v4461_v20  ;;  %v3894_v29 = vld [vmem:[%s6315_s3 + $0x10] sm:$0xff]   ;;  %v3897_v33 = vld [vmem:[%s6315_s3 + $0x60] sm:$0xff]  }
  0x17   :  { %3626 = vmatpush3.bf16.msra.mxu0 %v4386_v5  ;;  %v3895_v30 = vld [vmem:[%s6315_s3 + $0x58] sm:$0xff]   ;;  %v4508_v31 = vpack.c.bf16 %v4491_v27, %v4486_v26  ;;  %v3898_v34 = vld [vmem:[%s6315_s3 + $0x20] sm:$0xff]   ;;  %v3899_v35 = vld [vmem:[%s6315_s3 + $0x68] sm:$0xff]  }
  0x18   :  { %3627 = vmatprep.subr.bf16.mxu0 %v4406_v9  ;;  %v3896_v32 = vld [vmem:[%s6315_s3 + $0x18] sm:$0xff]   ;;  %v4527_v36 = vld [vmem:[%s6313_s1 + $0x8] sm:$0xff]   ;;  %v4532_v37 = vld [vmem:[%s6313_s1 + $0x10] sm:$0xff]  }
  0x19   :  { %3530 = vmatpush3.bf16.msra.mxu1 %v3892_v24  ;;  %v3900_v38 = vld [vmem:[%s6315_s3 + $0x28] sm:$0xff]   ;;  %v3901_v39 = vld [vmem:[%s6315_s3 + $0x70] sm:$0xff]   ;;  %v4549_v41 = vld [vmem:[%s6313_s1 + $0x18] sm:$0xff]  }
  0x1a   :  { %3531 = vmatprep.subr.bf16.mxu1 %v3893_v25  ;;  %v3902_v40 = vld [vmem:[%s6315_s3 + $0x30] sm:$0xff]   ;;  %v4554_v42 = vld [vmem:[%s6313_s1 + $0x20] sm:$0xff]   ;;  %v4561_v43 = vld [vmem:[%s6313_s1 + $0x28] sm:$0xff]  }
  0x1b   :  { %3628 = vmatpush3.bf16.msra.mxu0 %v4406_v9  ;;  %v4566_v44 = vld [vmem:[%s6313_s1 + $0x30] sm:$0xff]   ;;  %v4573_v45 = vld [vmem:[%s6313_s1 + $0x38] sm:$0xff]  }
  0x1c   :  { %3629 = vmatprep.subr.bf16.mxu0 %v4423_v12  ;;  %v3903_v46 = vld [vmem:[%s6315_s3 + $0x78] sm:$0xff]  }
  0x1d   :  { %3532 = vmatpush3.bf16.msra.mxu1 %v3894_v29  ;;  %v3904_v47 = vld [vmem:[%s6315_s3 + $0x38] sm:$0xff]   ;;  %v3911_v29 = vld [vmem:[%s6317_s5 + $0x20] ss:$8 sps:$4 sm:$0xff]  }
  0x1e   :  { %3533 = vmatprep.subr.bf16.mxu1 %v3895_v30  ;;  %v3916_v30 = vld [vmem:[%s6317_s5 + $0x34] ss:$8 sps:$4 sm:$0xff]  }
  0x1f   :  { %3630 = vmatpush3.bf16.msra.mxu0 %v4423_v12 }
  0x20   :  { %3631 = vmatprep.subr.bf16.mxu0 %v4444_v16 }
  0x21   :  { %3534 = vmatpush3.bf16.msra.mxu1 %v3896_v32  ;;  %v3919_v32 = vld [vmem:[%s6317_s5 + $0x44] ss:$8 sps:$4 sm:$0xff]  }
  0x22   :  { %3535 = vmatprep.subr.bf16.mxu1 %v3897_v33  ;;  %v3917_v33 = vld [vmem:[%s6317_s5 + $0x40] ss:$8 sps:$4 sm:$0xff]  }
  0x23   :  { %3632 = vmatpush3.bf16.msra.mxu0 %v4444_v16 }
  0x24   :  { %3633 = vmatprep.subr.bf16.mxu0 %v4474_v23 }
  0x25   :  { %3536 = vmatpush3.bf16.msra.mxu1 %v3898_v34  ;;  %v3922_v34 = vld [vmem:[%s6317_s5 + $0x54] ss:$8 sps:$4 sm:$0xff]  }
  0x26   :  { %3537 = vmatprep.subr.bf16.mxu1 %v3899_v35  ;;  %v3920_v35 = vld [vmem:[%s6317_s5 + $0x50] ss:$8 sps:$4 sm:$0xff]  }
  0x27   :  { %3634 = vmatpush3.bf16.msra.mxu0 %v4474_v23 }
  0x28   :  { %3635 = vmatprep.subr.bf16.mxu0 %v4496_v28 }
  0x29   :  { %3538 = vmatpush3.bf16.msra.mxu1 %v3900_v38  ;;  %v3925_v38 = vld [vmem:[%s6317_s5 + $0x64] ss:$8 sps:$4 sm:$0xff]  }
  0x2a   :  { %3539 = vmatprep.subr.bf16.mxu1 %v3901_v39  ;;  %v3923_v39 = vld [vmem:[%s6317_s5 + $0x60] ss:$8 sps:$4 sm:$0xff]  }
  0x2b   :  { %3636 = vmatpush3.bf16.msra.mxu0 %v4496_v28 }
  0x2c   :  { %3637 = vmatprep.subr.bf16.mxu0 %v4508_v31 }
  0x2d   :  { %3540 = vmatpush3.bf16.msra.mxu1 %v3902_v40  ;;  %v3928_v40 = vld [vmem:[%s6317_s5 + $0x74] ss:$8 sps:$4 sm:$0xff]  }
  0x2e   :  { %3541 = vmatprep.subr.bf16.mxu1 %v3903_v46  ;;  %v3926_v46 = vld [vmem:[%s6317_s5 + $0x70] ss:$8 sps:$4 sm:$0xff]  }
  0x2f   :  { %3638 = vmatpush3.bf16.msra.mxu0 %v4508_v31 }
  0x31   :  { %3542 = vmatpush3.bf16.msra.mxu1 %v3904_v47  ;;  %v3931_v47 = vld [vmem:[%s6317_s5 + $0x84] ss:$8 sps:$4 sm:$0xff]  }
  0x32   :  { %3640 = vmatmul.mubr.bf16.vlgmr.msra.gmra.mrb[0].mxu0 %v4527_v36 }
  0x33   :  { %3643 = vmatprep.mubr.bf16.mxu0 %v4532_v37 }
  0x3a   :  { %3644 = vmatmul.mubr.bf16.gmra.mrb[4].mxu0 %v4549_v41 }
  0x3b   :  { %3647 = vmatprep.mubr.bf16.mxu0 %v4554_v42 }
  0x42   :  { %3648 = vmatmul.mubr.bf16.gmra.mrb[8].mxu0 %v4561_v43 }
  0x43   :  { %3651 = vmatprep.mubr.bf16.mxu0 %v4566_v44 }
  0x4a   :  { %3652 = vmatmul.mubr.bf16.gmra.mrb[12].mxu0 %v4573_v45 }
  0x4b   :  { %3671 = vmatprep.mubr.bf16.mxu0 %v4416_v11 }
 0x105   :  { %v3641_v48 = vpop.f32.mrb[0].mxu0 }
 0x106   :  { %v180_v49 = vpop.f32.mrb[1].mxu0 }
 0x107   :  { %v3642_v50 = vpop.f32.mrb[2].mxu0 }
 0x108   :  { %v244_v51 = vpack.c.bf16 %v3642_v50, %v3641_v48  ;;  %v183_v52 = vpop.f32.mrb[3].mxu0 }
 0x109   :  { %v243_v53 = vpack.c.bf16 %v183_v52, %v180_v49  ;;  %v4644_v49 = vld [vmem:[%s6316_s4] ss:$0 sm:$0xff] }
 0x10b   :  { %419 = vmatmul.mubr.bf16.vlgmr.msra.gmra.mrb[0].mxu1 %v243_v53 }
 0x10c   :  { %426 = vmatprep.mubr.bf16.mxu1 %v4386_v5 }
 0x10d   :  { %v3645_v54 = vpop.f32.mrb[4].mxu0 }
 0x10e   :  { %v196_v55 = vpop.f32.mrb[5].mxu0 }
 0x10f   :  { %v3646_v56 = vpop.f32.mrb[6].mxu0 }
 0x110   :  { %v246_v57 = vpack.c.bf16 %v3646_v56, %v3645_v54  ;;  %v199_v58 = vpop.f32.mrb[7].mxu0  ;;  %v3934_v54 = vld [vmem:[%s6317_s5 + $0x94] ss:$8 sps:$4 sm:$0xff]  }
 0x111   :  { %v245_v59 = vpack.c.bf16 %v199_v58, %v196_v55  ;;  %v4652_v55 = vstv %s483_s26 }
 0x113   :  { %427 = vmatmul.mubr.bf16.gmra.mrb[4].mxu1 %v244_v51  ;;  %v3929_v51 = vld [vmem:[%s6317_s5 + $0x80] ss:$8 sps:$4 sm:$0xff]  }
 0x114   :  { %434 = vmatprep.mubr.bf16.mxu1 %v4406_v9  ;;  %v3905_v9 = vld [vmem:[%s6317_s5] ss:$8 sps:$4 sm:$0xff]  }
 0x115   :  { %v3649_v60 = vpop.f32.mrb[8].mxu0 }
 0x116   :  { %v212_v61 = vpop.f32.mrb[9].mxu0 }
 0x117   :  { %v3650_v62 = vpop.f32.mrb[10].mxu0 }
 0x118   :  { %v248_v63 = vpack.c.bf16 %v3650_v62, %v3649_v60  ;;  %v215_v3 = vpop.f32.mrb[11].mxu0  ;;  %v3937_v62 = vld [vmem:[%s6317_s5 + $0xa4] ss:$8 sps:$4 sm:$0xff]  }
 0x119   :  { %v247_v11 = vpack.c.bf16 %v215_v3, %v212_v61 }
 0x11b   :  { %435 = vmatmul.mubr.bf16.gmra.mrb[8].mxu1 %v245_v59  ;;  %v3932_v59 = vld [vmem:[%s6317_s5 + $0x90] ss:$8 sps:$4 sm:$0xff]  }
 0x11c   :  { %442 = vmatprep.mubr.bf16.mxu1 %v4423_v12  ;;  %v3907_v12 = vld [vmem:[%s6317_s5 + $0x4] ss:$8 sps:$4 sm:$0xff]  }
 0x11d   :  { %v3653_v18 = vpop.f32.mrb[12].mxu0  ;;  %834 = vmatprep.subr.bf16.mxu1 %v3907_v12 }
 0x11e   :  { %v228_v5 = vpop.f32.mrb[13].mxu0  ;;  %835 = vmatpush1.bf16.msra.mxu1 %v3905_v9  ;;  %v3940_v9 = vld [vmem:[%s6317_s5 + $0xb4] ss:$8 sps:$4 sm:$0xff]  }
 0x11f   :  { %v3654_v19 = vpop.f32.mrb[14].mxu0 }
 0x120   :  { %v250_v22 = vpack.c.bf16 %v3654_v19, %v3653_v18  ;;  %v231_v24 = vpop.f32.mrb[15].mxu0  ;;  %v3935_v18 = vld [vmem:[%s6317_s5 + $0xa0] ss:$8 sps:$4 sm:$0xff]  }
 0x121   :  { %v249_v25 = vpack.c.bf16 %v231_v24, %v228_v5 }
 0x123   :  { %443 = vmatmul.mubr.bf16.gmra.mrb[12].mxu1 %v246_v57 }
 0x124   :  { %450 = vmatprep.mubr.bf16.mxu1 %v4444_v16  ;;  %v3910_v16 = vld [vmem:[%s6317_s5 + $0x14] ss:$8 sps:$4 sm:$0xff]  }
 0x125   :  { %836 = vmatprep.subr.bf16.mxu1 %v3910_v16 }
 0x12b   :  { %451 = vmatmul.mubr.bf16.gmra.mrb[16].mxu1 %v247_v11 }
 0x12c   :  { %458 = vmatprep.mubr.bf16.mxu1 %v4474_v23  ;;  %v3908_v23 = vld [vmem:[%s6317_s5 + $0x10] ss:$8 sps:$4 sm:$0xff]  }
 0x12d   :  { %837 = vmatpush1.bf16.msra.mxu1 %v3908_v23 }
 0x133   :  { %459 = vmatmul.mubr.bf16.gmra.mrb[20].mxu1 %v248_v63 }
 0x134   :  { %466 = vmatprep.mubr.bf16.mxu1 %v4496_v28  ;;  %v3913_v28 = vld [vmem:[%s6317_s5 + $0x24] ss:$8 sps:$4 sm:$0xff]  }
 0x135   :  { %838 = vmatprep.subr.bf16.mxu1 %v3913_v28  ;;  %v3938_v28 = vld [vmem:[%s6317_s5 + $0xb0] ss:$8 sps:$4 sm:$0xff]  }
 0x136   :  { %839 = vmatpush1.bf16.msra.mxu1 %v3911_v29 }
 0x137   :  { %840 = vmatprep.subr.bf16.mxu1 %v3916_v30 }
 0x13b   :  { %467 = vmatmul.mubr.bf16.gmra.mrb[24].mxu1 %v249_v25 }
 0x13c   :  { %474 = vmatprep.mubr.bf16.mxu1 %v4508_v31  ;;  %v3914_v31 = vld [vmem:[%s6317_s5 + $0x30] ss:$8 sps:$4 sm:$0xff]  }
 0x13d   :  { %841 = vmatpush1.bf16.msra.mxu1 %v3914_v31 }
 0x13e   :  { %842 = vmatprep.subr.bf16.mxu1 %v3919_v32 }
 0x141   :  { %843 = vmatpush1.bf16.msra.mxu1 %v3917_v33  ;;  %v3941_v33 = vld [vmem:[%s6317_s5 + $0xc0] ss:$8 sps:$4 sm:$0xff]  }
 0x142   :  { %844 = vmatprep.subr.bf16.mxu1 %v3922_v34 }
 0x143   :  { %475 = vmatmul.mubr.bf16.gmra.mrb[28].mxu1 %v250_v22 }
 0x145   :  { %845 = vmatpush1.bf16.msra.mxu1 %v3920_v35 }
 0x146   :  { %846 = vmatprep.subr.bf16.mxu1 %v3925_v38 }
 0x149   :  { %847 = vmatpush1.bf16.msra.mxu1 %v3923_v39 }
 0x14a   :  { %848 = vmatprep.subr.bf16.mxu1 %v3928_v40  ;;  %v3946_v40 = vld [vmem:[%s6317_s5 + $0xd4] ss:$8 sps:$4 sm:$0xff]  }
 0x14d   :  { %849 = vmatpush1.bf16.msra.mxu1 %v3926_v46 }
 0x14e   :  { %850 = vmatprep.subr.bf16.mxu1 %v3931_v47 }
 0x151   :  { %851 = vmatpush1.bf16.msra.mxu1 %v3929_v51  ;;  %v3944_v51 = vld [vmem:[%s6317_s5 + $0xd0] ss:$8 sps:$4 sm:$0xff]  }
 0x152   :  { %852 = vmatprep.subr.bf16.mxu1 %v3934_v54 }
 0x155   :  { %853 = vmatpush1.bf16.msra.mxu1 %v3932_v59 }
 0x156   :  { %854 = vmatprep.subr.bf16.mxu1 %v3937_v62 }
 0x159   :  { %855 = vmatpush1.bf16.msra.mxu1 %v3935_v18 }
 0x15a   :  { %856 = vmatprep.subr.bf16.mxu1 %v3940_v9 }
 0x15d   :  { %857 = vmatpush1.bf16.msra.mxu1 %v3938_v28 }
 0x1de   :  { %v3543_v48 = vpop.f32.mrb[0].mxu1 }
 0x1df   :  { %v3544_v50 = vpop.f32.mrb[1].mxu1 }
 0x1e0   :  { %v3545_v52 = vadd.f32 %v3544_v50, %v3543_v48  ;;  %v3546_v53 = vpop.f32.mrb[2].mxu1 }
 0x1e1   :  { %v3547_v56 = vpop.f32.mrb[3].mxu1 }
 0x1e2   :  { %v421_v57 = vadd.f32 %v3545_v52, %v4644_v49  ;;  %v3548_v58 = vadd.f32 %v3547_v56, %v3546_v53  ;;  %v3949_v52 = vld [vmem:[%s6317_s5 + $0xe4] ss:$8 sps:$4 sm:$0xff]  }
 0x1e4   :  { %v485_v60 = vmul.f32 %v4652_v55, %v421_v57  ;;  %v424_v61 = vadd.f32 %v3548_v58, %v4644_v49  ;;  %v3947_v57 = vld [vmem:[%s6317_s5 + $0xe0] ss:$8 sps:$4 sm:$0xff]  }
 0x1e6   :  { %v486_v63 = vmul.f32 %v4652_v55, %v424_v61  ;;  %v3549_v3 = vpop.f32.mrb[4].mxu1  ;;  %v501_v22 = vadd.f32 %v485_v60, %v4365_v0 }
 0x1e7   :  { %v3550_v11 = vpop.f32.mrb[5].mxu1 }
 0x1e8   :  { %v3551_v5 = vadd.f32 %v3550_v11, %v3549_v3  ;;  %v3552_v19 = vpop.f32.mrb[6].mxu1  ;;  %v502_v24 = vadd.f32 %v486_v63, %v4370_v1  ;;  %v3943_v1 = vld [vmem:[%s6317_s5 + $0xc4] ss:$8 sps:$4 sm:$0xff]  }
 0x1e9   :  { %v3553_v25 = vpop.f32.mrb[7].mxu1  ;;  %858 = vmatprep.subr.bf16.mxu1 %v3943_v1 }
 0x1ea   :  { %v429_v12 = vadd.f32 %v3551_v5, %v4644_v49  ;;  %v3554_v16 = vadd.f32 %v3553_v25, %v3552_v19  ;;  %v517_v23 = vpack.c.bf16 %v502_v24, %v501_v22  ;;  %859 = vmatpush1.bf16.msra.mxu1 %v3941_v33 }
 0x1eb   :  { %860 = vmatprep.subr.bf16.mxu1 %v3946_v40 }
 0x1ec   :  { %v487_v29 = vmul.f32 %v4652_v55, %v429_v12  ;;  %v432_v0 = vadd.f32 %v3554_v16, %v4644_v49  ;;  %3655 = vmatprep.subr.bf16.mxu0 %v517_v23  ;;  %866 = vmatprep.mubr.bf16.mxu1 %v517_v23 }
 0x1ed   :  { %3656 = vmatpush3.bf16.msra.mxu0 %v517_v23 }
 0x1ee   :  { %v488_v30 = vmul.f32 %v4652_v55, %v432_v0  ;;  %v3555_v31 = vpop.f32.mrb[8].mxu1  ;;  %v503_v38 = vadd.f32 %v487_v29, %v4375_v2  ;;  %861 = vmatpush1.bf16.msra.mxu1 %v3944_v51 }
 0x1ef   :  { %v3556_v32 = vpop.f32.mrb[9].mxu1  ;;  %862 = vmatprep.subr.bf16.mxu1 %v3949_v52 }
 0x1f0   :  { %v3557_v34 = vadd.f32 %v3556_v32, %v3555_v31  ;;  %v3558_v35 = vpop.f32.mrb[10].mxu1  ;;  %v504_v39 = vadd.f32 %v488_v30, %v4382_v4 }
 0x1f1   :  { %v3559_v46 = vpop.f32.mrb[11].mxu1 }
 0x1f2   :  { %v437_v47 = vadd.f32 %v3557_v34, %v4644_v49  ;;  %v3560_v48 = vadd.f32 %v3559_v46, %v3558_v35  ;;  %v4691_v50 = vpack.c.bf16 %v504_v39, %v503_v38  ;;  %863 = vmatpush1.bf16.msra.mxu1 %v3947_v57 }
 0x1f4   :  { %v489_v2 = vmul.f32 %v4652_v55, %v437_v47  ;;  %v440_v4 = vadd.f32 %v3560_v48, %v4644_v49  ;;  %3657 = vmatprep.subr.bf16.mxu0 %v4691_v50 }
 0x1f5   :  { %3658 = vmatpush3.bf16.msra.mxu0 %v4691_v50 }
 0x1f6   :  { %v490_v53 = vmul.f32 %v4652_v55, %v440_v4  ;;  %v3561_v54 = vpop.f32.mrb[12].mxu1  ;;  %v505_v60 = vadd.f32 %v489_v2, %v4391_v6 }
 0x1f7   :  { %v3562_v56 = vpop.f32.mrb[13].mxu1 }
 0x1f8   :  { %v3563_v58 = vadd.f32 %v3562_v56, %v3561_v54  ;;  %v3564_v59 = vpop.f32.mrb[14].mxu1  ;;  %v506_v61 = vadd.f32 %v490_v53, %v4396_v7 }
 0x1f9   :  { %v3565_v62 = vpop.f32.mrb[15].mxu1 }
 0x1fa   :  { %v445_v63 = vadd.f32 %v3563_v58, %v4644_v49  ;;  %v3566_v3 = vadd.f32 %v3565_v62, %v3564_v59  ;;  %v4710_v11 = vpack.c.bf16 %v506_v61, %v505_v60 }
 0x1fc   :  { %v491_v18 = vmul.f32 %v4652_v55, %v445_v63  ;;  %v448_v5 = vadd.f32 %v3566_v3, %v4644_v49  ;;  %3659 = vmatprep.subr.bf16.mxu0 %v4710_v11 }
 0x1fd   :  { %3660 = vmatpush3.bf16.msra.mxu0 %v4710_v11 }
 0x1fe   :  { %v492_v6 = vmul.f32 %v4652_v55, %v448_v5  ;;  %v3567_v19 = vpop.f32.mrb[16].mxu1  ;;  %v507_v25 = vadd.f32 %v491_v18, %v4401_v8 }
 0x1ff   :  { %v3568_v7 = vpop.f32.mrb[17].mxu1 }
 0x200   :  { %v3569_v22 = vadd.f32 %v3568_v7, %v3567_v19  ;;  %v3570_v24 = vpop.f32.mrb[18].mxu1  ;;  %v508_v9 = vadd.f32 %v492_v6, %v4411_v10 }
 0x201   :  { %v3571_v12 = vpop.f32.mrb[19].mxu1 }
 0x202   :  { %v453_v16 = vadd.f32 %v3569_v22, %v4644_v49  ;;  %v3572_v23 = vadd.f32 %v3571_v12, %v3570_v24  ;;  %v4720_v28 = vpack.c.bf16 %v508_v9, %v507_v25 }
 0x204   :  { %v493_v29 = vmul.f32 %v4652_v55, %v453_v16  ;;  %v456_v0 = vadd.f32 %v3572_v23, %v4644_v49  ;;  %3661 = vmatprep.subr.bf16.mxu0 %v4720_v28 }
 0x205   :  { %3662 = vmatpush3.bf16.msra.mxu0 %v4720_v28 }
 0x206   :  { %v494_v1 = vmul.f32 %v4652_v55, %v456_v0  ;;  %v3573_v30 = vpop.f32.mrb[20].mxu1  ;;  %v509_v32 = vadd.f32 %v493_v29, %v4428_v13 }
 0x207   :  { %v3574_v8 = vpop.f32.mrb[21].mxu1 }
 0x208   :  { %v3575_v31 = vadd.f32 %v3574_v8, %v3573_v30  ;;  %v3576_v10 = vpop.f32.mrb[22].mxu1  ;;  %v510_v33 = vadd.f32 %v494_v1, %v4433_v14 }
 0x209   :  { %v3577_v34 = vpop.f32.mrb[23].mxu1 }
 0x20a   :  { %v461_v35 = vadd.f32 %v3575_v31, %v4644_v49  ;;  %v3578_v38 = vadd.f32 %v3577_v34, %v3576_v10  ;;  %v4730_v39 = vpack.c.bf16 %v510_v33, %v509_v32 }
 0x20c   :  { %v495_v40 = vmul.f32 %v4652_v55, %v461_v35  ;;  %v464_v46 = vadd.f32 %v3578_v38, %v4644_v49  ;;  %3663 = vmatprep.subr.bf16.mxu0 %v4730_v39  ;;  %v662_v38 = vld [vmem:[%s6318_s6] sm:$0x3] }
 0x20d   :  { %3664 = vmatpush3.bf16.msra.mxu0 %v4730_v39 }
 0x20e   :  { %v496_v47 = vmul.f32 %v4652_v55, %v464_v46  ;;  %v3579_v48 = vpop.f32.mrb[24].mxu1  ;;  %v511_v2 = vadd.f32 %v495_v40, %v4439_v15 }
 0x20f   :  { %v3580_v13 = vpop.f32.mrb[25].mxu1 }
 0x210   :  { %v3581_v51 = vadd.f32 %v3580_v13, %v3579_v48  ;;  %v3582_v14 = vpop.f32.mrb[26].mxu1  ;;  %v512_v4 = vadd.f32 %v496_v47, %v4449_v17 }
 0x211   :  { %v3583_v52 = vpop.f32.mrb[27].mxu1 }
 0x212   :  { %v469_v53 = vadd.f32 %v3581_v51, %v4644_v49  ;;  %v3584_v54 = vadd.f32 %v3583_v52, %v3582_v14  ;;  %v4740_v56 = vpack.c.bf16 %v512_v4, %v511_v2 }
 0x214   :  { %v497_v57 = vmul.f32 %v4652_v55, %v469_v53  ;;  %v472_v58 = vadd.f32 %v3584_v54, %v4644_v49  ;;  %3665 = vmatprep.subr.bf16.mxu0 %v4740_v56 }
 0x215   :  { %3666 = vmatpush3.bf16.msra.mxu0 %v4740_v56 }
 0x216   :  { %v498_v59 = vmul.f32 %v4652_v55, %v472_v58  ;;  %v3585_v60 = vpop.f32.mrb[28].mxu1  ;;  %v513_v62 = vadd.f32 %v497_v57, %v4461_v20 }
 0x217   :  { %v3586_v15 = vpop.f32.mrb[29].mxu1 }
 0x218   :  { %v3587_v61 = vadd.f32 %v3586_v15, %v3585_v60  ;;  %v3588_v17 = vpop.f32.mrb[30].mxu1  ;;  %v514_v63 = vadd.f32 %v498_v59, %v4466_v21  ;;  %v3952_v21 = vld [vmem:[%s6317_s5 + $0xf4] ss:$8 sps:$4 sm:$0xff]  }
 0x219   :  { %v3589_v3 = vpop.f32.mrb[31].mxu1  ;;  %864 = vmatprep.subr.bf16.mxu1 %v3952_v21 }
 0x21a   :  { %v477_v18 = vadd.f32 %v3587_v61, %v4644_v49  ;;  %v3590_v5 = vadd.f32 %v3589_v3, %v3588_v17  ;;  %v523_v6 = vpack.c.bf16 %v514_v63, %v513_v62 }
 0x21c   :  { %v499_v19 = vmul.f32 %v4652_v55, %v477_v18  ;;  %v480_v7 = vadd.f32 %v3590_v5, %v4644_v49  ;;  %3667 = vmatprep.subr.bf16.mxu0 %v523_v6 }
 0x21d   :  { %3668 = vmatpush3.bf16.msra.mxu0 %v523_v6 }
 0x21e   :  { %v500_v22 = vmul.f32 %v4652_v55, %v480_v7  ;;  %v515_v24 = vadd.f32 %v499_v19, %v4486_v26  ;;  %v3950_v26 = vld [vmem:[%s6317_s5 + $0xf0] ss:$8 sps:$4 sm:$0xff]  }
 0x21f   :  { %865 = vmatpush1.bf16.msra.mxu1 %v3950_v26 }
 0x220   :  { %v516_v25 = vadd.f32 %v500_v22, %v4491_v27 }
 0x222   :  { %v524_v20 = vpack.c.bf16 %v516_v25, %v515_v24 }
 0x224   :  { %3669 = vmatprep.subr.bf16.mxu0 %v524_v20 }
 0x225   :  { %3670 = vmatpush3.bf16.msra.mxu0 %v524_v20 }
 0x228   :  { %3672 = vmatmul.mubr.bf16.vlgmr.msra.gmra.mrb[16].mxu0 %v4527_v36 }
 0x229   :  { %3675 = vmatprep.mubr.bf16.mxu0 %v4532_v37 }
 0x230   :  { %3676 = vmatmul.mubr.bf16.gmra.mrb[20].mxu0 %v4549_v41 }
 0x231   :  { %3679 = vmatprep.mubr.bf16.mxu0 %v4554_v42 }
 0x238   :  { %3680 = vmatmul.mubr.bf16.gmra.mrb[24].mxu0 %v4561_v43 }
 0x239   :  { %3683 = vmatprep.mubr.bf16.mxu0 %v4566_v44 }
 0x240   :  { %3684 = vmatmul.mubr.bf16.gmra.mrb[28].mxu0 %v4573_v45 }
 0x2fb   :  { %v3673_v27 = vpop.f32.mrb[16].mxu0 }
 0x2fc   :  { %v559_v36 = vpop.f32.mrb[17].mxu0 }
 0x2fd   :  { %v3674_v37 = vpop.f32.mrb[18].mxu0 }
 0x2fe   :  { %v623_v41 = vpack.c.bf16 %v3674_v37, %v3673_v27  ;;  %v562_v42 = vpop.f32.mrb[19].mxu0 }
 0x2ff   :  { %v622_v43 = vpack.c.bf16 %v562_v42, %v559_v36 }
 0x301   :  { %867 = vmatmul.mubr.bf16.vlgmr.msra.gmra.mrb[32].mxu1 %v622_v43 }
 0x302   :  { %876 = vmatprep.mubr.bf16.mxu1 %v4691_v50 }
 0x303   :  { %v3677_v44 = vpop.f32.mrb[20].mxu0 }
 0x304   :  { %v575_v45 = vpop.f32.mrb[21].mxu0 }
 0x305   :  { %v3678_v49 = vpop.f32.mrb[22].mxu0 }
 0x306   :  { %v625_v55 = vpack.c.bf16 %v3678_v49, %v3677_v44  ;;  %v578_v9 = vpop.f32.mrb[23].mxu0 }
 0x307   :  { %v624_v12 = vpack.c.bf16 %v578_v9, %v575_v45 }
 0x309   :  { %877 = vmatmul.mubr.bf16.gmra.mrb[36].mxu1 %v623_v41 }
 0x30a   :  { %886 = vmatprep.mubr.bf16.mxu1 %v4710_v11  ;;  %v6353_v11 = vmov 0  }
 0x30b   :  { %v3681_v16 = vpop.f32.mrb[24].mxu0  ;;  %1027 = vmatprep.mubr.bf16.mxu0 %v6353_v11 }
 0x30c   :  { %v591_v23 = vpop.f32.mrb[25].mxu0 }
 0x30d   :  { %v3682_v29 = vpop.f32.mrb[26].mxu0 }
 0x30e   :  { %v627_v0 = vpack.c.bf16 %v3682_v29, %v3681_v16  ;;  %v594_v1 = vpop.f32.mrb[27].mxu0 }
 0x30f   :  { %v626_v30 = vpack.c.bf16 %v594_v1, %v591_v23 }
 0x311   :  { %887 = vmatmul.mubr.bf16.gmra.mrb[40].mxu1 %v624_v12 }
 0x312   :  { %896 = vmatprep.mubr.bf16.mxu1 %v4720_v28  ;;  %v6326_v28 = vlaneseq }
 0x313   :  { %v3685_v8 = vpop.f32.mrb[28].mxu0 }
 0x314   :  { %v607_v50 = vpop.f32.mrb[29].mxu0  ;;  %v665_v34 = vshrl.u32 %v6326_v28, 7 }
 0x315   :  { %v3686_v31 = vpop.f32.mrb[30].mxu0 }
 0x316   :  { %v629_v10 = vpack.c.bf16 %v3686_v31, %v3685_v8  ;;  %v610_v32 = vpop.f32.mrb[31].mxu0  ;;  %v4776_v35 = vsub.s32 0, %v665_v34 }
 0x317   :  { %v628_v33 = vpack.c.bf16 %v610_v32, %v607_v50 }
 0x318   :  { %v4784_v40 = vrot.slane %v662_v38, %v4776_v35 }
 0x319   :  { %897 = vmatmul.mubr.bf16.gmra.mrb[44].mxu1 %v625_v55 }
 0x31a   :  { %906 = vmatprep.mubr.bf16.mxu1 %v4730_v39  ;;  %v4781_v39 = vsub.s32 1, %v665_v34 }
 0x31c   :  { %v4787_v46 = vrot.slane %v662_v38, %v4781_v39 }
 0x321   :  { %907 = vmatmul.mubr.bf16.gmra.mrb[48].mxu1 %v626_v30 }
 0x322   :  { %916 = vmatprep.mubr.bf16.mxu1 %v4740_v56 }
 0x329   :  { %917 = vmatmul.mubr.bf16.gmra.mrb[52].mxu1 %v627_v0 }
 0x32a   :  { %926 = vmatprep.mubr.bf16.mxu1 %v523_v6 }
 0x331   :  { %927 = vmatmul.mubr.bf16.gmra.mrb[56].mxu1 %v628_v33 }
 0x332   :  { %936 = vmatprep.mubr.bf16.mxu1 %v524_v20 }
 0x339   :  { %937 = vmatmul.mubr.bf16.gmra.mrb[60].mxu1 %v629_v10 }
 0x33a   :  { %1826 = vmatprep.mubr.bf16.mxu1 %v6353_v11 }
 0x3d4   :  { %v868_v47 = vpop.f32.mrb[32].mxu1 }
 0x3d5   :  { %v869_v48 = vadd.f32 %v868_v47, %v4784_v40  ;;  %v870_v13 = vpop.f32.mrb[33].mxu1 }
 0x3d6   :  { %v871_v51 = vadd.f32 %v870_v13, %v4787_v46  ;;  %v872_v14 = vpop.f32.mrb[34].mxu1 }
 0x3d7   :  { %v873_v2 = vadd.f32 %v872_v14, %v4784_v40  ;;  %v874_v4 = vpop.f32.mrb[35].mxu1  ;;  %v947_v53 = vmax.f32 %v869_v48, 0.0 }
 0x3d8   :  { %v875_v52 = vadd.f32 %v874_v4, %v4787_v46  ;;  %v948_v56 = vmax.f32 %v871_v51, 0.0 }
 0x3d9   :  { %v949_v54 = vmax.f32 %v873_v2, 0.0 }
 0x3da   :  { %v950_v57 = vmax.f32 %v875_v52, 0.0 }
 0x3db   :  { %v4793_v58 = vpack.c.bf16 %v949_v54, %v947_v53 }
 0x3dc   :  { %v4795_v59 = vpack.c.bf16 %v950_v57, %v948_v56  ;;  %v878_v60 = vpop.f32.mrb[36].mxu1 }
 0x3dd   :  { %v879_v15 = vadd.f32 %v878_v60, %v4784_v40  ;;  %v880_v61 = vpop.f32.mrb[37].mxu1 }
 0x3de   :  { %v881_v17 = vadd.f32 %v880_v61, %v4787_v46  ;;  %v882_v62 = vpop.f32.mrb[38].mxu1  ;;  %995 = vmatprep.subr.bf16.mxu0 %v4795_v59 }
 0x3df   :  { %v883_v63 = vadd.f32 %v882_v62, %v4784_v40  ;;  %v884_v3 = vpop.f32.mrb[39].mxu1  ;;  %996 = vmatpush1.bf16.msra.mxu0 %v4793_v58  ;;  %v951_v5 = vmax.f32 %v879_v15, 0.0 }
 0x3e0   :  { %v885_v18 = vadd.f32 %v884_v3, %v4787_v46  ;;  %v952_v19 = vmax.f32 %v881_v17, 0.0 }
 0x3e1   :  { %v953_v6 = vmax.f32 %v883_v63, 0.0 }
 0x3e2   :  { %v954_v7 = vmax.f32 %v885_v18, 0.0 }
 0x3e3   :  { %v4803_v22 = vpack.c.bf16 %v953_v6, %v951_v5 }
 0x3e4   :  { %v4805_v24 = vpack.c.bf16 %v954_v7, %v952_v19  ;;  %v888_v25 = vpop.f32.mrb[40].mxu1 }
 0x3e5   :  { %v889_v20 = vadd.f32 %v888_v25, %v4784_v40  ;;  %v890_v21 = vpop.f32.mrb[41].mxu1 }
 0x3e6   :  { %v891_v26 = vadd.f32 %v890_v21, %v4787_v46  ;;  %v892_v27 = vpop.f32.mrb[42].mxu1  ;;  %997 = vmatprep.subr.bf16.mxu0 %v4805_v24 }
 0x3e7   :  { %v893_v36 = vadd.f32 %v892_v27, %v4784_v40  ;;  %v894_v37 = vpop.f32.mrb[43].mxu1  ;;  %998 = vmatpush1.bf16.msra.mxu0 %v4803_v22  ;;  %v955_v42 = vmax.f32 %v889_v20, 0.0 }
 0x3e8   :  { %v895_v41 = vadd.f32 %v894_v37, %v4787_v46  ;;  %v956_v44 = vmax.f32 %v891_v26, 0.0 }
 0x3e9   :  { %v957_v43 = vmax.f32 %v893_v36, 0.0 }
 0x3ea   :  { %v958_v45 = vmax.f32 %v895_v41, 0.0 }
 0x3eb   :  { %v4813_v49 = vpack.c.bf16 %v957_v43, %v955_v42 }
 0x3ec   :  { %v4815_v55 = vpack.c.bf16 %v958_v45, %v956_v44  ;;  %v898_v9 = vpop.f32.mrb[44].mxu1 }
 0x3ed   :  { %v899_v12 = vadd.f32 %v898_v9, %v4784_v40  ;;  %v900_v16 = vpop.f32.mrb[45].mxu1 }
 0x3ee   :  { %v901_v23 = vadd.f32 %v900_v16, %v4787_v46  ;;  %v902_v29 = vpop.f32.mrb[46].mxu1  ;;  %999 = vmatprep.subr.bf16.mxu0 %v4815_v55 }
 0x3ef   :  { %v903_v0 = vadd.f32 %v902_v29, %v4784_v40  ;;  %v904_v1 = vpop.f32.mrb[47].mxu1  ;;  %1000 = vmatpush1.bf16.msra.mxu0 %v4813_v49  ;;  %v959_v8 = vmax.f32 %v899_v12, 0.0 }
 0x3f0   :  { %v905_v30 = vadd.f32 %v904_v1, %v4787_v46  ;;  %v960_v31 = vmax.f32 %v901_v23, 0.0 }
 0x3f1   :  { %v961_v50 = vmax.f32 %v903_v0, 0.0 }
 0x3f2   :  { %v962_v10 = vmax.f32 %v905_v30, 0.0 }
 0x3f3   :  { %v4823_v32 = vpack.c.bf16 %v961_v50, %v959_v8 }
 0x3f4   :  { %v4825_v33 = vpack.c.bf16 %v962_v10, %v960_v31  ;;  %v908_v34 = vpop.f32.mrb[48].mxu1 }
 0x3f5   :  { %v909_v38 = vadd.f32 %v908_v34, %v4784_v40  ;;  %v910_v47 = vpop.f32.mrb[49].mxu1 }
 0x3f6   :  { %v911_v48 = vadd.f32 %v910_v47, %v4787_v46  ;;  %v912_v13 = vpop.f32.mrb[50].mxu1  ;;  %1001 = vmatprep.subr.bf16.mxu0 %v4825_v33 }
 0x3f7   :  { %v913_v51 = vadd.f32 %v912_v13, %v4784_v40  ;;  %v914_v14 = vpop.f32.mrb[51].mxu1  ;;  %1002 = vmatpush1.bf16.msra.mxu0 %v4823_v32  ;;  %v963_v4 = vmax.f32 %v909_v38, 0.0 }
 0x3f8   :  { %v915_v2 = vadd.f32 %v914_v14, %v4787_v46  ;;  %v964_v53 = vmax.f32 %v911_v48, 0.0  ;;  %v3955_v14 = vld [vmem:[%s6319_s7 + $0x4] ss:$8 sps:$4 sm:$0xff]  }
 0x3f9   :  { %v965_v52 = vmax.f32 %v913_v51, 0.0 }
 0x3fa   :  { %v966_v54 = vmax.f32 %v915_v2, 0.0  ;;  %v4881_v2 = vld [vmem:[%s6313_s1] sm:$0xff]  }
 0x3fb   :  { %v4833_v56 = vpack.c.bf16 %v965_v52, %v963_v4  ;;  %v3956_v4 = vld [vmem:[%s6319_s7 + $0x10] ss:$8 sps:$4 sm:$0xff]   ;;  %v3961_v52 = vld [vmem:[%s6319_s7 + $0x24] ss:$8 sps:$4 sm:$0xff]  }
 0x3fc   :  { %v4835_v57 = vpack.c.bf16 %v966_v54, %v964_v53  ;;  %v918_v60 = vpop.f32.mrb[52].mxu1  ;;  %v3959_v53 = vld [vmem:[%s6319_s7 + $0x20] ss:$8 sps:$4 sm:$0xff]   ;;  %v3964_v54 = vld [vmem:[%s6319_s7 + $0x34] ss:$8 sps:$4 sm:$0xff]  }
 0x3fd   :  { %v919_v15 = vadd.f32 %v918_v60, %v4784_v40  ;;  %v920_v61 = vpop.f32.mrb[53].mxu1  ;;  %v4900_v60 = vld [vmem:[%s6313_s1 + $0x8] sm:$0xff]  }
 0x3fe   :  { %v921_v17 = vadd.f32 %v920_v61, %v4787_v46  ;;  %v922_v62 = vpop.f32.mrb[54].mxu1  ;;  %1003 = vmatprep.subr.bf16.mxu0 %v4835_v57  ;;  %v3967_v61 = vld [vmem:[%s6319_s7 + $0x44] ss:$8 sps:$4 sm:$0xff]  }
 0x3ff   :  { %v923_v63 = vadd.f32 %v922_v62, %v4784_v40  ;;  %v924_v3 = vpop.f32.mrb[55].mxu1  ;;  %1004 = vmatpush1.bf16.msra.mxu0 %v4833_v56  ;;  %v967_v5 = vmax.f32 %v919_v15, 0.0  ;;  %v3962_v15 = vld [vmem:[%s6319_s7 + $0x30] ss:$8 sps:$4 sm:$0xff]   ;;  %v3970_v62 = vld [vmem:[%s6319_s7 + $0x54] ss:$8 sps:$4 sm:$0xff]  }
 0x400   :  { %v925_v18 = vadd.f32 %v924_v3, %v4787_v46  ;;  %v968_v19 = vmax.f32 %v921_v17, 0.0  ;;  %v3965_v17 = vld [vmem:[%s6319_s7 + $0x40] ss:$8 sps:$4 sm:$0xff]   ;;  %v3968_v3 = vld [vmem:[%s6319_s7 + $0x50] ss:$8 sps:$4 sm:$0xff]  }
 0x401   :  { %v969_v6 = vmax.f32 %v923_v63, 0.0  ;;  %v4919_v63 = vld [vmem:[%s6313_s1 + $0x10] sm:$0xff]  }
 0x402   :  { %v970_v7 = vmax.f32 %v925_v18, 0.0  ;;  %v3973_v18 = vld [vmem:[%s6319_s7 + $0x64] ss:$8 sps:$4 sm:$0xff]  }
 0x403   :  { %v4843_v25 = vpack.c.bf16 %v969_v6, %v967_v5  ;;  %v3971_v5 = vld [vmem:[%s6319_s7 + $0x60] ss:$8 sps:$4 sm:$0xff]   ;;  %v3976_v6 = vld [vmem:[%s6319_s7 + $0x74] ss:$8 sps:$4 sm:$0xff]  }
 0x404   :  { %v4845_v20 = vpack.c.bf16 %v970_v7, %v968_v19  ;;  %v928_v21 = vpop.f32.mrb[56].mxu1  ;;  %v4938_v19 = vld [vmem:[%s6313_s1 + $0x18] sm:$0xff]  }
 0x405   :  { %v929_v26 = vadd.f32 %v928_v21, %v4784_v40  ;;  %v930_v27 = vpop.f32.mrb[57].mxu1  ;;  %v3974_v7 = vld [vmem:[%s6319_s7 + $0x70] ss:$8 sps:$4 sm:$0xff]   ;;  %v3979_v21 = vld [vmem:[%s6319_s7 + $0x84] ss:$8 sps:$4 sm:$0xff]  }
 0x406   :  { %v931_v36 = vadd.f32 %v930_v27, %v4787_v46  ;;  %v932_v37 = vpop.f32.mrb[58].mxu1  ;;  %1005 = vmatprep.subr.bf16.mxu0 %v4845_v20  ;;  %v3982_v27 = vld [vmem:[%s6319_s7 + $0x94] ss:$8 sps:$4 sm:$0xff]  }
 0x407   :  { %v933_v41 = vadd.f32 %v932_v37, %v4784_v40  ;;  %v934_v42 = vpop.f32.mrb[59].mxu1  ;;  %1006 = vmatpush1.bf16.msra.mxu0 %v4843_v25  ;;  %v971_v44 = vmax.f32 %v929_v26, 0.0  ;;  %v3977_v26 = vld [vmem:[%s6319_s7 + $0x80] ss:$8 sps:$4 sm:$0xff]   ;;  %v3980_v37 = vld [vmem:[%s6319_s7 + $0x90] ss:$8 sps:$4 sm:$0xff]  }
 0x408   :  { %v935_v43 = vadd.f32 %v934_v42, %v4787_v46  ;;  %v972_v9 = vmax.f32 %v931_v36, 0.0  ;;  %v4957_v36 = vld [vmem:[%s6313_s1 + $0x20] sm:$0xff]  }
 0x409   :  { %v973_v45 = vmax.f32 %v933_v41, 0.0  ;;  %v3985_v41 = vld [vmem:[%s6319_s7 + $0xa4] ss:$8 sps:$4 sm:$0xff]   ;;  %v3983_v42 = vld [vmem:[%s6319_s7 + $0xa0] ss:$8 sps:$4 sm:$0xff]  }
 0x40a   :  { %v974_v12 = vmax.f32 %v935_v43, 0.0  ;;  %v3988_v43 = vld [vmem:[%s6319_s7 + $0xb4] ss:$8 sps:$4 sm:$0xff]  }
 0x40b   :  { %v4853_v16 = vpack.c.bf16 %v973_v45, %v971_v44  ;;  %v4976_v44 = vld [vmem:[%s6313_s1 + $0x28] sm:$0xff]   ;;  %v3986_v45 = vld [vmem:[%s6319_s7 + $0xb0] ss:$8 sps:$4 sm:$0xff]  }
 0x40c   :  { %v4855_v23 = vpack.c.bf16 %v974_v12, %v972_v9  ;;  %v938_v29 = vpop.f32.mrb[60].mxu1  ;;  %v3991_v9 = vld [vmem:[%s6319_s7 + $0xc4] ss:$8 sps:$4 sm:$0xff]   ;;  %v3989_v12 = vld [vmem:[%s6319_s7 + $0xc0] ss:$8 sps:$4 sm:$0xff]  }
 0x40d   :  { %v939_v0 = vadd.f32 %v938_v29, %v4784_v40  ;;  %v940_v1 = vpop.f32.mrb[61].mxu1  ;;  %v3994_v29 = vld [vmem:[%s6319_s7 + $0xd4] ss:$8 sps:$4 sm:$0xff]  }
 0x40e   :  { %v941_v30 = vadd.f32 %v940_v1, %v4787_v46  ;;  %v942_v8 = vpop.f32.mrb[62].mxu1  ;;  %1007 = vmatprep.subr.bf16.mxu0 %v4855_v23  ;;  %v3992_v1 = vld [vmem:[%s6319_s7 + $0xd0] ss:$8 sps:$4 sm:$0xff]  }
 0x40f   :  { %v943_v50 = vadd.f32 %v942_v8, %v4784_v40  ;;  %v944_v31 = vpop.f32.mrb[63].mxu1  ;;  %1008 = vmatpush1.bf16.msra.mxu0 %v4853_v16  ;;  %v975_v34 = vmax.f32 %v939_v0, 0.0  ;;  %v3953_v40 = vld [vmem:[%s6319_s7] ss:$8 sps:$4 sm:$0xff]   ;;  %v4995_v0 = vld [vmem:[%s6313_s1 + $0x30] sm:$0xff]  }
 0x410   :  { %v945_v10 = vadd.f32 %v944_v31, %v4787_v46  ;;  %v976_v47 = vmax.f32 %v941_v30, 0.0  ;;  %v3958_v46 = vld [vmem:[%s6319_s7 + $0x14] ss:$8 sps:$4 sm:$0xff]   ;;  %v3997_v30 = vld [vmem:[%s6319_s7 + $0xe4] ss:$8 sps:$4 sm:$0xff]  }
 0x411   :  { %v977_v38 = vmax.f32 %v943_v50, 0.0  ;;  %v3995_v8 = vld [vmem:[%s6319_s7 + $0xe0] ss:$8 sps:$4 sm:$0xff]   ;;  %v5011_v50 = vld [vmem:[%s6313_s1 + $0x38] sm:$0xff]  }
 0x412   :  { %v978_v48 = vmax.f32 %v945_v10, 0.0  ;;  %v4000_v31 = vld [vmem:[%s6319_s7 + $0xf4] ss:$8 sps:$4 sm:$0xff]   ;;  %v3998_v10 = vld [vmem:[%s6319_s7 + $0xf0] ss:$8 sps:$4 sm:$0xff]  }
 0x413   :  { %v4863_v13 = vpack.c.bf16 %v977_v38, %v975_v34  ;;  %v4003_v34 = vld [vmem:[%s6319_s7 + $0x104] ss:$8 sps:$4 sm:$0xff]  }
 0x414   :  { %v4865_v51 = vpack.c.bf16 %v978_v48, %v976_v47 }
 0x416   :  { %1009 = vmatprep.subr.bf16.mxu0 %v4865_v51 }
 0x417   :  { %1010 = vmatpush1.bf16.msra.mxu0 %v4863_v13 }
 0x418   :  { %1520 = vmatprep.subr.bf16.mxu0 %v3955_v14 }
 0x41a   :  { %1028 = vmatmul.mubr.bf16.vlgmr.msra.gmra.mrb[32].mxu0 %v4881_v2 }
 0x41b   :  { %1037 = vmatprep.mubr.bf16.mxu0 %v6353_v11  ;;  %1521 = vmatpush1.bf16.msra.mxu0 %v3953_v40 }
 0x41c   :  { %1522 = vmatprep.subr.bf16.mxu0 %v3958_v46 }
 0x41f   :  { %1523 = vmatpush1.bf16.msra.mxu0 %v3956_v4  ;;  %v4001_v4 = vld [vmem:[%s6319_s7 + $0x100] ss:$8 sps:$4 sm:$0xff]  }
 0x420   :  { %1524 = vmatprep.subr.bf16.mxu0 %v3961_v52  ;;  %v4006_v52 = vld [vmem:[%s6319_s7 + $0x114] ss:$8 sps:$4 sm:$0xff]  }
 0x422   :  { %1038 = vmatmul.mubr.bf16.gmra.mrb[36].mxu0 %v4900_v60 }
 0x423   :  { %1047 = vmatprep.mubr.bf16.mxu0 %v6353_v11  ;;  %1525 = vmatpush1.bf16.msra.mxu0 %v3959_v53 }
 0x424   :  { %1526 = vmatprep.subr.bf16.mxu0 %v3964_v54  ;;  %v4004_v54 = vld [vmem:[%s6319_s7 + $0x110] ss:$8 sps:$4 sm:$0xff]  }
 0x427   :  { %1527 = vmatpush1.bf16.msra.mxu0 %v3962_v15 }
 0x428   :  { %1528 = vmatprep.subr.bf16.mxu0 %v3967_v61  ;;  %v4009_v61 = vld [vmem:[%s6319_s7 + $0x124] ss:$8 sps:$4 sm:$0xff]  }
 0x42a   :  { %1048 = vmatmul.mubr.bf16.gmra.mrb[40].mxu0 %v4919_v63 }
 0x42b   :  { %1057 = vmatprep.mubr.bf16.mxu0 %v6353_v11  ;;  %1529 = vmatpush1.bf16.msra.mxu0 %v3965_v17 }
 0x42c   :  { %1530 = vmatprep.subr.bf16.mxu0 %v3970_v62 }
 0x42f   :  { %1531 = vmatpush1.bf16.msra.mxu0 %v3968_v3 }
 0x430   :  { %1532 = vmatprep.subr.bf16.mxu0 %v3973_v18 }
 0x432   :  { %1058 = vmatmul.mubr.bf16.gmra.mrb[44].mxu0 %v4938_v19 }
 0x433   :  { %1067 = vmatprep.mubr.bf16.mxu0 %v6353_v11  ;;  %1533 = vmatpush1.bf16.msra.mxu0 %v3971_v5  ;;  %v4007_v5 = vld [vmem:[%s6319_s7 + $0x120] ss:$8 sps:$4 sm:$0xff]  }
 0x434   :  { %1534 = vmatprep.subr.bf16.mxu0 %v3976_v6  ;;  %v4012_v6 = vld [vmem:[%s6319_s7 + $0x134] ss:$8 sps:$4 sm:$0xff]  }
 0x437   :  { %1535 = vmatpush1.bf16.msra.mxu0 %v3974_v7 }
 0x438   :  { %1536 = vmatprep.subr.bf16.mxu0 %v3979_v21  ;;  %v4010_v21 = vld [vmem:[%s6319_s7 + $0x130] ss:$8 sps:$4 sm:$0xff]  }
 0x43a   :  { %1068 = vmatmul.mubr.bf16.gmra.mrb[48].mxu0 %v4957_v36 }
 0x43b   :  { %1077 = vmatprep.mubr.bf16.mxu0 %v6353_v11  ;;  %1537 = vmatpush1.bf16.msra.mxu0 %v3977_v26 }
 0x43c   :  { %1538 = vmatprep.subr.bf16.mxu0 %v3982_v27  ;;  %v4015_v27 = vld [vmem:[%s6319_s7 + $0x144] ss:$8 sps:$4 sm:$0xff]  }
 0x43f   :  { %1539 = vmatpush1.bf16.msra.mxu0 %v3980_v37 }
 0x440   :  { %1540 = vmatprep.subr.bf16.mxu0 %v3985_v41 }
 0x442   :  { %1078 = vmatmul.mubr.bf16.gmra.mrb[52].mxu0 %v4976_v44 }
 0x443   :  { %1087 = vmatprep.mubr.bf16.mxu0 %v6353_v11  ;;  %1541 = vmatpush1.bf16.msra.mxu0 %v3983_v42 }
 0x444   :  { %1542 = vmatprep.subr.bf16.mxu0 %v3988_v43 }
 0x447   :  { %1543 = vmatpush1.bf16.msra.mxu0 %v3986_v45  ;;  %v4013_v45 = vld [vmem:[%s6319_s7 + $0x140] ss:$8 sps:$4 sm:$0xff]  }
 0x448   :  { %1544 = vmatprep.subr.bf16.mxu0 %v3991_v9  ;;  %v4018_v9 = vld [vmem:[%s6319_s7 + $0x154] ss:$8 sps:$4 sm:$0xff]  }
 0x44a   :  { %1088 = vmatmul.mubr.bf16.gmra.mrb[56].mxu0 %v4995_v0 }
 0x44b   :  { %1097 = vmatprep.mubr.bf16.mxu0 %v6353_v11  ;;  %1545 = vmatpush1.bf16.msra.mxu0 %v3989_v12 }
 0x44c   :  { %1546 = vmatprep.subr.bf16.mxu0 %v3994_v29  ;;  %v4016_v29 = vld [vmem:[%s6319_s7 + $0x150] ss:$8 sps:$4 sm:$0xff]  }
 0x44f   :  { %1547 = vmatpush1.bf16.msra.mxu0 %v3992_v1 }
 0x450   :  { %1548 = vmatprep.subr.bf16.mxu0 %v3997_v30  ;;  %v4021_v30 = vld [vmem:[%s6319_s7 + $0x164] ss:$8 sps:$4 sm:$0xff]  }
 0x452   :  { %1098 = vmatmul.mubr.bf16.gmra.mrb[60].mxu0 %v5011_v50 }
 0x453   :  { %1549 = vmatpush1.bf16.msra.mxu0 %v3995_v8 }
 0x454   :  { %1550 = vmatprep.subr.bf16.mxu0 %v4000_v31 }
 0x457   :  { %1551 = vmatpush1.bf16.msra.mxu0 %v3998_v10 }
 0x458   :  { %1633 = vmatprep.subr.bf16.mxu0 %v4003_v34 }
 0x4ed   :  { %v1029_v38 = vpop.f32.mrb[32].mxu0 }
 0x4ee   :  { %v1031_v47 = vpop.f32.mrb[33].mxu0 }
 0x4ef   :  { %v1033_v48 = vpop.f32.mrb[34].mxu0 }
 0x4f0   :  { %v1108_v14 = vpack.c.bf16 %v1033_v48, %v1029_v38  ;;  %v1035_v40 = vpop.f32.mrb[35].mxu0  ;;  %v4019_v38 = vld [vmem:[%s6319_s7 + $0x160] ss:$8 sps:$4 sm:$0xff]  }
 0x4f1   :  { %v1109_v46 = vpack.c.bf16 %v1035_v40, %v1031_v47  ;;  %v4024_v47 = vld [vmem:[%s6319_s7 + $0x174] ss:$8 sps:$4 sm:$0xff]  }
 0x4f3   :  { %1552 = vmatprep.mubr.bf16.mxu0 %v1109_v46  ;;  %v4027_v46 = vld [vmem:[%s6319_s7 + $0x184] ss:$8 sps:$4 sm:$0xff]  }
 0x4f4   :  { %1553 = vmatmul.mubr.bf16.vlgmr.msra.gmra.mrb[64].mxu0 %v1108_v14  ;;  %v4022_v14 = vld [vmem:[%s6319_s7 + $0x170] ss:$8 sps:$4 sm:$0xff]  }
 0x4f5   :  { %v1039_v53 = vpop.f32.mrb[36].mxu0  ;;  %1634 = vmatpush1.bf16.msra.mxu0 %v4001_v4 }
 0x4f6   :  { %v1041_v15 = vpop.f32.mrb[37].mxu0  ;;  %1635 = vmatprep.subr.bf16.mxu0 %v4006_v52 }
 0x4f7   :  { %v1043_v17 = vpop.f32.mrb[38].mxu0 }
 0x4f8   :  { %v1110_v62 = vpack.c.bf16 %v1043_v17, %v1039_v53  ;;  %v1045_v3 = vpop.f32.mrb[39].mxu0 }
 0x4f9   :  { %v1111_v18 = vpack.c.bf16 %v1045_v3, %v1041_v15  ;;  %1636 = vmatpush1.bf16.msra.mxu0 %v4004_v54  ;;  %v4025_v15 = vld [vmem:[%s6319_s7 + $0x180] ss:$8 sps:$4 sm:$0xff]  }
 0x4fa   :  { %1637 = vmatprep.subr.bf16.mxu0 %v4009_v61  ;;  %v4030_v61 = vld [vmem:[%s6319_s7 + $0x194] ss:$8 sps:$4 sm:$0xff]  }
 0x4fb   :  { %1562 = vmatprep.mubr.bf16.mxu0 %v1111_v18  ;;  %v4033_v18 = vld [vmem:[%s6319_s7 + $0x1a4] ss:$8 sps:$4 sm:$0xff]  }
 0x4fc   :  { %1563 = vmatmul.mubr.bf16.gmra.mrb[68].mxu0 %v1110_v62  ;;  %v4028_v62 = vld [vmem:[%s6319_s7 + $0x190] ss:$8 sps:$4 sm:$0xff]  }
 0x4fd   :  { %v1049_v7 = vpop.f32.mrb[40].mxu0  ;;  %1638 = vmatpush1.bf16.msra.mxu0 %v4007_v5 }
 0x4fe   :  { %v1051_v26 = vpop.f32.mrb[41].mxu0  ;;  %1639 = vmatprep.subr.bf16.mxu0 %v4012_v6 }
 0x4ff   :  { %v1053_v37 = vpop.f32.mrb[42].mxu0 }
 0x500   :  { %v1112_v41 = vpack.c.bf16 %v1053_v37, %v1049_v7  ;;  %v1055_v42 = vpop.f32.mrb[43].mxu0 }
 0x501   :  { %v1113_v43 = vpack.c.bf16 %v1055_v42, %v1051_v26  ;;  %1640 = vmatpush1.bf16.msra.mxu0 %v4010_v21  ;;  %v4031_v26 = vld [vmem:[%s6319_s7 + $0x1a0] ss:$8 sps:$4 sm:$0xff]  }
 0x502   :  { %1641 = vmatprep.subr.bf16.mxu0 %v4015_v27  ;;  %v4036_v27 = vld [vmem:[%s6319_s7 + $0x1b4] ss:$8 sps:$4 sm:$0xff]  }
 0x503   :  { %1572 = vmatprep.mubr.bf16.mxu0 %v1113_v43  ;;  %v4039_v43 = vld [vmem:[%s6319_s7 + $0x1c4] ss:$8 sps:$4 sm:$0xff]  }
 0x504   :  { %1573 = vmatmul.mubr.bf16.gmra.mrb[72].mxu0 %v1112_v41  ;;  %v4034_v41 = vld [vmem:[%s6319_s7 + $0x1b0] ss:$8 sps:$4 sm:$0xff]  }
 0x505   :  { %v1059_v12 = vpop.f32.mrb[44].mxu0  ;;  %1642 = vmatpush1.bf16.msra.mxu0 %v4013_v45 }
 0x506   :  { %v1061_v1 = vpop.f32.mrb[45].mxu0  ;;  %1643 = vmatprep.subr.bf16.mxu0 %v4018_v9 }
 0x507   :  { %v1063_v8 = vpop.f32.mrb[46].mxu0 }
 0x508   :  { %v1114_v31 = vpack.c.bf16 %v1063_v8, %v1059_v12  ;;  %v1065_v10 = vpop.f32.mrb[47].mxu0 }
 0x509   :  { %v1115_v34 = vpack.c.bf16 %v1065_v10, %v1061_v1  ;;  %1644 = vmatpush1.bf16.msra.mxu0 %v4016_v29  ;;  %v4037_v1 = vld [vmem:[%s6319_s7 + $0x1c0] ss:$8 sps:$4 sm:$0xff]  }
 0x50a   :  { %1645 = vmatprep.subr.bf16.mxu0 %v4021_v30  ;;  %v4042_v30 = vld [vmem:[%s6319_s7 + $0x1d4] ss:$8 sps:$4 sm:$0xff]  }
 0x50b   :  { %1582 = vmatprep.mubr.bf16.mxu0 %v1115_v34  ;;  %v4045_v34 = vld [vmem:[%s6319_s7 + $0x1e4] ss:$8 sps:$4 sm:$0xff]  }
 0x50c   :  { %1583 = vmatmul.mubr.bf16.gmra.mrb[76].mxu0 %v1114_v31  ;;  %v4040_v31 = vld [vmem:[%s6319_s7 + $0x1d0] ss:$8 sps:$4 sm:$0xff]  }
 0x50d   :  { %v1069_v48 = vpop.f32.mrb[48].mxu0  ;;  %1646 = vmatpush1.bf16.msra.mxu0 %v4019_v38 }
 0x50e   :  { %v1071_v40 = vpop.f32.mrb[49].mxu0  ;;  %1647 = vmatprep.subr.bf16.mxu0 %v4024_v47 }
 0x50f   :  { %v1073_v4 = vpop.f32.mrb[50].mxu0 }
 0x510   :  { %v1116_v52 = vpack.c.bf16 %v1073_v4, %v1069_v48  ;;  %v1075_v53 = vpop.f32.mrb[51].mxu0  ;;  %v4046_v4 = vld [vmem:[%s6319_s7 + $0x1f0] ss:$8 sps:$4 sm:$0xff]  }
 0x511   :  { %v1117_v54 = vpack.c.bf16 %v1075_v53, %v1071_v40  ;;  %1648 = vmatpush1.bf16.msra.mxu0 %v4022_v14  ;;  %v4043_v40 = vld [vmem:[%s6319_s7 + $0x1e0] ss:$8 sps:$4 sm:$0xff]  }
 0x512   :  { %1649 = vmatprep.subr.bf16.mxu0 %v4027_v46  ;;  %v4048_v46 = vld [vmem:[%s6319_s7 + $0x1f4] ss:$8 sps:$4 sm:$0xff]  }
 0x513   :  { %1592 = vmatprep.mubr.bf16.mxu0 %v1117_v54 }
 0x514   :  { %1593 = vmatmul.mubr.bf16.gmra.mrb[80].mxu0 %v1116_v52 }
 0x515   :  { %v1079_v17 = vpop.f32.mrb[52].mxu0  ;;  %1650 = vmatpush1.bf16.msra.mxu0 %v4025_v15 }
 0x516   :  { %v1081_v3 = vpop.f32.mrb[53].mxu0  ;;  %1651 = vmatprep.subr.bf16.mxu0 %v4030_v61 }
 0x517   :  { %v1083_v5 = vpop.f32.mrb[54].mxu0 }
 0x518   :  { %v1118_v6 = vpack.c.bf16 %v1083_v5, %v1079_v17  ;;  %v1085_v7 = vpop.f32.mrb[55].mxu0 }
 0x519   :  { %v1119_v21 = vpack.c.bf16 %v1085_v7, %v1081_v3  ;;  %1652 = vmatpush1.bf16.msra.mxu0 %v4028_v62 }
 0x51a   :  { %1653 = vmatprep.subr.bf16.mxu0 %v4033_v18 }
 0x51b   :  { %1602 = vmatprep.mubr.bf16.mxu0 %v1119_v21 }
 0x51c   :  { %1603 = vmatmul.mubr.bf16.gmra.mrb[84].mxu0 %v1118_v6 }
 0x51d   :  { %v1089_v37 = vpop.f32.mrb[56].mxu0  ;;  %1654 = vmatpush1.bf16.msra.mxu0 %v4031_v26 }
 0x51e   :  { %v1091_v42 = vpop.f32.mrb[57].mxu0  ;;  %1655 = vmatprep.subr.bf16.mxu0 %v4036_v27 }
 0x51f   :  { %v1093_v45 = vpop.f32.mrb[58].mxu0 }
 0x520   :  { %v1120_v9 = vpack.c.bf16 %v1093_v45, %v1089_v37  ;;  %v1095_v12 = vpop.f32.mrb[59].mxu0 }
 0x521   :  { %v1121_v29 = vpack.c.bf16 %v1095_v12, %v1091_v42  ;;  %1656 = vmatpush1.bf16.msra.mxu0 %v4034_v41 }
 0x522   :  { %1657 = vmatprep.subr.bf16.mxu0 %v4039_v43 }
 0x523   :  { %1612 = vmatprep.mubr.bf16.mxu0 %v1121_v29 }
 0x524   :  { %1613 = vmatmul.mubr.bf16.gmra.mrb[88].mxu0 %v1120_v9 }
 0x525   :  { %v1099_v8 = vpop.f32.mrb[60].mxu0  ;;  %1658 = vmatpush1.bf16.msra.mxu0 %v4037_v1 }
 0x526   :  { %v1101_v10 = vpop.f32.mrb[61].mxu0  ;;  %1659 = vmatprep.subr.bf16.mxu0 %v4042_v30 }
 0x527   :  { %v1103_v38 = vpop.f32.mrb[62].mxu0 }
 0x528   :  { %v1122_v47 = vpack.c.bf16 %v1103_v38, %v1099_v8  ;;  %v1105_v48 = vpop.f32.mrb[63].mxu0 }
 0x529   :  { %v1123_v14 = vpack.c.bf16 %v1105_v48, %v1101_v10  ;;  %1660 = vmatpush1.bf16.msra.mxu0 %v4040_v31 }
 0x52a   :  { %1661 = vmatprep.subr.bf16.mxu0 %v4045_v34 }
 0x52b   :  { %1622 = vmatprep.mubr.bf16.mxu0 %v1123_v14 }
 0x52c   :  { %1623 = vmatmul.mubr.bf16.gmra.mrb[92].mxu0 %v1122_v47 }
 0x52d   :  { %1662 = vmatpush1.bf16.msra.mxu0 %v4043_v40  ;;  %1665 = vmatprep.mubr.bf16.mxu0 %v4795_v59 }
 0x52e   :  { %1663 = vmatprep.subr.bf16.mxu0 %v4048_v46 }
 0x531   :  { %1664 = vmatpush1.bf16.msra.mxu0 %v4046_v4 }
 0x534   :  { %1666 = vmatmul.mubr.bf16.vlgmr.msra.gmra.mrb[64].mxu0 %v4793_v58  ;;  %v1188_v58 = vld [vmem:[%s6320_s8] sm:$0x3] }
 0x535   :  { %1675 = vmatprep.mubr.bf16.mxu0 %v4805_v24  ;;  %v5136_v59 = vrot.slane %v1188_v58, %v4781_v39 }
 0x53c   :  { %1676 = vmatmul.mubr.bf16.gmra.mrb[68].mxu0 %v4803_v22  ;;  %v5139_v22 = vrot.slane %v1188_v58, %v4776_v35 }
 0x53d   :  { %1685 = vmatprep.mubr.bf16.mxu0 %v4815_v55 }
 0x544   :  { %1686 = vmatmul.mubr.bf16.gmra.mrb[72].mxu0 %v4813_v49 }
 0x545   :  { %1695 = vmatprep.mubr.bf16.mxu0 %v4825_v33 }
 0x54c   :  { %1696 = vmatmul.mubr.bf16.gmra.mrb[76].mxu0 %v4823_v32 }
 0x54d   :  { %1705 = vmatprep.mubr.bf16.mxu0 %v4835_v57 }
 0x554   :  { %1706 = vmatmul.mubr.bf16.gmra.mrb[80].mxu0 %v4833_v56 }
 0x555   :  { %1715 = vmatprep.mubr.bf16.mxu0 %v4845_v20 }
 0x55c   :  { %1716 = vmatmul.mubr.bf16.gmra.mrb[84].mxu0 %v4843_v25 }
 0x55d   :  { %1725 = vmatprep.mubr.bf16.mxu0 %v4855_v23 }
 0x564   :  { %1726 = vmatmul.mubr.bf16.gmra.mrb[88].mxu0 %v4853_v16 }
 0x565   :  { %1735 = vmatprep.mubr.bf16.mxu0 %v4865_v51 }
 0x56c   :  { %1736 = vmatmul.mubr.bf16.gmra.mrb[92].mxu0 %v4863_v13 }
 0x607   :  { %v1667_v24 = vpop.f32.mrb[64].mxu0 }
 0x608   :  { %v1669_v49 = vpop.f32.mrb[65].mxu0  ;;  %v5145_v33 = vadd.f32 %v1667_v24, %v5139_v22 }
 0x609   :  { %v5142_v55 = vadd.f32 %v1669_v49, %v5136_v59  ;;  %v1671_v32 = vpop.f32.mrb[66].mxu0 }
 0x60a   :  { %v5148_v56 = vadd.f32 %v1671_v32, %v5139_v22  ;;  %v1673_v57 = vpop.f32.mrb[67].mxu0  ;;  %v6350_v13 = vmax.f32 %v5145_v33, 0.0 }
 0x60b   :  { %v5151_v25 = vadd.f32 %v1673_v57, %v5136_v59  ;;  %v6348_v16 = vmax.f32 %v5142_v55, 0.0 }
 0x60c   :  { %v6349_v20 = vmax.f32 %v5148_v56, 0.0 }
 0x60d   :  { %v6347_v23 = vmax.f32 %v5151_v25, 0.0 }
 0x60e   :  { %v5167_v53 = vpack.c.bf16 %v6349_v20, %v6350_v13 }
 0x60f   :  { %v5161_v51 = vpack.c.bf16 %v6347_v23, %v6348_v16  ;;  %v1677_v52 = vpop.f32.mrb[68].mxu0 }
 0x610   :  { %v1679_v54 = vpop.f32.mrb[69].mxu0  ;;  %v5174_v17 = vadd.f32 %v1677_v52, %v5139_v22 }
 0x611   :  { %v5170_v15 = vadd.f32 %v1679_v54, %v5136_v59  ;;  %v1681_v61 = vpop.f32.mrb[70].mxu0  ;;  %1794 = vmatprep.subr.bf16.mxu1 %v5161_v51 }
 0x612   :  { %v5177_v62 = vadd.f32 %v1681_v61, %v5139_v22  ;;  %v1683_v3 = vpop.f32.mrb[71].mxu0  ;;  %1795 = vmatpush1.bf16.msra.mxu1 %v5167_v53  ;;  %v6346_v21 = vmax.f32 %v5174_v17, 0.0 }
 0x613   :  { %v5181_v18 = vadd.f32 %v1683_v3, %v5136_v59  ;;  %v6340_v6 = vmax.f32 %v5170_v15, 0.0 }
 0x614   :  { %v6343_v5 = vmax.f32 %v5177_v62, 0.0 }
 0x615   :  { %v6339_v7 = vmax.f32 %v5181_v18, 0.0 }
 0x616   :  { %v5197_v37 = vpack.c.bf16 %v6343_v5, %v6346_v21 }
 0x617   :  { %v5191_v26 = vpack.c.bf16 %v6339_v7, %v6340_v6  ;;  %v1687_v27 = vpop.f32.mrb[72].mxu0 }
 0x618   :  { %v1689_v41 = vpop.f32.mrb[73].mxu0  ;;  %v5204_v45 = vadd.f32 %v1687_v27, %v5139_v22 }
 0x619   :  { %v5200_v42 = vadd.f32 %v1689_v41, %v5136_v59  ;;  %v1691_v43 = vpop.f32.mrb[74].mxu0  ;;  %1796 = vmatprep.subr.bf16.mxu1 %v5191_v26 }
 0x61a   :  { %6386 = vst [vmem:[#allocation6_spill] sm:$0xff] %v5204_v45  ;;  %v5207_v9 = vadd.f32 %v1691_v43, %v5139_v22  ;;  %v1693_v12 = vpop.f32.mrb[75].mxu0  ;;  %1797 = vmatpush1.bf16.msra.mxu1 %v5197_v37  ;;  %v6338_v31 = vmax.f32 %v5204_v45, 0.0 }
 0x61b   :  { %6385 = vst [vmem:[#allocation5_spill] sm:$0xff] %v5200_v42  ;;  %v5211_v29 = vadd.f32 %v1693_v12, %v5136_v59  ;;  %v6336_v30 = vmax.f32 %v5200_v42, 0.0 }
 0x61c   :  { %6387 = vst [vmem:[#allocation7_spill] sm:$0xff] %v5207_v9  ;;  %v6337_v1 = vmax.f32 %v5207_v9, 0.0 }
 0x61d   :  { %6388 = vst [vmem:[#allocation8_spill] sm:$0xff] %v5211_v29  ;;  %v6333_v8 = vmax.f32 %v5211_v29, 0.0  ;;  %v4132_v29 = vld [vmem:[%s6321_s9 + $0x1b4] ss:$8 sps:$4 sm:$0xff]  }
 0x61e   :  { %v5227_v38 = vpack.c.bf16 %v6337_v1, %v6338_v31 }
 0x61f   :  { %v5221_v10 = vpack.c.bf16 %v6333_v8, %v6336_v30  ;;  %v1697_v34 = vpop.f32.mrb[76].mxu0 }
 0x620   :  { %v1699_v47 = vpop.f32.mrb[77].mxu0  ;;  %v5234_v40 = vadd.f32 %v1697_v34, %v5139_v22 }
 0x621   :  { %v5230_v48 = vadd.f32 %v1699_v47, %v5136_v59  ;;  %v1701_v14 = vpop.f32.mrb[78].mxu0  ;;  %1798 = vmatprep.subr.bf16.mxu1 %v5221_v10 }
 0x622   :  { %6390 = vst [vmem:[#allocation10_spill] sm:$0xff] %v5234_v40  ;;  %v5237_v46 = vadd.f32 %v1701_v14, %v5139_v22  ;;  %v1703_v4 = vpop.f32.mrb[79].mxu0  ;;  %1799 = vmatpush1.bf16.msra.mxu1 %v5227_v38  ;;  %v6330_v57 = vmax.f32 %v5234_v40, 0.0  ;;  %v4127_v40 = vld [vmem:[%s6321_s9 + $0x1a0] ss:$8 sps:$4 sm:$0xff]  }
 0x623   :  { %6389 = vst [vmem:[#allocation9_spill] sm:$0xff] %v5230_v48  ;;  %v5241_v58 = vadd.f32 %v1703_v4, %v5136_v59  ;;  %v6328_v49 = vmax.f32 %v5230_v48, 0.0 }
 0x624   :  { %6391 = vst [vmem:[#allocation11_spill] sm:$0xff] %v5237_v46  ;;  %v6329_v24 = vmax.f32 %v5237_v46, 0.0 }
 0x625   :  { %6392 = vst [vmem:[#allocation12_spill] sm:$0xff] %v5241_v58  ;;  %v6327_v32 = vmax.f32 %v5241_v58, 0.0  ;;  %v4126_v58 = vld [vmem:[%s6321_s9 + $0x194] ss:$8 sps:$4 sm:$0xff]  }
 0x626   :  { %v5257_v61 = vpack.c.bf16 %v6329_v24, %v6330_v57 }
 0x627   :  { %v5251_v52 = vpack.c.bf16 %v6327_v32, %v6328_v49  ;;  %v1707_v54 = vpop.f32.mrb[80].mxu0 }
 0x628   :  { %v1709_v3 = vpop.f32.mrb[81].mxu0  ;;  %v5264_v43 = vadd.f32 %v1707_v54, %v5139_v22 }
 0x629   :  { %v5260_v27 = vadd.f32 %v1709_v3, %v5136_v59  ;;  %v1711_v41 = vpop.f32.mrb[82].mxu0  ;;  %1800 = vmatprep.subr.bf16.mxu1 %v5251_v52 }
 0x62a   :  { %6394 = vst [vmem:[#allocation14_spill] sm:$0xff] %v5264_v43  ;;  %v5267_v12 = vadd.f32 %v1711_v41, %v5139_v22  ;;  %v1713_v34 = vpop.f32.mrb[83].mxu0  ;;  %1801 = vmatpush1.bf16.msra.mxu1 %v5257_v61  ;;  %v6335_v28 = vmax.f32 %v5264_v43, 0.0  ;;  %v4121_v43 = vld [vmem:[%s6321_s9 + $0x180] ss:$8 sps:$4 sm:$0xff]  }
 0x62b   :  { %6393 = vst [vmem:[#allocation13_spill] sm:$0xff] %v5260_v27  ;;  %v5271_v47 = vadd.f32 %v1713_v34, %v5136_v59  ;;  %v6332_v4 = vmax.f32 %v5260_v27, 0.0 }
 0x62c   :  { %6395 = vst [vmem:[#allocation15_spill] sm:$0xff] %v5267_v12  ;;  %v6334_v14 = vmax.f32 %v5267_v12, 0.0 }
 0x62d   :  { %6396 = vst [vmem:[#allocation16_spill] sm:$0xff] %v5271_v47  ;;  %v6331_v3 = vmax.f32 %v5271_v47, 0.0  ;;  %v4120_v47 = vld [vmem:[%s6321_s9 + $0x174] ss:$8 sps:$4 sm:$0xff]  }
 0x62e   :  { %v5287_v34 = vpack.c.bf16 %v6334_v14, %v6335_v28 }
 0x62f   :  { %v5281_v54 = vpack.c.bf16 %v6331_v3, %v6332_v4  ;;  %v1717_v41 = vpop.f32.mrb[84].mxu0 }
 0x630   :  { %v1719_v32 = vpop.f32.mrb[85].mxu0  ;;  %v5294_v57 = vadd.f32 %v1717_v41, %v5139_v22 }
 0x631   :  { %v5290_v49 = vadd.f32 %v1719_v32, %v5136_v59  ;;  %v1721_v24 = vpop.f32.mrb[86].mxu0  ;;  %1802 = vmatprep.subr.bf16.mxu1 %v5281_v54 }
 0x632   :  { %6398 = vst [vmem:[#allocation18_spill] sm:$0xff] %v5294_v57  ;;  %v5297_v3 = vadd.f32 %v1721_v24, %v5139_v22  ;;  %v1723_v4 = vpop.f32.mrb[87].mxu0  ;;  %1803 = vmatpush1.bf16.msra.mxu1 %v5287_v34  ;;  %v6345_v30 = vmax.f32 %v5294_v57, 0.0  ;;  %v4115_v57 = vld [vmem:[%s6321_s9 + $0x160] ss:$8 sps:$4 sm:$0xff]  }
 0x633   :  { %6397 = vst [vmem:[#allocation17_spill] sm:$0xff] %v5290_v49  ;;  %v5301_v8 = vadd.f32 %v1723_v4, %v5136_v59  ;;  %v6342_v32 = vmax.f32 %v5290_v49, 0.0 }
 0x634   :  { %6399 = vst [vmem:[#allocation19_spill] sm:$0xff] %v5297_v3  ;;  %v6344_v14 = vmax.f32 %v5297_v3, 0.0 }
 0x635   :  { %6400 = vst [vmem:[#allocation20_spill] sm:$0xff] %v5301_v8  ;;  %v6341_v28 = vmax.f32 %v5301_v8, 0.0  ;;  %v4114_v8 = vld [vmem:[%s6321_s9 + $0x154] ss:$8 sps:$4 sm:$0xff]  }
 0x636   :  { %v5317_v4 = vpack.c.bf16 %v6344_v14, %v6345_v30 }
 0x637   :  { %v5311_v24 = vpack.c.bf16 %v6341_v28, %v6342_v32  ;;  %v1727_v41 = vpop.f32.mrb[88].mxu0 }
 0x638   :  { %v1729_v1 = vpop.f32.mrb[89].mxu0  ;;  %v5324_v6 = vadd.f32 %v1727_v41, %v5139_v22 }
 0x639   :  { %v5320_v31 = vadd.f32 %v1729_v1, %v5136_v59  ;;  %v1731_v7 = vpop.f32.mrb[90].mxu0  ;;  %1804 = vmatprep.subr.bf16.mxu1 %v5311_v24 }
 0x63a   :  { %6402 = vst [vmem:[#allocation22_spill] sm:$0xff] %v5324_v6  ;;  %v5327_v28 = vadd.f32 %v1731_v7, %v5139_v22  ;;  %v1733_v32 = vpop.f32.mrb[91].mxu0  ;;  %1805 = vmatpush1.bf16.msra.mxu1 %v5317_v4  ;;  %v6356_v21 = vmax.f32 %v5324_v6, 0.0  ;;  %v4109_v6 = vld [vmem:[%s6321_s9 + $0x140] ss:$8 sps:$4 sm:$0xff]  }
 0x63b   :  { %6401 = vst [vmem:[#allocation21_spill] sm:$0xff] %v5320_v31  ;;  %v5331_v5 = vadd.f32 %v1733_v32, %v5136_v59  ;;  %v6352_v1 = vmax.f32 %v5320_v31, 0.0 }
 0x63c   :  { %6403 = vst [vmem:[#allocation23_spill] sm:$0xff] %v5327_v28  ;;  %v6355_v14 = vmax.f32 %v5327_v28, 0.0 }
 0x63d   :  { %6404 = vst [vmem:[#allocation24_spill] sm:$0xff] %v5331_v5  ;;  %v6351_v30 = vmax.f32 %v5331_v5, 0.0 }
 0x63e   :  { %v5347_v32 = vpack.c.bf16 %v6355_v14, %v6356_v21 }
 0x63f   :  { %v5341_v7 = vpack.c.bf16 %v6351_v30, %v6352_v1  ;;  %v1737_v41 = vpop.f32.mrb[92].mxu0 }
 0x640   :  { %v1739_v23 = vpop.f32.mrb[93].mxu0  ;;  %v5354_v13 = vadd.f32 %v1737_v41, %v5139_v22  ;;  %v4054_v41 = vld [vmem:[%s6321_s9 + $0x14] ss:$8 sps:$4 sm:$0xff]  }
 0x641   :  { %v5350_v16 = vadd.f32 %v1739_v23, %v5136_v59  ;;  %v1741_v20 = vpop.f32.mrb[94].mxu0  ;;  %1806 = vmatprep.subr.bf16.mxu1 %v5341_v7 }
 0x642   :  { %6406 = vst [vmem:[#allocation26_spill] sm:$0xff] %v5354_v13  ;;  %v5357_v30 = vadd.f32 %v1741_v20, %v5139_v22  ;;  %v1743_v1 = vpop.f32.mrb[95].mxu0  ;;  %1807 = vmatpush1.bf16.msra.mxu1 %v5347_v32  ;;  %v6361_v5 = vmax.f32 %v5354_v13, 0.0  ;;  %v4051_v20 = vld [vmem:[%s6321_s9 + $0x4] ss:$8 sps:$4 sm:$0xff]  }
 0x643   :  { %6405 = vst [vmem:[#allocation25_spill] sm:$0xff] %v5350_v16  ;;  %v5361_v11 = vadd.f32 %v1743_v1, %v5136_v59  ;;  %v6359_v23 = vmax.f32 %v5350_v16, 0.0  ;;  %v4049_v1 = vld [vmem:[%s6321_s9] ss:$8 sps:$4 sm:$0xff]   ;;  %v4108_v13 = vld [vmem:[%s6321_s9 + $0x134] ss:$8 sps:$4 sm:$0xff]  }
 0x644   :  { %6407 = vst [vmem:[#allocation27_spill] sm:$0xff] %v5357_v30  ;;  %v6360_v14 = vmax.f32 %v5357_v30, 0.0  ;;  %v4103_v30 = vld [vmem:[%s6321_s9 + $0x120] ss:$8 sps:$4 sm:$0xff]  }
 0x645   :  { %6408 = vst [vmem:[#allocation28_spill] sm:$0xff] %v5361_v11  ;;  %v6358_v21 = vmax.f32 %v5361_v11, 0.0 }
 0x646   :  { %v5380_v59 = vpack.c.bf16 %v6360_v14, %v6361_v5  ;;  %v4057_v14 = vld [vmem:[%s6321_s9 + $0x24] ss:$8 sps:$4 sm:$0xff]   ;;  %v5551_v5 = vld [vmem:[%s6323_s11 + $0x30] ss:$8 sps:$4 sm:$0xff]  }
 0x647   :  { %v5371_v22 = vpack.c.bf16 %v6358_v21, %v6359_v23  ;;  %v6409_v21 = vmov 0   ;;  %v4052_v23 = vld [vmem:[%s6321_s9 + $0x10] ss:$8 sps:$4 sm:$0xff]  }
 0x649   :  { %1808 = vmatprep.subr.bf16.mxu1 %v5371_v22 }
 0x64a   :  { %1809 = vmatpush1.bf16.msra.mxu1 %v5380_v59 }
 0x64b   :  { %2319 = vmatprep.subr.bf16.mxu1 %v4051_v20  ;;  %v4055_v20 = vld [vmem:[%s6321_s9 + $0x20] ss:$8 sps:$4 sm:$0xff]  }
 0x64d   :  { %1827 = vmatmul.mubr.bf16.vlgmr.msra.gmra.mrb[64].mxu1 %v4881_v2  ;;  %v4060_v2 = vld [vmem:[%s6321_s9 + $0x34] ss:$8 sps:$4 sm:$0xff]  }
 0x64e   :  { %1836 = vmatprep.mubr.bf16.mxu1 %v6409_v21  ;;  %2320 = vmatpush1.bf16.msra.mxu1 %v4049_v1  ;;  %v4058_v1 = vld [vmem:[%s6321_s9 + $0x30] ss:$8 sps:$4 sm:$0xff]  }
 0x64f   :  { %2321 = vmatprep.subr.bf16.mxu1 %v4054_v41  ;;  %v4064_v41 = vld [vmem:[%s6321_s9 + $0x50] ss:$8 sps:$4 sm:$0xff]  }
 0x652   :  { %2322 = vmatpush1.bf16.msra.mxu1 %v4052_v23  ;;  %v4063_v23 = vld [vmem:[%s6321_s9 + $0x44] ss:$8 sps:$4 sm:$0xff]  }
 0x653   :  { %2323 = vmatprep.subr.bf16.mxu1 %v4057_v14  ;;  %v4061_v14 = vld [vmem:[%s6321_s9 + $0x40] ss:$8 sps:$4 sm:$0xff]  }
 0x655   :  { %1837 = vmatmul.mubr.bf16.gmra.mrb[68].mxu1 %v4900_v60  ;;  %v4066_v60 = vld [vmem:[%s6321_s9 + $0x54] ss:$8 sps:$4 sm:$0xff]  }
 0x656   :  { %1846 = vmatprep.mubr.bf16.mxu1 %v6409_v21  ;;  %2324 = vmatpush1.bf16.msra.mxu1 %v4055_v20  ;;  %v4069_v20 = vld [vmem:[%s6321_s9 + $0x64] ss:$8 sps:$4 sm:$0xff]  }
 0x657   :  { %2325 = vmatprep.subr.bf16.mxu1 %v4060_v2  ;;  %v4067_v2 = vld [vmem:[%s6321_s9 + $0x60] ss:$8 sps:$4 sm:$0xff]  }
 0x65a   :  { %2326 = vmatpush1.bf16.msra.mxu1 %v4058_v1  ;;  %v4070_v1 = vld [vmem:[%s6321_s9 + $0x70] ss:$8 sps:$4 sm:$0xff]  }
 0x65b   :  { %2327 = vmatprep.subr.bf16.mxu1 %v4063_v23  ;;  %v4075_v23 = vld [vmem:[%s6321_s9 + $0x84] ss:$8 sps:$4 sm:$0xff]  }
 0x65d   :  { %1847 = vmatmul.mubr.bf16.gmra.mrb[72].mxu1 %v4919_v63  ;;  %v4072_v63 = vld [vmem:[%s6321_s9 + $0x74] ss:$8 sps:$4 sm:$0xff]  }
 0x65e   :  { %1856 = vmatprep.mubr.bf16.mxu1 %v6409_v21  ;;  %2328 = vmatpush1.bf16.msra.mxu1 %v4061_v14  ;;  %v4073_v14 = vld [vmem:[%s6321_s9 + $0x80] ss:$8 sps:$4 sm:$0xff]  }
 0x65f   :  { %2329 = vmatprep.subr.bf16.mxu1 %v4066_v60  ;;  %v4076_v60 = vld [vmem:[%s6321_s9 + $0x90] ss:$8 sps:$4 sm:$0xff]  }
 0x662   :  { %2330 = vmatpush1.bf16.msra.mxu1 %v4064_v41  ;;  %v4081_v41 = vld [vmem:[%s6321_s9 + $0xa4] ss:$8 sps:$4 sm:$0xff]  }
 0x663   :  { %2331 = vmatprep.subr.bf16.mxu1 %v4069_v20  ;;  %v4079_v20 = vld [vmem:[%s6321_s9 + $0xa0] ss:$8 sps:$4 sm:$0xff]  }
 0x665   :  { %1857 = vmatmul.mubr.bf16.gmra.mrb[76].mxu1 %v4938_v19  ;;  %v4078_v19 = vld [vmem:[%s6321_s9 + $0x94] ss:$8 sps:$4 sm:$0xff]  }
 0x666   :  { %1866 = vmatprep.mubr.bf16.mxu1 %v6409_v21  ;;  %2332 = vmatpush1.bf16.msra.mxu1 %v4067_v2  ;;  %v4082_v2 = vld [vmem:[%s6321_s9 + $0xb0] ss:$8 sps:$4 sm:$0xff]  }
 0x667   :  { %2333 = vmatprep.subr.bf16.mxu1 %v4072_v63  ;;  %v4087_v63 = vld [vmem:[%s6321_s9 + $0xc4] ss:$8 sps:$4 sm:$0xff]  }
 0x66a   :  { %2334 = vmatpush1.bf16.msra.mxu1 %v4070_v1  ;;  %v4085_v1 = vld [vmem:[%s6321_s9 + $0xc0] ss:$8 sps:$4 sm:$0xff]  }
 0x66b   :  { %2335 = vmatprep.subr.bf16.mxu1 %v4075_v23  ;;  %v4088_v23 = vld [vmem:[%s6321_s9 + $0xd0] ss:$8 sps:$4 sm:$0xff]  }
 0x66d   :  { %1867 = vmatmul.mubr.bf16.gmra.mrb[80].mxu1 %v4957_v36  ;;  %v4084_v36 = vld [vmem:[%s6321_s9 + $0xb4] ss:$8 sps:$4 sm:$0xff]  }
 0x66e   :  { %1876 = vmatprep.mubr.bf16.mxu1 %v6409_v21  ;;  %2336 = vmatpush1.bf16.msra.mxu1 %v4073_v14  ;;  %v4093_v14 = vld [vmem:[%s6321_s9 + $0xe4] ss:$8 sps:$4 sm:$0xff]  }
 0x66f   :  { %2337 = vmatprep.subr.bf16.mxu1 %v4078_v19  ;;  %v4091_v19 = vld [vmem:[%s6321_s9 + $0xe0] ss:$8 sps:$4 sm:$0xff]  }
 0x672   :  { %2338 = vmatpush1.bf16.msra.mxu1 %v4076_v60  ;;  %v4099_v60 = vld [vmem:[%s6321_s9 + $0x104] ss:$8 sps:$4 sm:$0xff]  }
 0x673   :  { %2339 = vmatprep.subr.bf16.mxu1 %v4081_v41  ;;  %v5503_v41 = vld [vmem:[%s6323_s11 + $0x4] ss:$8 sps:$4 sm:$0xff]  }
 0x674   :  { %2819 = vmatprep.subr.bf16.mxu0 %v5503_v41 }
 0x675   :  { %1877 = vmatmul.mubr.bf16.gmra.mrb[84].mxu1 %v4976_v44  ;;  %v4090_v44 = vld [vmem:[%s6321_s9 + $0xd4] ss:$8 sps:$4 sm:$0xff]  }
 0x676   :  { %1886 = vmatprep.mubr.bf16.mxu1 %v6409_v21  ;;  %2340 = vmatpush1.bf16.msra.mxu1 %v4079_v20 }
 0x677   :  { %2341 = vmatprep.subr.bf16.mxu1 %v4084_v36  ;;  %v5508_v36 = vld [vmem:[%s6323_s11 + $0x14] ss:$8 sps:$4 sm:$0xff]  }
 0x67a   :  { %2342 = vmatpush1.bf16.msra.mxu1 %v4082_v2 }
 0x67b   :  { %2343 = vmatprep.subr.bf16.mxu1 %v4087_v63 }
 0x67d   :  { %1887 = vmatmul.mubr.bf16.gmra.mrb[88].mxu1 %v4995_v0  ;;  %v4096_v0 = vld [vmem:[%s6321_s9 + $0xf4] ss:$8 sps:$4 sm:$0xff]  }
 0x67e   :  { %1896 = vmatprep.mubr.bf16.mxu1 %v6409_v21  ;;  %2344 = vmatpush1.bf16.msra.mxu1 %v4085_v1  ;;  %v4094_v21 = vld [vmem:[%s6321_s9 + $0xf0] ss:$8 sps:$4 sm:$0xff]  }
 0x67f   :  { %2345 = vmatprep.subr.bf16.mxu1 %v4090_v44  ;;  %v5515_v1 = vld [vmem:[%s6323_s11 + $0x10] ss:$8 sps:$4 sm:$0xff]  }
 0x682   :  { %2346 = vmatpush1.bf16.msra.mxu1 %v4088_v23 }
 0x683   :  { %2347 = vmatprep.subr.bf16.mxu1 %v4093_v14  ;;  %v5521_v14 = vld [vmem:[%s6323_s11 + $0x24] ss:$8 sps:$4 sm:$0xff]  }
 0x685   :  { %1897 = vmatmul.mubr.bf16.gmra.mrb[92].mxu1 %v5011_v50  ;;  %v5498_v50 = vld [vmem:[%s6323_s11] ss:$8 sps:$4 sm:$0xff]  }
 0x686   :  { %2348 = vmatpush1.bf16.msra.mxu1 %v4091_v19  ;;  %2820 = vmatpush1.bf16.msra.mxu0 %v5498_v50 }
 0x687   :  { %2349 = vmatprep.subr.bf16.mxu1 %v4096_v0  ;;  %2821 = vmatprep.subr.bf16.mxu0 %v5508_v36  ;;  %v4097_v0 = vld [vmem:[%s6321_s9 + $0x100] ss:$8 sps:$4 sm:$0xff]  }
 0x68a   :  { %2350 = vmatpush1.bf16.msra.mxu1 %v4094_v21  ;;  %v4102_v21 = vld [vmem:[%s6321_s9 + $0x114] ss:$8 sps:$4 sm:$0xff]   ;;  %2822 = vmatpush1.bf16.msra.mxu0 %v5515_v1 }
 0x68b   :  { %2432 = vmatprep.subr.bf16.mxu1 %v4099_v60  ;;  %v5533_v60 = vld [vmem:[%s6323_s11 + $0x20] ss:$8 sps:$4 sm:$0xff]   ;;  %2823 = vmatprep.subr.bf16.mxu0 %v5521_v14 }
 0x68e   :  { %2824 = vmatpush1.bf16.msra.mxu0 %v5533_v60 }
 0x720   :  { %v1828_v20 = vpop.f32.mrb[64].mxu1 }
 0x721   :  { %v1830_v2 = vpop.f32.mrb[65].mxu1 }
 0x722   :  { %v1832_v63 = vpop.f32.mrb[66].mxu1 }
 0x723   :  { %v1907_v44 = vpack.c.bf16 %v1832_v63, %v1828_v20  ;;  %v1834_v23 = vpop.f32.mrb[67].mxu1  ;;  %v5539_v20 = vld [vmem:[%s6323_s11 + $0x34] ss:$8 sps:$4 sm:$0xff]   ;;  %v4100_v63 = vld [vmem:[%s6321_s9 + $0x110] ss:$8 sps:$4 sm:$0xff]  }
 0x724   :  { %v1908_v19 = vpack.c.bf16 %v1834_v23, %v1830_v2  ;;  %2825 = vmatprep.subr.bf16.mxu0 %v5539_v20 }
 0x725   :  { %2826 = vmatpush1.bf16.msra.mxu0 %v5551_v5 }
 0x726   :  { %2351 = vmatprep.mubr.bf16.mxu1 %v1908_v19  ;;  %v4105_v19 = vld [vmem:[%s6321_s9 + $0x124] ss:$8 sps:$4 sm:$0xff]  }
 0x727   :  { %2352 = vmatmul.mubr.bf16.vlgmr.msra.gmra.mrb[96].mxu1 %v1907_v44 }
 0x728   :  { %v1838_v2 = vpop.f32.mrb[68].mxu1  ;;  %2433 = vmatpush1.bf16.msra.mxu1 %v4097_v0 }
 0x729   :  { %v1840_v23 = vpop.f32.mrb[69].mxu1  ;;  %2434 = vmatprep.subr.bf16.mxu1 %v4102_v21  ;;  %v5557_v21 = vld [vmem:[%s6323_s11 + $0x44] ss:$8 sps:$4 sm:$0xff]  }
 0x72a   :  { %v1842_v44 = vpop.f32.mrb[70].mxu1  ;;  %2827 = vmatprep.subr.bf16.mxu0 %v5557_v21 }
 0x72b   :  { %v1909_v11 = vpack.c.bf16 %v1842_v44, %v1838_v2  ;;  %v1844_v0 = vpop.f32.mrb[71].mxu1  ;;  %v5569_v2 = vld [vmem:[%s6323_s11 + $0x40] ss:$8 sps:$4 sm:$0xff]   ;;  %v4111_v44 = vld [vmem:[%s6321_s9 + $0x144] ss:$8 sps:$4 sm:$0xff]  }
 0x72c   :  { %v1910_v16 = vpack.c.bf16 %v1844_v0, %v1840_v23  ;;  %2435 = vmatpush1.bf16.msra.mxu1 %v4100_v63  ;;  %v5575_v63 = vld [vmem:[%s6323_s11 + $0x54] ss:$8 sps:$4 sm:$0xff]   ;;  %2828 = vmatpush1.bf16.msra.mxu0 %v5569_v2  ;;  %v5587_v0 = vld [vmem:[%s6323_s11 + $0x50] ss:$8 sps:$4 sm:$0xff]  }
 0x72d   :  { %2436 = vmatprep.subr.bf16.mxu1 %v4105_v19  ;;  %2829 = vmatprep.subr.bf16.mxu0 %v5575_v63 }
 0x72e   :  { %2361 = vmatprep.mubr.bf16.mxu1 %v1910_v16  ;;  %v4106_v16 = vld [vmem:[%s6321_s9 + $0x130] ss:$8 sps:$4 sm:$0xff]  }
 0x72f   :  { %2362 = vmatmul.mubr.bf16.gmra.mrb[100].mxu1 %v1909_v11 }
 0x730   :  { %v1848_v23 = vpop.f32.mrb[72].mxu1  ;;  %2437 = vmatpush1.bf16.msra.mxu1 %v4103_v30  ;;  %2830 = vmatpush1.bf16.msra.mxu0 %v5587_v0 }
 0x731   :  { %v1850_v19 = vpop.f32.mrb[73].mxu1  ;;  %2438 = vmatprep.subr.bf16.mxu1 %v4108_v13  ;;  %v5593_v13 = vld [vmem:[%s6323_s11 + $0x64] ss:$8 sps:$4 sm:$0xff]  }
 0x732   :  { %v1852_v11 = vpop.f32.mrb[74].mxu1  ;;  %2831 = vmatprep.subr.bf16.mxu0 %v5593_v13 }
 0x733   :  { %v1911_v31 = vpack.c.bf16 %v1852_v11, %v1848_v23  ;;  %v1854_v30 = vpop.f32.mrb[75].mxu1  ;;  %v5605_v23 = vld [vmem:[%s6323_s11 + $0x60] ss:$8 sps:$4 sm:$0xff]   ;;  %v4117_v11 = vld [vmem:[%s6321_s9 + $0x164] ss:$8 sps:$4 sm:$0xff]  }
 0x734   :  { %v1912_v28 = vpack.c.bf16 %v1854_v30, %v1850_v19  ;;  %2439 = vmatpush1.bf16.msra.mxu1 %v4106_v16  ;;  %v5611_v16 = vld [vmem:[%s6323_s11 + $0x74] ss:$8 sps:$4 sm:$0xff]   ;;  %2832 = vmatpush1.bf16.msra.mxu0 %v5605_v23  ;;  %v5623_v30 = vld [vmem:[%s6323_s11 + $0x70] ss:$8 sps:$4 sm:$0xff]  }
 0x735   :  { %2440 = vmatprep.subr.bf16.mxu1 %v4111_v44  ;;  %2833 = vmatprep.subr.bf16.mxu0 %v5611_v16 }
 0x736   :  { %2371 = vmatprep.mubr.bf16.mxu1 %v1912_v28  ;;  %v4112_v28 = vld [vmem:[%s6321_s9 + $0x150] ss:$8 sps:$4 sm:$0xff]  }
 0x737   :  { %2372 = vmatmul.mubr.bf16.gmra.mrb[104].mxu1 %v1911_v31 }
 0x738   :  { %v1858_v19 = vpop.f32.mrb[76].mxu1  ;;  %2441 = vmatpush1.bf16.msra.mxu1 %v4109_v6  ;;  %2834 = vmatpush1.bf16.msra.mxu0 %v5623_v30 }
 0x739   :  { %v1860_v44 = vpop.f32.mrb[77].mxu1  ;;  %2442 = vmatprep.subr.bf16.mxu1 %v4114_v8  ;;  %v5629_v8 = vld [vmem:[%s6323_s11 + $0x84] ss:$8 sps:$4 sm:$0xff]  }
 0x73a   :  { %v1862_v31 = vpop.f32.mrb[78].mxu1  ;;  %2835 = vmatprep.subr.bf16.mxu0 %v5629_v8 }
 0x73b   :  { %v1913_v49 = vpack.c.bf16 %v1862_v31, %v1858_v19  ;;  %v1864_v6 = vpop.f32.mrb[79].mxu1  ;;  %v5641_v19 = vld [vmem:[%s6323_s11 + $0x80] ss:$8 sps:$4 sm:$0xff]   ;;  %v4123_v31 = vld [vmem:[%s6321_s9 + $0x184] ss:$8 sps:$4 sm:$0xff]  }
 0x73c   :  { %v1914_v3 = vpack.c.bf16 %v1864_v6, %v1860_v44  ;;  %2443 = vmatpush1.bf16.msra.mxu1 %v4112_v28  ;;  %v5647_v28 = vld [vmem:[%s6323_s11 + $0x94] ss:$8 sps:$4 sm:$0xff]   ;;  %2836 = vmatpush1.bf16.msra.mxu0 %v5641_v19  ;;  %v5659_v6 = vld [vmem:[%s6323_s11 + $0x90] ss:$8 sps:$4 sm:$0xff]  }
 0x73d   :  { %2444 = vmatprep.subr.bf16.mxu1 %v4117_v11  ;;  %2837 = vmatprep.subr.bf16.mxu0 %v5647_v28 }
 0x73e   :  { %2381 = vmatprep.mubr.bf16.mxu1 %v1914_v3  ;;  %v4118_v3 = vld [vmem:[%s6321_s9 + $0x170] ss:$8 sps:$4 sm:$0xff]  }
 0x73f   :  { %2382 = vmatmul.mubr.bf16.gmra.mrb[108].mxu1 %v1913_v49 }
 0x740   :  { %v1868_v44 = vpop.f32.mrb[80].mxu1  ;;  %2445 = vmatpush1.bf16.msra.mxu1 %v4115_v57  ;;  %2838 = vmatpush1.bf16.msra.mxu0 %v5659_v6 }
 0x741   :  { %v1870_v11 = vpop.f32.mrb[81].mxu1  ;;  %2446 = vmatprep.subr.bf16.mxu1 %v4120_v47  ;;  %v5665_v47 = vld [vmem:[%s6323_s11 + $0xa4] ss:$8 sps:$4 sm:$0xff]  }
 0x742   :  { %v1872_v49 = vpop.f32.mrb[82].mxu1  ;;  %2839 = vmatprep.subr.bf16.mxu0 %v5665_v47 }
 0x743   :  { %v1915_v27 = vpack.c.bf16 %v1872_v49, %v1868_v44  ;;  %v1874_v57 = vpop.f32.mrb[83].mxu1  ;;  %v5677_v44 = vld [vmem:[%s6323_s11 + $0xa0] ss:$8 sps:$4 sm:$0xff]   ;;  %v4129_v49 = vld [vmem:[%s6321_s9 + $0x1a4] ss:$8 sps:$4 sm:$0xff]  }
 0x744   :  { %v1916_v12 = vpack.c.bf16 %v1874_v57, %v1870_v11  ;;  %2447 = vmatpush1.bf16.msra.mxu1 %v4118_v3  ;;  %v5683_v3 = vld [vmem:[%s6323_s11 + $0xb4] ss:$8 sps:$4 sm:$0xff]   ;;  %2840 = vmatpush1.bf16.msra.mxu0 %v5677_v44  ;;  %v5695_v57 = vld [vmem:[%s6323_s11 + $0xb0] ss:$8 sps:$4 sm:$0xff]  }
 0x745   :  { %2448 = vmatprep.subr.bf16.mxu1 %v4123_v31  ;;  %2841 = vmatprep.subr.bf16.mxu0 %v5683_v3 }
 0x746   :  { %2391 = vmatprep.mubr.bf16.mxu1 %v1916_v12  ;;  %v4124_v12 = vld [vmem:[%s6321_s9 + $0x190] ss:$8 sps:$4 sm:$0xff]  }
 0x747   :  { %2392 = vmatmul.mubr.bf16.gmra.mrb[112].mxu1 %v1915_v27 }
 0x748   :  { %v1878_v11 = vpop.f32.mrb[84].mxu1  ;;  %2449 = vmatpush1.bf16.msra.mxu1 %v4121_v43  ;;  %2842 = vmatpush1.bf16.msra.mxu0 %v5695_v57 }
 0x749   :  { %v1880_v31 = vpop.f32.mrb[85].mxu1  ;;  %2450 = vmatprep.subr.bf16.mxu1 %v4126_v58  ;;  %v5701_v58 = vld [vmem:[%s6323_s11 + $0xc4] ss:$8 sps:$4 sm:$0xff]  }
 0x74a   :  { %v1882_v27 = vpop.f32.mrb[86].mxu1  ;;  %2843 = vmatprep.subr.bf16.mxu0 %v5701_v58 }
 0x74b   :  { %v1917_v48 = vpack.c.bf16 %v1882_v27, %v1878_v11  ;;  %v1884_v43 = vpop.f32.mrb[87].mxu1  ;;  %v5713_v11 = vld [vmem:[%s6323_s11 + $0xc0] ss:$8 sps:$4 sm:$0xff]  }
 0x74c   :  { %v1918_v46 = vpack.c.bf16 %v1884_v43, %v1880_v31  ;;  %2451 = vmatpush1.bf16.msra.mxu1 %v4124_v12  ;;  %v4130_v31 = vld [vmem:[%s6321_s9 + $0x1b0] ss:$8 sps:$4 sm:$0xff]   ;;  %2844 = vmatpush1.bf16.msra.mxu0 %v5713_v11 }
 0x74d   :  { %2452 = vmatprep.subr.bf16.mxu1 %v4129_v49 }
 0x74e   :  { %2401 = vmatprep.mubr.bf16.mxu1 %v1918_v46  ;;  %v4135_v46 = vld [vmem:[%s6321_s9 + $0x1c4] ss:$8 sps:$4 sm:$0xff]  }
 0x74f   :  { %2402 = vmatmul.mubr.bf16.gmra.mrb[116].mxu1 %v1917_v48 }
 0x750   :  { %v1888_v12 = vpop.f32.mrb[88].mxu1  ;;  %2453 = vmatpush1.bf16.msra.mxu1 %v4127_v40  ;;  %v4133_v40 = vld [vmem:[%s6321_s9 + $0x1c0] ss:$8 sps:$4 sm:$0xff]  }
 0x751   :  { %v1890_v49 = vpop.f32.mrb[89].mxu1  ;;  %2454 = vmatprep.subr.bf16.mxu1 %v4132_v29  ;;  %v4138_v29 = vld [vmem:[%s6321_s9 + $0x1d4] ss:$8 sps:$4 sm:$0xff]  }
 0x752   :  { %v1892_v27 = vpop.f32.mrb[90].mxu1 }
 0x753   :  { %v1919_v43 = vpack.c.bf16 %v1892_v27, %v1888_v12  ;;  %v1894_v42 = vpop.f32.mrb[91].mxu1  ;;  %v4136_v12 = vld [vmem:[%s6321_s9 + $0x1d0] ss:$8 sps:$4 sm:$0xff]  }
 0x754   :  { %v1920_v48 = vpack.c.bf16 %v1894_v42, %v1890_v49  ;;  %2455 = vmatpush1.bf16.msra.mxu1 %v4130_v31  ;;  %v4141_v42 = vld [vmem:[%s6321_s9 + $0x1e4] ss:$8 sps:$4 sm:$0xff]  }
 0x755   :  { %2456 = vmatprep.subr.bf16.mxu1 %v4135_v46 }
 0x756   :  { %2411 = vmatprep.mubr.bf16.mxu1 %v1920_v48  ;;  %v4144_v48 = vld [vmem:[%s6321_s9 + $0x1f4] ss:$8 sps:$4 sm:$0xff]  }
 0x757   :  { %2412 = vmatmul.mubr.bf16.gmra.mrb[120].mxu1 %v1919_v43  ;;  %v4139_v43 = vld [vmem:[%s6321_s9 + $0x1e0] ss:$8 sps:$4 sm:$0xff]  }
 0x758   :  { %v1898_v9 = vpop.f32.mrb[92].mxu1  ;;  %2457 = vmatpush1.bf16.msra.mxu1 %v4133_v40 }
 0x759   :  { %v1900_v27 = vpop.f32.mrb[93].mxu1  ;;  %2458 = vmatprep.subr.bf16.mxu1 %v4138_v29  ;;  %v6417_v29 = vmax.f32 %v5181_v18, 0.0 }
 0x75a   :  { %v1902_v31 = vpop.f32.mrb[94].mxu1 }
 0x75b   :  { %v1921_v49 = vpack.c.bf16 %v1902_v31, %v1898_v9  ;;  %v1904_v46 = vpop.f32.mrb[95].mxu1  ;;  %v4142_v9 = vld [vmem:[%s6321_s9 + $0x1f0] ss:$8 sps:$4 sm:$0xff]  }
 0x75c   :  { %v1922_v45 = vpack.c.bf16 %v1904_v46, %v1900_v27  ;;  %2459 = vmatpush1.bf16.msra.mxu1 %v4136_v12 }
 0x75d   :  { %2460 = vmatprep.subr.bf16.mxu1 %v4141_v42 }
 0x75e   :  { %2421 = vmatprep.mubr.bf16.mxu1 %v1922_v45  ;;  %v4190_v45 = vld [vmem:[%s6323_s11 + $0xf0] ss:$8 sps:$4 sm:$0xff]  }
 0x75f   :  { %2422 = vmatmul.mubr.bf16.gmra.mrb[124].mxu1 %v1921_v49 }
 0x760   :  { %2461 = vmatpush1.bf16.msra.mxu1 %v4139_v43  ;;  %2464 = vmatprep.mubr.bf16.mxu1 %v5161_v51  ;;  %v4186_v51 = vld [vmem:[%s6323_s11 + $0xd4] ss:$8 sps:$4 sm:$0xff]  }
 0x761   :  { %2462 = vmatprep.subr.bf16.mxu1 %v4144_v48  ;;  %2845 = vmatprep.subr.bf16.mxu0 %v4186_v51 }
 0x764   :  { %2463 = vmatpush1.bf16.msra.mxu1 %v4142_v9 }
 0x765   :  { %3719 = vmatprep.subr.bf16.mxu1 %v5503_v41 }
 0x767   :  { %2465 = vmatmul.mubr.bf16.vlgmr.msra.gmra.mrb[96].mxu1 %v5167_v53  ;;  %v4184_v53 = vld [vmem:[%s6323_s11 + $0xd0] ss:$8 sps:$4 sm:$0xff]  }
 0x768   :  { %2474 = vmatprep.mubr.bf16.mxu1 %v5191_v26  ;;  %3735 = vmatpush1.bf16.msra.mxu1 %v5498_v50  ;;  %v4187_v26 = vld [vmem:[%s6323_s11 + $0xe0] ss:$8 sps:$4 sm:$0xff]  }
 0x769   :  { %3720 = vmatprep.subr.bf16.mxu1 %v5508_v36  ;;  %2846 = vmatpush1.bf16.msra.mxu0 %v4184_v53  ;;  %v6410_v36 = vmax.f32 %v5145_v33, 0.0 }
 0x76c   :  { %3736 = vmatpush1.bf16.msra.mxu1 %v5515_v1 }
 0x76d   :  { %3721 = vmatprep.subr.bf16.mxu1 %v5521_v14  ;;  %v6411_v14 = vmax.f32 %v5148_v56, 0.0 }
 0x76f   :  { %2475 = vmatmul.mubr.bf16.gmra.mrb[100].mxu1 %v5197_v37  ;;  %v4192_v37 = vld [vmem:[%s6323_s11 + $0xf4] ss:$8 sps:$4 sm:$0xff]  }
 0x770   :  { %2484 = vmatprep.mubr.bf16.mxu1 %v5221_v10  ;;  %3737 = vmatpush1.bf16.msra.mxu1 %v5533_v60  ;;  %v1987_v10 = vld [vmem:[%s6322_s10] sm:$0x3] }
 0x771   :  { %3722 = vmatprep.subr.bf16.mxu1 %v5539_v20  ;;  %v6412_v20 = vmax.f32 %v5142_v55, 0.0 }
 0x774   :  { %3738 = vmatpush1.bf16.msra.mxu1 %v5551_v5  ;;  %v4189_v5 = vld [vmem:[%s6323_s11 + $0xe4] ss:$8 sps:$4 sm:$0xff]  }
 0x775   :  { %3723 = vmatprep.subr.bf16.mxu1 %v5557_v21  ;;  %2847 = vmatprep.subr.bf16.mxu0 %v4189_v5 }
 0x776   :  { %2848 = vmatpush1.bf16.msra.mxu0 %v4187_v26 }
 0x777   :  { %2485 = vmatmul.mubr.bf16.gmra.mrb[104].mxu1 %v5227_v38  ;;  %2849 = vmatprep.subr.bf16.mxu0 %v4192_v37  ;;  %v5808_v38 = vrot.slane %v1987_v10, %v4776_v35 }
 0x778   :  { %2494 = vmatprep.mubr.bf16.mxu1 %v5251_v52  ;;  %3739 = vmatpush1.bf16.msra.mxu1 %v5569_v2  ;;  %v5811_v52 = vrot.slane %v1987_v10, %v4781_v39  ;;  %v6413_v2 = vmax.f32 %v5151_v25, 0.0 }
 0x779   :  { %3724 = vmatprep.subr.bf16.mxu1 %v5575_v63 }
 0x77a   :  { %2850 = vmatpush1.bf16.msra.mxu0 %v4190_v45 }
 0x77c   :  { %3740 = vmatpush1.bf16.msra.mxu1 %v5587_v0 }
 0x77d   :  { %3725 = vmatprep.subr.bf16.mxu1 %v5593_v13 }
 0x77f   :  { %2495 = vmatmul.mubr.bf16.gmra.mrb[108].mxu1 %v5257_v61 }
 0x780   :  { %2504 = vmatprep.mubr.bf16.mxu1 %v5281_v54  ;;  %3741 = vmatpush1.bf16.msra.mxu1 %v5605_v23  ;;  %v5813_v54 = vstv %s3477_s22 }
 0x781   :  { %3726 = vmatprep.subr.bf16.mxu1 %v5611_v16 }
 0x784   :  { %3742 = vmatpush1.bf16.msra.mxu1 %v5623_v30 }
 0x785   :  { %3727 = vmatprep.subr.bf16.mxu1 %v5629_v8 }
 0x787   :  { %2505 = vmatmul.mubr.bf16.gmra.mrb[112].mxu1 %v5287_v34 }
 0x788   :  { %2514 = vmatprep.mubr.bf16.mxu1 %v5311_v24  ;;  %3743 = vmatpush1.bf16.msra.mxu1 %v5641_v19 }
 0x789   :  { %3728 = vmatprep.subr.bf16.mxu1 %v5647_v28 }
 0x78c   :  { %3744 = vmatpush1.bf16.msra.mxu1 %v5659_v6 }
 0x78d   :  { %3729 = vmatprep.subr.bf16.mxu1 %v5665_v47 }
 0x78f   :  { %2515 = vmatmul.mubr.bf16.gmra.mrb[116].mxu1 %v5317_v4 }
 0x790   :  { %2524 = vmatprep.mubr.bf16.mxu1 %v5341_v7  ;;  %3745 = vmatpush1.bf16.msra.mxu1 %v5677_v44  ;;  %v6414_v44 = vmax.f32 %v5174_v17, 0.0 }
 0x791   :  { %3730 = vmatprep.subr.bf16.mxu1 %v5683_v3 }
 0x794   :  { %3746 = vmatpush1.bf16.msra.mxu1 %v5695_v57  ;;  %v6415_v57 = vmax.f32 %v5177_v62, 0.0 }
 0x795   :  { %3731 = vmatprep.subr.bf16.mxu1 %v5701_v58 }
 0x797   :  { %2525 = vmatmul.mubr.bf16.gmra.mrb[120].mxu1 %v5347_v32 }
 0x798   :  { %2534 = vmatprep.mubr.bf16.mxu1 %v5371_v22  ;;  %3747 = vmatpush1.bf16.msra.mxu1 %v5713_v11  ;;  %v6416_v11 = vmax.f32 %v5170_v15, 0.0 }
 0x799   :  { %3732 = vmatprep.subr.bf16.mxu1 %v4186_v51 }
 0x79c   :  { %3748 = vmatpush1.bf16.msra.mxu1 %v4184_v53 }
 0x79d   :  { %3733 = vmatprep.subr.bf16.mxu1 %v4189_v5  ;;  %v6418_v5 = vld [vmem:[#allocation6_spill] sm:$0xff] }
 0x79f   :  { %2535 = vmatmul.mubr.bf16.gmra.mrb[124].mxu1 %v5380_v59 }
 0x7a0   :  { %3749 = vmatpush1.bf16.msra.mxu1 %v4187_v26  ;;  %v6419_v26 = vmax.f32 %v6418_v5, 0.0  ;;  %v6440_v5 = vld [vmem:[#allocation16_spill] sm:$0xff] }
 0x7a1   :  { %3734 = vmatprep.subr.bf16.mxu1 %v4192_v37 }
 0x7a4   :  { %3750 = vmatpush1.bf16.msra.mxu1 %v4190_v45  ;;  %v6420_v45 = vld [vmem:[#allocation7_spill] sm:$0xff] }
 0x7a5   :  { %v6421_v10 = vmax.f32 %v6420_v45, 0.0 }
 0x83a   :  { %v2466_v61 = vpop.f32.mrb[96].mxu1 }
 0x83b   :  { %v3783_v34 = vadd.f32 %v2466_v61, %v5808_v38  ;;  %v2468_v24 = vpop.f32.mrb[97].mxu1 }
 0x83c   :  { %v3784_v4 = vadd.f32 %v2468_v24, %v5811_v52  ;;  %v2470_v7 = vpop.f32.mrb[98].mxu1 }
 0x83d   :  { %v2547_v32 = vmul.f32 %v3783_v34, %v5813_v54  ;;  %v3785_v22 = vadd.f32 %v2470_v7, %v5808_v38  ;;  %v2472_v59 = vpop.f32.mrb[99].mxu1  ;;  %v6422_v34 = vld [vmem:[#allocation5_spill] sm:$0xff]  ;;  %v6424_v7 = vld [vmem:[#allocation8_spill] sm:$0xff] }
 0x83e   :  { %v2548_v35 = vmul.f32 %v3784_v4, %v5813_v54  ;;  %v3786_v50 = vadd.f32 %v2472_v59, %v5811_v52  ;;  %v6423_v24 = vmax.f32 %v6422_v34, 0.0 }
 0x83f   :  { %v2549_v39 = vmul.f32 %v3785_v22, %v5813_v54  ;;  %v2579_v1 = vadd.f32 %v2547_v32, %v6410_v36  ;;  %v6425_v32 = vmax.f32 %v6424_v7, 0.0 }
 0x840   :  { %v2550_v41 = vmul.f32 %v3786_v50, %v5813_v54  ;;  %v2580_v21 = vadd.f32 %v2548_v35, %v6412_v20 }
 0x841   :  { %v2581_v60 = vadd.f32 %v2549_v39, %v6411_v14 }
 0x842   :  { %v2582_v63 = vadd.f32 %v2550_v41, %v6413_v2  ;;  %v2476_v0 = vpop.f32.mrb[100].mxu1 }
 0x843   :  { %v2611_v13 = vpack.c.bf16 %v2581_v60, %v2579_v1  ;;  %v3787_v23 = vadd.f32 %v2476_v0, %v5808_v38  ;;  %v2478_v16 = vpop.f32.mrb[101].mxu1 }
 0x844   :  { %v3788_v30 = vadd.f32 %v2478_v16, %v5811_v52  ;;  %v2480_v8 = vpop.f32.mrb[102].mxu1  ;;  %v2612_v19 = vpack.c.bf16 %v2582_v63, %v2580_v21 }
 0x845   :  { %v2551_v33 = vmul.f32 %v3787_v23, %v5813_v54  ;;  %v3789_v56 = vadd.f32 %v2480_v8, %v5808_v38  ;;  %v2482_v28 = vpop.f32.mrb[103].mxu1 }
 0x846   :  { %v2552_v55 = vmul.f32 %v3788_v30, %v5813_v54  ;;  %v3790_v6 = vadd.f32 %v2482_v28, %v5811_v52  ;;  %2851 = vmatprep.mubr.bf16.mxu0 %v2612_v19  ;;  %v6428_v30 = vld [vmem:[#allocation11_spill] sm:$0xff] }
 0x847   :  { %v2553_v25 = vmul.f32 %v3789_v56, %v5813_v54  ;;  %2852 = vmatmul.mubr.bf16.vlgmr.msra.gmra.mrb[96].mxu0 %v2611_v13  ;;  %v2583_v3 = vadd.f32 %v2551_v33, %v6414_v44  ;;  %v6426_v13 = vld [vmem:[#allocation10_spill] sm:$0xff]  ;;  %v6429_v8 = vmax.f32 %v6428_v30, 0.0  ;;  %v6430_v33 = vld [vmem:[#allocation9_spill] sm:$0xff] }
 0x848   :  { %v2554_v47 = vmul.f32 %v3790_v6, %v5813_v54  ;;  %v2584_v40 = vadd.f32 %v2552_v55, %v6416_v11  ;;  %v6427_v23 = vmax.f32 %v6426_v13, 0.0  ;;  %v6431_v56 = vmax.f32 %v6430_v33, 0.0  ;;  %v6432_v55 = vld [vmem:[#allocation12_spill] sm:$0xff] }
 0x849   :  { %v2585_v58 = vadd.f32 %v2553_v25, %v6415_v57  ;;  %v6433_v6 = vmax.f32 %v6432_v55, 0.0  ;;  %v6448_v13 = vld [vmem:[#allocation20_spill] sm:$0xff] }
 0x84a   :  { %v2586_v12 = vadd.f32 %v2554_v47, %v6417_v29  ;;  %v2486_v27 = vpop.f32.mrb[104].mxu1 }
 0x84b   :  { %v3791_v42 = vadd.f32 %v2486_v27, %v5808_v38  ;;  %v2488_v31 = vpop.f32.mrb[105].mxu1  ;;  %v2613_v49 = vpack.c.bf16 %v2585_v58, %v2583_v3 }
 0x84c   :  { %v3792_v46 = vadd.f32 %v2488_v31, %v5811_v52  ;;  %v2490_v43 = vpop.f32.mrb[106].mxu1  ;;  %v2614_v48 = vpack.c.bf16 %v2586_v12, %v2584_v40 }
 0x84d   :  { %v2555_v17 = vmul.f32 %v3791_v42, %v5813_v54  ;;  %v3793_v62 = vadd.f32 %v2490_v43, %v5808_v38  ;;  %v2492_v9 = vpop.f32.mrb[107].mxu1  ;;  %v6434_v43 = vld [vmem:[#allocation14_spill] sm:$0xff] }
 0x84e   :  { %v2556_v15 = vmul.f32 %v3792_v46, %v5813_v54  ;;  %v3794_v51 = vadd.f32 %v2492_v9, %v5811_v52  ;;  %2861 = vmatprep.mubr.bf16.mxu0 %v2614_v48  ;;  %v6435_v48 = vmax.f32 %v6434_v43, 0.0 }
 0x84f   :  { %v2557_v18 = vmul.f32 %v3793_v62, %v5813_v54  ;;  %2862 = vmatmul.mubr.bf16.gmra.mrb[100].mxu0 %v2613_v49  ;;  %v2587_v37 = vadd.f32 %v2555_v17, %v6419_v26  ;;  %v6436_v62 = vld [vmem:[#allocation15_spill] sm:$0xff]  ;;  %v6441_v26 = vmax.f32 %v6440_v5, 0.0 }
 0x850   :  { %v2558_v53 = vmul.f32 %v3794_v51, %v5813_v54  ;;  %v2588_v4 = vadd.f32 %v2556_v15, %v6423_v24  ;;  %v6437_v9 = vmax.f32 %v6436_v62, 0.0  ;;  %v6438_v51 = vld [vmem:[#allocation13_spill] sm:$0xff] }
 0x851   :  { %v2589_v61 = vadd.f32 %v2557_v18, %v6421_v10  ;;  %v6439_v18 = vmax.f32 %v6438_v51, 0.0 }
 0x852   :  { %v2590_v22 = vadd.f32 %v2558_v53, %v6425_v32  ;;  %v2496_v59 = vpop.f32.mrb[108].mxu1 }
 0x853   :  { %v3795_v35 = vadd.f32 %v2496_v59, %v5808_v38  ;;  %v2498_v50 = vpop.f32.mrb[109].mxu1  ;;  %v2615_v39 = vpack.c.bf16 %v2589_v61, %v2587_v37 }
 0x854   :  { %v3796_v41 = vadd.f32 %v2498_v50, %v5811_v52  ;;  %v2500_v36 = vpop.f32.mrb[110].mxu1  ;;  %v2616_v1 = vpack.c.bf16 %v2590_v22, %v2588_v4 }
 0x855   :  { %v2559_v14 = vmul.f32 %v3795_v35, %v5813_v54  ;;  %v3797_v60 = vadd.f32 %v2500_v36, %v5808_v38  ;;  %v2502_v20 = vpop.f32.mrb[111].mxu1  ;;  %v6442_v36 = vld [vmem:[#allocation18_spill] sm:$0xff] }
 0x856   :  { %v2560_v21 = vmul.f32 %v3796_v41, %v5813_v54  ;;  %v3798_v2 = vadd.f32 %v2502_v20, %v5811_v52  ;;  %2871 = vmatprep.mubr.bf16.mxu0 %v2616_v1  ;;  %v6443_v1 = vmax.f32 %v6442_v36, 0.0  ;;  %v6464_v36 = vld [vmem:[#allocation28_spill] sm:$0xff] }
 0x857   :  { %v2561_v63 = vmul.f32 %v3797_v60, %v5813_v54  ;;  %2872 = vmatmul.mubr.bf16.gmra.mrb[104].mxu0 %v2615_v39  ;;  %v2591_v16 = vadd.f32 %v2559_v14, %v6427_v23  ;;  %v6444_v60 = vld [vmem:[#allocation19_spill] sm:$0xff]  ;;  %v6449_v23 = vmax.f32 %v6448_v13, 0.0 }
 0x858   :  { %v2562_v0 = vmul.f32 %v3798_v2, %v5813_v54  ;;  %v2592_v28 = vadd.f32 %v2560_v21, %v6431_v56  ;;  %v6445_v20 = vmax.f32 %v6444_v60, 0.0  ;;  %v6446_v2 = vld [vmem:[#allocation17_spill] sm:$0xff] }
 0x859   :  { %v2593_v19 = vadd.f32 %v2561_v63, %v6429_v8  ;;  %v6447_v63 = vmax.f32 %v6446_v2, 0.0 }
 0x85a   :  { %v2594_v25 = vadd.f32 %v2562_v0, %v6433_v6  ;;  %v2506_v47 = vpop.f32.mrb[112].mxu1 }
 0x85b   :  { %v3799_v44 = vadd.f32 %v2506_v47, %v5808_v38  ;;  %v2508_v3 = vpop.f32.mrb[113].mxu1  ;;  %v2617_v57 = vpack.c.bf16 %v2593_v19, %v2591_v16 }
 0x85c   :  { %v3800_v58 = vadd.f32 %v2508_v3, %v5811_v52  ;;  %v2510_v11 = vpop.f32.mrb[114].mxu1  ;;  %v2618_v40 = vpack.c.bf16 %v2594_v25, %v2592_v28 }
 0x85d   :  { %v2563_v29 = vmul.f32 %v3799_v44, %v5813_v54  ;;  %v3801_v12 = vadd.f32 %v2510_v11, %v5808_v38  ;;  %v2512_v27 = vpop.f32.mrb[115].mxu1  ;;  %v4265_v11 = vld [vmem:[%s6313_s1] sm:$0xff]  }
 0x85e   :  { %v2564_v42 = vmul.f32 %v3800_v58, %v5813_v54  ;;  %v3802_v31 = vadd.f32 %v2512_v27, %v5811_v52  ;;  %2881 = vmatprep.mubr.bf16.mxu0 %v2618_v40  ;;  %v6450_v40 = vld [vmem:[#allocation22_spill] sm:$0xff]  ;;  %v6452_v27 = vld [vmem:[#allocation23_spill] sm:$0xff] }
 0x85f   :  { %v2565_v49 = vmul.f32 %v3801_v12, %v5813_v54  ;;  %2882 = vmatmul.mubr.bf16.gmra.mrb[108].mxu0 %v2617_v57  ;;  %v2595_v17 = vadd.f32 %v2563_v29, %v6435_v48  ;;  %v6451_v29 = vmax.f32 %v6450_v40, 0.0  ;;  %v6456_v48 = vld [vmem:[#allocation24_spill] sm:$0xff] }
 0x860   :  { %v2566_v46 = vmul.f32 %v3802_v31, %v5813_v54  ;;  %v2596_v53 = vadd.f32 %v2564_v42, %v6439_v18  ;;  %v6453_v42 = vmax.f32 %v6452_v27, 0.0 }
 0x861   :  { %v2597_v15 = vadd.f32 %v2565_v49, %v6437_v9  ;;  %v6454_v49 = vld [vmem:[#allocation21_spill] sm:$0xff] }
 0x862   :  { %v2598_v37 = vadd.f32 %v2566_v46, %v6441_v26  ;;  %v2516_v45 = vpop.f32.mrb[116].mxu1  ;;  %v6455_v46 = vmax.f32 %v6454_v49, 0.0 }
 0x863   :  { %v3803_v10 = vadd.f32 %v2516_v45, %v5808_v38  ;;  %v2518_v61 = vpop.f32.mrb[117].mxu1  ;;  %v2619_v34 = vpack.c.bf16 %v2597_v15, %v2595_v17  ;;  %v6457_v17 = vmax.f32 %v6456_v48, 0.0 }
 0x864   :  { %v3804_v24 = vadd.f32 %v2518_v61, %v5811_v52  ;;  %v2520_v4 = vpop.f32.mrb[118].mxu1  ;;  %v2620_v7 = vpack.c.bf16 %v2598_v37, %v2596_v53 }
 0x865   :  { %v2567_v32 = vmul.f32 %v3803_v10, %v5813_v54  ;;  %v3805_v22 = vadd.f32 %v2520_v4, %v5808_v38  ;;  %v2522_v59 = vpop.f32.mrb[119].mxu1 }
 0x866   :  { %v2568_v35 = vmul.f32 %v3804_v24, %v5813_v54  ;;  %v3806_v50 = vadd.f32 %v2522_v59, %v5811_v52  ;;  %2891 = vmatprep.mubr.bf16.mxu0 %v2620_v7  ;;  %v6458_v7 = vld [vmem:[#allocation26_spill] sm:$0xff]  ;;  %v6460_v59 = vld [vmem:[#allocation27_spill] sm:$0xff] }
 0x867   :  { %v2569_v39 = vmul.f32 %v3805_v22, %v5813_v54  ;;  %2892 = vmatmul.mubr.bf16.gmra.mrb[112].mxu0 %v2619_v34  ;;  %v2599_v14 = vadd.f32 %v2567_v32, %v6443_v1  ;;  %v6459_v32 = vmax.f32 %v6458_v7, 0.0  ;;  %v6465_v1 = vmax.f32 %v6464_v36, 0.0  ;;  %v6005_v7 = vld [vmem:[%s6324_s12] ss:$0 sm:$0xff] }
 0x868   :  { %v2570_v41 = vmul.f32 %v3806_v50, %v5813_v54  ;;  %v2600_v0 = vadd.f32 %v2568_v35, %v6447_v63  ;;  %v6461_v35 = vmax.f32 %v6460_v59, 0.0 }
 0x869   :  { %v2601_v21 = vadd.f32 %v2569_v39, %v6445_v20  ;;  %v6462_v39 = vld [vmem:[#allocation25_spill] sm:$0xff] }
 0x86a   :  { %v2602_v16 = vadd.f32 %v2570_v41, %v6449_v23  ;;  %v2526_v30 = vpop.f32.mrb[120].mxu1  ;;  %v6463_v41 = vmax.f32 %v6462_v39, 0.0 }
 0x86b   :  { %v3807_v8 = vadd.f32 %v2526_v30, %v5808_v38  ;;  %v2528_v19 = vpop.f32.mrb[121].mxu1  ;;  %v2621_v33 = vpack.c.bf16 %v2601_v21, %v2599_v14 }
 0x86c   :  { %v3808_v56 = vadd.f32 %v2528_v19, %v5811_v52  ;;  %v2530_v28 = vpop.f32.mrb[122].mxu1  ;;  %v2622_v55 = vpack.c.bf16 %v2602_v16, %v2600_v0 }
 0x86d   :  { %v2571_v6 = vmul.f32 %v3807_v8, %v5813_v54  ;;  %v3809_v25 = vadd.f32 %v2530_v28, %v5808_v38  ;;  %v2532_v47 = vpop.f32.mrb[123].mxu1 }
 0x86e   :  { %v2572_v44 = vmul.f32 %v3808_v56, %v5813_v54  ;;  %v3810_v3 = vadd.f32 %v2532_v47, %v5811_v52  ;;  %2901 = vmatprep.mubr.bf16.mxu0 %v2622_v55 }
 0x86f   :  { %v2573_v57 = vmul.f32 %v3809_v25, %v5813_v54  ;;  %2902 = vmatmul.mubr.bf16.gmra.mrb[116].mxu0 %v2621_v33  ;;  %v2603_v12 = vadd.f32 %v2571_v6, %v6451_v29 }
 0x870   :  { %v2574_v58 = vmul.f32 %v3810_v3, %v5813_v54  ;;  %3703 = vmatprep.mubr.bf16.mxu0 %v4265_v11  ;;  %v2604_v43 = vadd.f32 %v2572_v44, %v6455_v46 }
 0x871   :  { %v2605_v31 = vadd.f32 %v2573_v57, %v6453_v42 }
 0x872   :  { %v2606_v62 = vadd.f32 %v2574_v58, %v6457_v17  ;;  %v2536_v9 = vpop.f32.mrb[124].mxu1 }
 0x873   :  { %v2623_v15 = vpack.c.bf16 %v2605_v31, %v2603_v12  ;;  %v3811_v51 = vadd.f32 %v2536_v9, %v5808_v38  ;;  %v2538_v18 = vpop.f32.mrb[125].mxu1 }
 0x874   :  { %v3812_v53 = vadd.f32 %v2538_v18, %v5811_v52  ;;  %v2540_v5 = vpop.f32.mrb[126].mxu1  ;;  %v2624_v26 = vpack.c.bf16 %v2606_v62, %v2604_v43 }
 0x875   :  { %v2575_v37 = vmul.f32 %v3811_v51, %v5813_v54  ;;  %v3813_v45 = vadd.f32 %v2540_v5, %v5808_v38  ;;  %v2542_v10 = vpop.f32.mrb[127].mxu1  ;;  %v4267_v5 = vld [vmem:[%s6313_s1 + $0x10] sm:$0xff]  }
 0x876   :  { %v2576_v61 = vmul.f32 %v3812_v53, %v5813_v54  ;;  %v3814_v34 = vadd.f32 %v2542_v10, %v5811_v52  ;;  %2911 = vmatprep.mubr.bf16.mxu1 %v2624_v26  ;;  %v4266_v53 = vld [vmem:[%s6313_s1 + $0x8] sm:$0xff]   ;;  %v4268_v26 = vld [vmem:[%s6313_s1 + $0x18] sm:$0xff]   ;;  %v4271_v10 = vld [vmem:[%s6313_s1 + $0x30] sm:$0xff]  }
 0x877   :  { %v2577_v24 = vmul.f32 %v3813_v45, %v5813_v54  ;;  %2912 = vmatmul.mubr.bf16.vlgmr.msra.gmra.mrb[128].mxu1 %v2623_v15  ;;  %v2607_v22 = vadd.f32 %v2575_v37, %v6459_v32  ;;  %v4269_v37 = vld [vmem:[%s6313_s1 + $0x20] sm:$0xff]   ;;  %v4270_v45 = vld [vmem:[%s6313_s1 + $0x28] sm:$0xff]  }
 0x878   :  { %v2578_v4 = vmul.f32 %v3814_v34, %v5813_v54  ;;  %v2608_v38 = vadd.f32 %v2576_v61, %v6463_v41  ;;  %v4272_v61 = vld [vmem:[%s6313_s1 + $0x38] sm:$0xff]   ;;  %v6466_v34 = vlaneseq }
 0x879   :  { %v2609_v50 = vadd.f32 %v2577_v24, %v6461_v35 }
 0x87a   :  { %v2610_v14 = vadd.f32 %v2578_v4, %v6465_v1  ;;  %v6000_v24 = vand.u32 127, %v6466_v34 }
 0x87b   :  { %v2625_v60 = vpack.c.bf16 %v2609_v50, %v2607_v22 }
 0x87c   :  { %v2626_v52 = vpack.c.bf16 %v2610_v14, %v2608_v38  ;;  %vm3062_vm0 = vcmp.lt.s32.totalorder %v6000_v24, 40 }
 0x87e   :  { %2921 = vmatprep.mubr.bf16.mxu1 %v2626_v52 }
 0x87f   :  { %2922 = vmatmul.mubr.bf16.gmra.mrb[132].mxu1 %v2625_v60 }
 0x91a   :  { %v2853_v20 = vpop.f32.mrb[96].mxu0 }
 0x91b   :  { %v5946_v21 = vpop.f32.mrb[97].mxu0 }
 0x91c   :  { %v2857_v54 = vpop.f32.mrb[98].mxu0 }
 0x91d   :  { %v2932_v2 = vpack.c.bf16 %v2857_v54, %v2853_v20  ;;  %v5948_v63 = vpop.f32.mrb[99].mxu0 }
 0x91f   :  { %3687 = vmatprep.subr.bf16.mxu0 %v2932_v2 }
 0x920   :  { %3688 = vmatpush3.bf16.msra.mxu0 %v2932_v2 }
 0x922   :  { %v2863_v0 = vpop.f32.mrb[100].mxu0 }
 0x923   :  { %v5950_v13 = vpop.f32.mrb[101].mxu0 }
 0x924   :  { %v2867_v23 = vpop.f32.mrb[102].mxu0 }
 0x925   :  { %v2933_v16 = vpack.c.bf16 %v2867_v23, %v2863_v0  ;;  %v5952_v30 = vpop.f32.mrb[103].mxu0 }
 0x927   :  { %3689 = vmatprep.subr.bf16.mxu0 %v2933_v16 }
 0x928   :  { %3690 = vmatpush3.bf16.msra.mxu0 %v2933_v16 }
 0x92a   :  { %v2873_v8 = vpop.f32.mrb[104].mxu0 }
 0x92b   :  { %v5954_v19 = vpop.f32.mrb[105].mxu0 }
 0x92c   :  { %v2877_v33 = vpop.f32.mrb[106].mxu0 }
 0x92d   :  { %v2934_v56 = vpack.c.bf16 %v2877_v33, %v2873_v8  ;;  %v5956_v28 = vpop.f32.mrb[107].mxu0 }
 0x92f   :  { %3691 = vmatprep.subr.bf16.mxu0 %v2934_v56 }
 0x930   :  { %3692 = vmatpush3.bf16.msra.mxu0 %v2934_v56 }
 0x932   :  { %v2883_v55 = vpop.f32.mrb[108].mxu0 }
 0x933   :  { %v5958_v6 = vpop.f32.mrb[109].mxu0 }
 0x934   :  { %v2887_v25 = vpop.f32.mrb[110].mxu0 }
 0x935   :  { %v2935_v47 = vpack.c.bf16 %v2887_v25, %v2883_v55  ;;  %v5960_v44 = vpop.f32.mrb[111].mxu0 }
 0x937   :  { %3693 = vmatprep.subr.bf16.mxu0 %v2935_v47 }
 0x938   :  { %3694 = vmatpush3.bf16.msra.mxu0 %v2935_v47 }
 0x93a   :  { %v2893_v3 = vpop.f32.mrb[112].mxu0 }
 0x93b   :  { %v5962_v57 = vpop.f32.mrb[113].mxu0 }
 0x93c   :  { %v2897_v58 = vpop.f32.mrb[114].mxu0 }
 0x93d   :  { %v2936_v11 = vpack.c.bf16 %v2897_v58, %v2893_v3  ;;  %v5964_v40 = vpop.f32.mrb[115].mxu0 }
 0x93f   :  { %3695 = vmatprep.subr.bf16.mxu0 %v2936_v11 }
 0x940   :  { %3696 = vmatpush3.bf16.msra.mxu0 %v2936_v11 }
 0x942   :  { %v2903_v29 = vpop.f32.mrb[116].mxu0 }
 0x943   :  { %v5966_v12 = vpop.f32.mrb[117].mxu0 }
 0x944   :  { %v2907_v27 = vpop.f32.mrb[118].mxu0 }
 0x945   :  { %v2937_v42 = vpack.c.bf16 %v2907_v27, %v2903_v29  ;;  %v5968_v31 = vpop.f32.mrb[119].mxu0 }
 0x947   :  { %3697 = vmatprep.subr.bf16.mxu0 %v2937_v42 }
 0x948   :  { %3698 = vmatpush3.bf16.msra.mxu0 %v2937_v42 }
 0x94a   :  { %v2913_v49 = vpop.f32.mrb[128].mxu1 }
 0x94b   :  { %v5970_v46 = vpop.f32.mrb[129].mxu1 }
 0x94c   :  { %v2917_v43 = vpop.f32.mrb[130].mxu1 }
 0x94d   :  { %v2938_v48 = vpack.c.bf16 %v2917_v43, %v2913_v49  ;;  %v5972_v17 = vpop.f32.mrb[131].mxu1 }
 0x94f   :  { %3699 = vmatprep.subr.bf16.mxu0 %v2938_v48 }
 0x950   :  { %3700 = vmatpush3.bf16.msra.mxu0 %v2938_v48 }
 0x952   :  { %v2923_v62 = vpop.f32.mrb[132].mxu1 }
 0x953   :  { %v5974_v9 = vpop.f32.mrb[133].mxu1 }
 0x954   :  { %v2927_v15 = vpop.f32.mrb[134].mxu1 }
 0x955   :  { %v2939_v51 = vpack.c.bf16 %v2927_v15, %v2923_v62  ;;  %v5976_v18 = vpop.f32.mrb[135].mxu1 }
 0x957   :  { %3701 = vmatprep.subr.bf16.mxu0 %v2939_v51 }
 0x958   :  { %3702 = vmatpush3.bf16.msra.mxu0 %v2939_v51 }
 0x95b   :  { %3704 = vmatmul.mubr.bf16.vlgmr.msra.gmra.mrb[120].mxu0 %v4266_v53 }
 0x95c   :  { %3707 = vmatprep.mubr.bf16.mxu0 %v4267_v5 }
 0x963   :  { %3708 = vmatmul.mubr.bf16.gmra.mrb[124].mxu0 %v4268_v26 }
 0x964   :  { %3711 = vmatprep.mubr.bf16.mxu0 %v4269_v37 }
 0x96b   :  { %3712 = vmatmul.mubr.bf16.gmra.mrb[128].mxu0 %v4270_v45 }
 0x96c   :  { %3715 = vmatprep.mubr.bf16.mxu0 %v4271_v10 }
 0x973   :  { %3716 = vmatmul.mubr.bf16.gmra.mrb[132].mxu0 %v4272_v61 }
 0xa2e   :  { %v3705_v4 = vpop.f32.mrb[120].mxu0 }
 0xa2f   :  { %v2983_v32 = vadd.f32 %v3705_v4, %v5950_v13  ;;  %v2974_v22 = vpop.f32.mrb[121].mxu0 }
 0xa30   :  { %v2975_v59 = vadd.f32 %v2974_v22, %v5946_v21  ;;  %v3706_v35 = vpop.f32.mrb[122].mxu0 }
 0xa31   :  { %v2986_v50 = vadd.f32 %v3706_v35, %v5952_v30  ;;  %v2977_v39 = vpop.f32.mrb[123].mxu0  ;;  %v3046_v41 = vadd.f32 %v6005_v7, %v2983_v32 }
 0xa32   :  { %v2978_v38 = vadd.f32 %v2977_v39, %v5948_v63  ;;  %v3044_v36 = vadd.f32 %v6005_v7, %v2975_v59 }
 0xa33   :  { %v6016_v1 = vsel %vm3062_vm0, %v3046_v41, -inf  ;;  %v3047_v14 = vadd.f32 %v6005_v7, %v2986_v50 }
 0xa34   :  { %3083 = vmax.xlane.f32.xlu1 %v6016_v1  ;;  %v6022_v60 = vsel %vm3062_vm0, %v3044_v36, -inf  ;;  %v3045_v52 = vadd.f32 %v6005_v7, %v2978_v38 }
 0xa35   :  { %3079 = vmax.xlane.f32.xlu0 %v6022_v60  ;;  %v6029_v2 = vsel %vm3062_vm0, %v3047_v14, -inf }
 0xa36   :  { %v3709_v20 = vpop.f32.mrb[124].mxu0  ;;  %v6035_v13 = vsel %vm3062_vm0, %v3045_v52, -inf }
 0xa37   :  { %v2999_v21 = vadd.f32 %v3709_v20, %v5958_v6  ;;  %v2990_v54 = vpop.f32.mrb[125].mxu0 }
 0xa38   :  { %v2991_v63 = vadd.f32 %v2990_v54, %v5954_v19  ;;  %3085 = vmax.xlane.f32.xlu1 %v6029_v2  ;;  %v3710_v0 = vpop.f32.mrb[126].mxu0 }
 0xa39   :  { %v3002_v23 = vadd.f32 %v3710_v0, %v5960_v44  ;;  %v2993_v16 = vpop.f32.mrb[127].mxu0  ;;  %3081 = vmax.xlane.f32.xlu0 %v6035_v13  ;;  %v3050_v30 = vadd.f32 %v6005_v7, %v2999_v21 }
 0xa3a   :  { %v2994_v8 = vadd.f32 %v2993_v16, %v5956_v28  ;;  %v3048_v56 = vadd.f32 %v6005_v7, %v2991_v63 }
 0xa3b   :  { %v6043_v33 = vsel %vm3062_vm0, %v3050_v30, -inf  ;;  %v3051_v19 = vadd.f32 %v6005_v7, %v3002_v23 }
 0xa3c   :  { %v3049_v6 = vadd.f32 %v6005_v7, %v2994_v8  ;;  %v6058_v58 = vsel %vm3062_vm0, %v3048_v56, -inf }
 0xa3d   :  { %3091 = vmax.xlane.f32.xlu0 %v6043_v33  ;;  %v6050_v55 = vsel %vm3062_vm0, %v3051_v19, -inf }
 0xa3e   :  { %3093 = vmax.xlane.f32.xlu1 %v6050_v55  ;;  %v3713_v25 = vpop.f32.mrb[128].mxu0  ;;  %v6064_v27 = vsel %vm3062_vm0, %v3049_v6, -inf }
 0xa3f   :  { %v3015_v28 = vadd.f32 %v3713_v25, %v5966_v12  ;;  %v3006_v47 = vpop.f32.mrb[129].mxu0 }
 0xa40   :  { %v3007_v44 = vadd.f32 %v3006_v47, %v5962_v57  ;;  %v3714_v3 = vpop.f32.mrb[130].mxu0 }
 0xa41   :  { %v3018_v11 = vadd.f32 %v3714_v3, %v5968_v31  ;;  %v3009_v29 = vpop.f32.mrb[131].mxu0  ;;  %3087 = vmax.xlane.f32.xlu0 %v6058_v58  ;;  %v3054_v42 = vadd.f32 %v6005_v7, %v3015_v28 }
 0xa42   :  { %v3010_v12 = vadd.f32 %v3009_v29, %v5964_v40  ;;  %3089 = vmax.xlane.f32.xlu1 %v6064_v27  ;;  %v3052_v31 = vadd.f32 %v6005_v7, %v3007_v44 }
 0xa43   :  { %v6071_v57 = vsel %vm3062_vm0, %v3054_v42, -inf  ;;  %v3055_v49 = vadd.f32 %v6005_v7, %v3018_v11 }
 0xa44   :  { %v3053_v48 = vadd.f32 %v6005_v7, %v3010_v12  ;;  %v6086_v5 = vsel %vm3062_vm0, %v3052_v31, -inf }
 0xa45   :  { %3099 = vmax.xlane.f32.xlu0 %v6071_v57  ;;  %v6078_v43 = vsel %vm3062_vm0, %v3055_v49, -inf }
 0xa46   :  { %v3717_v62 = vpop.f32.mrb[132].mxu0  ;;  %3101 = vmax.xlane.f32.xlu1 %v6078_v43  ;;  %v6092_v45 = vsel %vm3062_vm0, %v3053_v48, -inf }
 0xa47   :  { %v3031_v40 = vadd.f32 %v3717_v62, %v5974_v9  ;;  %v3022_v15 = vpop.f32.mrb[133].mxu0 }
 0xa48   :  { %v3023_v51 = vadd.f32 %v3022_v15, %v5970_v46  ;;  %v3718_v53 = vpop.f32.mrb[134].mxu0 }
 0xa49   :  { %v3034_v26 = vadd.f32 %v3718_v53, %v5976_v18  ;;  %v3025_v37 = vpop.f32.mrb[135].mxu0  ;;  %3095 = vmax.xlane.f32.xlu0 %v6086_v5  ;;  %v3058_v18 = vadd.f32 %v6005_v7, %v3031_v40 }
 0xa4a   :  { %v3026_v10 = vadd.f32 %v3025_v37, %v5972_v17  ;;  %3097 = vmax.xlane.f32.xlu1 %v6092_v45  ;;  %v3056_v46 = vadd.f32 %v6005_v7, %v3023_v51 }
 0xa4b   :  { %v3059_v17 = vadd.f32 %v6005_v7, %v3034_v26  ;;  %v6112_v4 = vsel %vm3062_vm0, %v3058_v18, -inf }
 0xa4c   :  { %v6099_v9 = vsel %vm3062_vm0, %v3056_v46, -inf  ;;  %v3057_v61 = vadd.f32 %v6005_v7, %v3026_v10 }
 0xa4d   :  { %3103 = vmax.xlane.f32.xlu0 %v6099_v9  ;;  %v6117_v32 = vsel %vm3062_vm0, %v3059_v17, -inf }
 0xa4e   :  { %v6106_v34 = vsel %vm3062_vm0, %v3057_v61, -inf }
 0xa4f   :  { %3105 = vmax.xlane.f32.xlu1 %v6106_v34 }
 0xa51   :  { %3107 = vmax.xlane.f32.xlu0 %v6112_v4 }
 0xa53   :  { %3109 = vmax.xlane.f32.xlu1 %v6117_v32 }
 0xac1   :  { %v3084_v22 = vpop.xlane.xlu1 %3083 }
 0xac2   :  { %v6121_v59 = vsub.f32 %v6016_v1, %v3084_v22  ;;  %v3080_v35 = vpop.xlane.xlu0 %3079 }
 0xac3   :  { %v6124_v7 = vsub.f32 %v6022_v60, %v3080_v35 }
 0xac4   :  { %v3131_v50 = vmul.f32 1.442695, %v6121_v59 }
 0xac5   :  { %v3127_v39 = vmul.f32 1.442695, %v6124_v7  ;;  %v3086_v41 = vpop.xlane.xlu1 %3085 }
 0xac6   :  { %4193 = vpow2.f32 %v3131_v50  ;;  %v6129_v38 = vsub.f32 %v6029_v2, %v3086_v41  ;;  %v3082_v36 = vpop.xlane.xlu0 %3081 }
 0xac7   :  { %v6132_v14 = vsub.f32 %v6035_v13, %v3082_v36  ;;  %4195 = vpow2.f32 %v3127_v39 }
 0xac8   :  { %v3133_v1 = vmul.f32 1.442695, %v6129_v38 }
 0xac9   :  { %v3129_v52 = vmul.f32 1.442695, %v6132_v14 }
 0xaca   :  { %4197 = vpow2.f32 %v3133_v1  ;;  %v3092_v60 = vpop.xlane.xlu0 %3091 }
 0xacb   :  { %v6137_v20 = vsub.f32 %v6043_v33, %v3092_v60  ;;  %v3094_v21 = vpop.xlane.xlu1 %3093  ;;  %4199 = vpow2.f32 %v3129_v52 }
 0xacc   :  { %v6140_v54 = vsub.f32 %v6050_v55, %v3094_v21 }
 0xacd   :  { %v3139_v2 = vmul.f32 1.442695, %v6137_v20 }
 0xace   :  { %v3141_v63 = vmul.f32 1.442695, %v6140_v54  ;;  %v3088_v0 = vpop.xlane.xlu0 %3087 }
 0xacf   :  { %4201 = vpow2.f32 %v3139_v2  ;;  %v6145_v13 = vsub.f32 %v6058_v58, %v3088_v0  ;;  %v3090_v23 = vpop.xlane.xlu1 %3089 }
 0xad0   :  { %v4194_v16 = vpop.eup %4193  ;;  %4203 = vpow2.f32 %v3141_v63  ;;  %v6148_v30 = vsub.f32 %v6064_v27, %v3090_v23 }
 0xad1   :  { %v3135_v8 = vmul.f32 1.442695, %v6145_v13  ;;  %v3161_v33 = vsel %vm3062_vm0, %v4194_v16, 0.0  ;;  %v4196_v19 = vpop.eup %4195 }
 0xad2   :  { %v3137_v56 = vmul.f32 1.442695, %v6148_v30  ;;  %3179 = vadd.xlane.f32.xlu0 %v3161_v33  ;;  %v3100_v55 = vpop.xlane.xlu0 %3099  ;;  %v3159_v58 = vsel %vm3062_vm0, %v4196_v19, 0.0 }
 0xad3   :  { %4205 = vpow2.f32 %v3135_v8  ;;  %v6155_v6 = vsub.f32 %v6071_v57, %v3100_v55  ;;  %v3102_v25 = vpop.xlane.xlu1 %3101 }
 0xad4   :  { %v4198_v28 = vpop.eup %4197  ;;  %4207 = vpow2.f32 %v3137_v56  ;;  %v6158_v47 = vsub.f32 %v6078_v43, %v3102_v25 }
 0xad5   :  { %v3147_v44 = vmul.f32 1.442695, %v6155_v6  ;;  %v3162_v3 = vsel %vm3062_vm0, %v4198_v28, 0.0  ;;  %v4200_v11 = vpop.eup %4199 }
 0xad6   :  { %v3149_v29 = vmul.f32 1.442695, %v6158_v47  ;;  %3181 = vadd.xlane.f32.xlu1 %v3162_v3  ;;  %3175 = vadd.xlane.f32.xlu0 %v3159_v58  ;;  %v3096_v27 = vpop.xlane.xlu0 %3095  ;;  %v3160_v43 = vsel %vm3062_vm0, %v4200_v11, 0.0 }
 0xad7   :  { %4209 = vpow2.f32 %v3147_v44  ;;  %v6167_v42 = vsub.f32 %v6086_v5, %v3096_v27  ;;  %v3098_v12 = vpop.xlane.xlu1 %3097 }
 0xad8   :  { %4211 = vpow2.f32 %v3149_v29  ;;  %v6170_v57 = vsub.f32 %v6092_v45, %v3098_v12 }
 0xad9   :  { %v4202_v49 = vpop.eup %4201  ;;  %v3143_v31 = vmul.f32 1.442695, %v6167_v42 }
 0xada   :  { %v4204_v48 = vpop.eup %4203  ;;  %v3145_v62 = vmul.f32 1.442695, %v6170_v57  ;;  %3177 = vadd.xlane.f32.xlu1 %v3160_v43  ;;  %v3104_v40 = vpop.xlane.xlu0 %3103  ;;  %v3165_v15 = vsel %vm3062_vm0, %v4202_v49, 0.0 }
 0xadb   :  { %4213 = vpow2.f32 %v3143_v31  ;;  %v6179_v51 = vsub.f32 %v6099_v9, %v3104_v40  ;;  %3187 = vadd.xlane.f32.xlu0 %v3165_v15  ;;  %v3166_v45 = vsel %vm3062_vm0, %v4204_v48, 0.0 }
 0xadc   :  { %4215 = vpow2.f32 %v3145_v62  ;;  %v3106_v53 = vpop.xlane.xlu1 %3105 }
 0xadd   :  { %v4206_v5 = vpop.eup %4205  ;;  %v3151_v26 = vmul.f32 1.442695, %v6179_v51  ;;  %v6183_v37 = vsub.f32 %v6106_v34, %v3106_v53 }
 0xade   :  { %v4208_v10 = vpop.eup %4207  ;;  %3189 = vadd.xlane.f32.xlu1 %v3166_v45  ;;  %v3108_v46 = vpop.xlane.xlu0 %3107  ;;  %v3163_v61 = vsel %vm3062_vm0, %v4206_v5, 0.0 }
 0xadf   :  { %4217 = vpow2.f32 %v3151_v26  ;;  %v3153_v9 = vmul.f32 1.442695, %v6183_v37  ;;  %v6191_v18 = vsub.f32 %v6112_v4, %v3108_v46  ;;  %3183 = vadd.xlane.f32.xlu0 %v3163_v61  ;;  %v3164_v50 = vsel %vm3062_vm0, %v4208_v10, 0.0 }
 0xae0   :  { %v3110_v17 = vpop.xlane.xlu1 %3109 }
 0xae1   :  { %v4210_v22 = vpop.eup %4209  ;;  %4219 = vpow2.f32 %v3153_v9  ;;  %v3155_v34 = vmul.f32 1.442695, %v6191_v18  ;;  %v6195_v35 = vsub.f32 %v6117_v32, %v3110_v17 }
 0xae2   :  { %v4212_v39 = vpop.eup %4211  ;;  %3185 = vadd.xlane.f32.xlu1 %v3164_v50  ;;  %v3169_v41 = vsel %vm3062_vm0, %v4210_v22, 0.0 }
 0xae3   :  { %4221 = vpow2.f32 %v3155_v34  ;;  %v3157_v4 = vmul.f32 1.442695, %v6195_v35  ;;  %3195 = vadd.xlane.f32.xlu0 %v3169_v41  ;;  %v3170_v1 = vsel %vm3062_vm0, %v4212_v39, 0.0 }
 0xae5   :  { %v4214_v36 = vpop.eup %4213  ;;  %4223 = vpow2.f32 %v3157_v4 }
 0xae6   :  { %v4216_v52 = vpop.eup %4215  ;;  %3197 = vadd.xlane.f32.xlu1 %v3170_v1  ;;  %v3167_v32 = vsel %vm3062_vm0, %v4214_v36, 0.0 }
 0xae7   :  { %3191 = vadd.xlane.f32.xlu0 %v3167_v32  ;;  %v3168_v21 = vsel %vm3062_vm0, %v4216_v52, 0.0 }
 0xae9   :  { %v4218_v60 = vpop.eup %4217 }
 0xaea   :  { %3193 = vadd.xlane.f32.xlu1 %v3168_v21  ;;  %v3171_v2 = vsel %vm3062_vm0, %v4218_v60, 0.0 }
 0xaeb   :  { %v4220_v63 = vpop.eup %4219  ;;  %3199 = vadd.xlane.f32.xlu0 %v3171_v2 }
 0xaec   :  { %v3172_v0 = vsel %vm3062_vm0, %v4220_v63, 0.0 }
 0xaed   :  { %v4222_v23 = vpop.eup %4221 }
 0xaee   :  { %3201 = vadd.xlane.f32.xlu1 %v3172_v0  ;;  %v3173_v16 = vsel %vm3062_vm0, %v4222_v23, 0.0 }
 0xaef   :  { %v4224_v8 = vpop.eup %4223  ;;  %3203 = vadd.xlane.f32.xlu0 %v3173_v16 }
 0xaf0   :  { %v3174_v33 = vsel %vm3062_vm0, %v4224_v8, 0.0 }
 0xaf2   :  { %3205 = vadd.xlane.f32.xlu1 %v3174_v33 }
 0xb5f   :  { %v3180_v19 = vpop.xlane.xlu0 %3179 }
 0xb60   :  { %4225 = vlog2.f32 %v3180_v19 }
 0xb63   :  { %v3182_v56 = vpop.xlane.xlu1 %3181  ;;  %v3176_v55 = vpop.xlane.xlu0 %3175 }
 0xb64   :  { %4227 = vlog2.f32 %v3182_v56 }
 0xb65   :  { %4229 = vlog2.f32 %v3176_v55 }
 0xb67   :  { %v3178_v25 = vpop.xlane.xlu1 %3177 }
 0xb68   :  { %4231 = vlog2.f32 %v3178_v25  ;;  %v3188_v28 = vpop.xlane.xlu0 %3187 }
 0xb69   :  { %4233 = vlog2.f32 %v3188_v28 }
 0xb6a   :  { %v4226_v44 = vpop.eup %4225 }
 0xb6b   :  { %v3212_v3 = vmul.f32 0.6931472, %v4226_v44  ;;  %v3190_v58 = vpop.xlane.xlu1 %3189 }
 0xb6c   :  { %4235 = vlog2.f32 %v3190_v58  ;;  %v3184_v11 = vpop.xlane.xlu0 %3183 }
 0xb6d   :  { %v3241_v29 = vsub.f32 %v6121_v59, %v3212_v3  ;;  %4237 = vlog2.f32 %v3184_v11 }
 0xb6e   :  { %v4228_v27 = vpop.eup %4227 }
 0xb6f   :  { %v4230_v12 = vpop.eup %4229  ;;  %v3257_v49 = vsel %vm3062_vm0, %v3241_v29, 0.0  ;;  %v3214_v31 = vmul.f32 0.6931472, %v4228_v27  ;;  %v3186_v43 = vpop.xlane.xlu1 %3185 }
 0xb70   :  { %3273 = vst [vmem:[%s6325_s13 + $0x10] sm:$0xff] %v3257_v49  ;;  %v3208_v48 = vmul.f32 0.6931472, %v4230_v12  ;;  %4239 = vlog2.f32 %v3186_v43  ;;  %v3196_v62 = vpop.xlane.xlu0 %3195 }
 0xb71   :  { %v3242_v40 = vsub.f32 %v6129_v38, %v3214_v31  ;;  %4241 = vlog2.f32 %v3196_v62 }
 0xb72   :  { %v4232_v15 = vpop.eup %4231  ;;  %v3239_v59 = vsub.f32 %v6124_v7, %v3208_v48 }
 0xb73   :  { %v4234_v53 = vpop.eup %4233  ;;  %v3258_v5 = vsel %vm3062_vm0, %v3242_v40, 0.0  ;;  %v3210_v26 = vmul.f32 0.6931472, %v4232_v15  ;;  %v3198_v45 = vpop.xlane.xlu1 %3197 }
 0xb74   :  { %3274 = vst [vmem:[%s6325_s13 + $0x18] sm:$0xff] %v3258_v5  ;;  %v3255_v10 = vsel %vm3062_vm0, %v3239_v59, 0.0  ;;  %v3220_v46 = vmul.f32 0.6931472, %v4234_v53  ;;  %4243 = vlog2.f32 %v3198_v45  ;;  %v3192_v38 = vpop.xlane.xlu0 %3191 }
 0xb75   :  { %3271 = vst [vmem:[%s6325_s13] sm:$0xff] %v3255_v10  ;;  %v3240_v7 = vsub.f32 %v6132_v14, %v3210_v26  ;;  %4245 = vlog2.f32 %v3192_v38 }
 0xb76   :  { %v4236_v61 = vpop.eup %4235  ;;  %v3245_v9 = vsub.f32 %v6137_v20, %v3220_v46 }
 0xb77   :  { %v4238_v17 = vpop.eup %4237  ;;  %v3256_v22 = vsel %vm3062_vm0, %v3240_v7, 0.0  ;;  %v3222_v34 = vmul.f32 0.6931472, %v4236_v61  ;;  %v3194_v50 = vpop.xlane.xlu1 %3193 }
 0xb78   :  { %3272 = vst [vmem:[%s6325_s13 + $0x8] sm:$0xff] %v3256_v22  ;;  %v3261_v39 = vsel %vm3062_vm0, %v3245_v9, 0.0  ;;  %v3216_v41 = vmul.f32 0.6931472, %v4238_v17  ;;  %4247 = vlog2.f32 %v3194_v50  ;;  %v3200_v14 = vpop.xlane.xlu0 %3199 }
 0xb79   :  { %3277 = vst [vmem:[%s6325_s13 + $0x30] sm:$0xff] %v3261_v39  ;;  %v3246_v20 = vsub.f32 %v6140_v54, %v3222_v34  ;;  %4249 = vlog2.f32 %v3200_v14 }
 0xb7a   :  { %v4240_v4 = vpop.eup %4239  ;;  %v3243_v36 = vsub.f32 %v6145_v13, %v3216_v41 }
 0xb7b   :  { %v4242_v1 = vpop.eup %4241  ;;  %v3262_v52 = vsel %vm3062_vm0, %v3246_v20, 0.0  ;;  %v3218_v32 = vmul.f32 0.6931472, %v4240_v4  ;;  %v3202_v60 = vpop.xlane.xlu1 %3201 }
 0xb7c   :  { %3278 = vst [vmem:[%s6325_s13 + $0x38] sm:$0xff] %v3262_v52  ;;  %v3259_v21 = vsel %vm3062_vm0, %v3243_v36, 0.0  ;;  %v3228_v2 = vmul.f32 0.6931472, %v4242_v1  ;;  %4251 = vlog2.f32 %v3202_v60  ;;  %v3204_v54 = vpop.xlane.xlu0 %3203 }
 0xb7d   :  { %3275 = vst [vmem:[%s6325_s13 + $0x20] sm:$0xff] %v3259_v21  ;;  %v3244_v13 = vsub.f32 %v6148_v30, %v3218_v32  ;;  %4253 = vlog2.f32 %v3204_v54 }
 0xb7e   :  { %v4244_v63 = vpop.eup %4243  ;;  %v3249_v0 = vsub.f32 %v6155_v6, %v3228_v2 }
 0xb7f   :  { %v4246_v23 = vpop.eup %4245  ;;  %v3260_v16 = vsel %vm3062_vm0, %v3244_v13, 0.0  ;;  %v3230_v8 = vmul.f32 0.6931472, %v4244_v63  ;;  %v3206_v33 = vpop.xlane.xlu1 %3205 }
 0xb80   :  { %3276 = vst [vmem:[%s6325_s13 + $0x28] sm:$0xff] %v3260_v16  ;;  %v3265_v19 = vsel %vm3062_vm0, %v3249_v0, 0.0  ;;  %v3224_v56 = vmul.f32 0.6931472, %v4246_v23  ;;  %4255 = vlog2.f32 %v3206_v33 }
 0xb81   :  { %3281 = vst [vmem:[%s6325_s13 + $0x50] sm:$0xff] %v3265_v19  ;;  %v3250_v30 = vsub.f32 %v6158_v47, %v3230_v8 }
 0xb82   :  { %v4248_v6 = vpop.eup %4247  ;;  %v3247_v55 = vsub.f32 %v6167_v42, %v3224_v56 }
 0xb83   :  { %v4250_v25 = vpop.eup %4249  ;;  %v3266_v28 = vsel %vm3062_vm0, %v3250_v30, 0.0  ;;  %v3226_v44 = vmul.f32 0.6931472, %v4248_v6 }
 0xb84   :  { %3282 = vst [vmem:[%s6325_s13 + $0x58] sm:$0xff] %v3266_v28  ;;  %v3263_v3 = vsel %vm3062_vm0, %v3247_v55, 0.0  ;;  %v3232_v58 = vmul.f32 0.6931472, %v4250_v25 }
 0xb85   :  { %3279 = vst [vmem:[%s6325_s13 + $0x40] sm:$0xff] %v3263_v3  ;;  %v3248_v47 = vsub.f32 %v6170_v57, %v3226_v44 }
 0xb86   :  { %v4252_v42 = vpop.eup %4251  ;;  %v3251_v11 = vsub.f32 %v6179_v51, %v3232_v58 }
 0xb87   :  { %v4254_v29 = vpop.eup %4253  ;;  %v3264_v27 = vsel %vm3062_vm0, %v3248_v47, 0.0  ;;  %v3234_v12 = vmul.f32 0.6931472, %v4252_v42 }
 0xb88   :  { %3280 = vst [vmem:[%s6325_s13 + $0x48] sm:$0xff] %v3264_v27  ;;  %v3267_v49 = vsel %vm3062_vm0, %v3251_v11, 0.0  ;;  %v3236_v31 = vmul.f32 0.6931472, %v4254_v29 }
 0xb89   :  { %3283 = vst [vmem:[%s6325_s13 + $0x60] sm:$0xff] %v3267_v49  ;;  %v3252_v57 = vsub.f32 %v6183_v37, %v3234_v12 }
 0xb8a   :  { %v4256_v51 = vpop.eup %4255  ;;  %v3253_v43 = vsub.f32 %v6191_v18, %v3236_v31 }
 0xb8b   :  { %v3268_v48 = vsel %vm3062_vm0, %v3252_v57, 0.0  ;;  %v3238_v62 = vmul.f32 0.6931472, %v4256_v51 }
 0xb8c   :  { %3284 = vst [vmem:[%s6325_s13 + $0x68] sm:$0xff] %v3268_v48  ;;  %v3269_v40 = vsel %vm3062_vm0, %v3253_v43, 0.0 }
 0xb8d   :  { %3285 = vst [vmem:[%s6325_s13 + $0x70] sm:$0xff] %v3269_v40  ;;  %v3254_v37 = vsub.f32 %v6195_v35, %v3238_v62 }
 0xb8f   :  { %v3270_v18 = vsel %vm3062_vm0, %v3254_v37, 0.0 }
 0xb90   :  { %3286 = vst [vmem:[%s6325_s13 + $0x78] sm:$0xff] %v3270_v18 }
 0xb91   :  { %3291 = vsyncpa [#allocation3], 1 }

</bundles_post_ra>
